<compile_context>
chip_gen: v6e
topology: v6e:2x2x1
jax: 0.10.0
libtpu: 0.0.40
codegen_flags: <defaults>
</compile_context>

<pallas_src>
import math
import jax
import jax.numpy as jnp
from jax import lax
from jax.experimental import pallas as pl
from jax.experimental.pallas import tpu as pltpu


# ----------------------------------------------------------------------------- small helpers

_MAX_TK = 6144                       # single K step for K<=6144 (covers K=4608 @ N=128)


def _round_up(x, m):
    return ((x + m - 1) // m) * m


def _pick_vmem_limit():
    """Generation-aware scoped VMEM limit (v5e/v6e: 128 MiB physical; v7x: 64 MiB)."""
    try:
        info = pltpu.get_tpu_info()
        cap = int(getattr(info, "vmem_capacity_bytes", 64 << 20))
    except Exception:
        cap = 64 << 20
    return (96 << 20) if cap >= (100 << 20) else (48 << 20)


_VMEM_LIMIT = _pick_vmem_limit()
_BIG_VMEM = _VMEM_LIMIT >= (90 << 20)


def _choose_tm(mp):
    """Row tile: big enough to amortize per-grid-step overhead; split small M into >=2
    tiles so the 'parallel' axis can shard across both v7x TensorCores."""
    target = 512 if _BIG_VMEM else 256
    if mp >= 2 * target:
        return target
    if mp <= 8:
        return 8
    return max(8, _round_up(-(-mp // 2), 8))


# ----------------------------------------------------------------------------- fused matmul kernel

def _make_fused_kernel(epilogue, *, phases=1, cout=0, pad_cols=0):
    has_gdn = epilogue in ("gdn", "igdn")

    def kernel(*refs):
        if has_gdn:
            x_ref, w_ref, b_ref, g_ref, bt_ref = refs[:5]
            out_refs = refs[5:-1]
        else:
            x_ref, w_ref, b_ref = refs[:3]
            out_refs = refs[3:-1]
        acc_ref = refs[-1]

        @pl.when(pl.program_id(1) == 0)
        def _init():
            acc_ref[...] = jnp.zeros_like(acc_ref)

        # bf16 operands, f32 accumulation on the MXU
        acc_ref[...] += jnp.dot(x_ref[...], w_ref[...],
                                preferred_element_type=jnp.float32)

        @pl.when(pl.program_id(1) == pl.num_programs(1) - 1)
        def _epilogue():
            acc = acc_ref[...] + b_ref[...]
            if epilogue == "gdn":        # y = x * rsqrt(beta + x^2 @ gamma^T)
                t = jnp.dot((acc * acc).astype(jnp.bfloat16), g_ref[...],
                            preferred_element_type=jnp.float32) + bt_ref[...]
                out_refs[0][...] = (acc * lax.rsqrt(t)).astype(out_refs[0].dtype)
            elif epilogue == "igdn":     # per-phase y = x * sqrt(beta + x^2 @ gamma^T)
                for p in range(phases):
                    a = acc[:, p * cout:(p + 1) * cout]
                    t = jnp.dot((a * a).astype(jnp.bfloat16), g_ref[...],
                                preferred_element_type=jnp.float32) + bt_ref[...]
                    out_refs[0][:, p * cout:(p + 1) * cout] = (
                        a * jnp.sqrt(t)).astype(out_refs[0].dtype)
                if pad_cols:
                    start = phases * cout
                    out_refs[0][:, start:start + pad_cols] = jnp.zeros(
                        (out_refs[0].shape[0], pad_cols), out_refs[0].dtype)
            elif epilogue == "clamp01":
                out_refs[0][...] = jnp.clip(acc, 0.0, 1.0).astype(out_refs[0].dtype)
            elif epilogue == "latent":   # feature + round(feature) from the same kernel
                out_refs[0][...] = acc.astype(out_refs[0].dtype)
                out_refs[1][...] = jnp.round(acc).astype(out_refs[1].dtype)
            else:
                out_refs[0][...] = acc.astype(out_refs[0].dtype)

    return kernel


def _fused_matmul(rows, w_mat, bias, *, epilogue, gamma_t=None, beta_row=None,
                  out_dtypes=(jnp.float32,), igdn_phases=1, igdn_cout=0):
    """(M,K)@(K,N)+b with the layer nonlinearity fused into the matmul epilogue."""
    M, K = rows.shape
    Kw, Nout = w_mat.shape
    assert Kw == K

    # ---- lane-dense output: pad N up to a multiple of 128 (zero columns, sliced off) ----
    Np = _round_up(Nout, 128)
    pad_n = Np - Nout
    if pad_n:
        w_mat = jnp.pad(w_mat, ((0, 0), (0, pad_n)))
        bias = jnp.pad(bias, (0, pad_n))
        if epilogue == "gdn":
            gamma_t = jnp.pad(gamma_t, ((0, pad_n), (0, pad_n)))
            beta_row = jnp.pad(beta_row, (0, pad_n), constant_values=1.0)
        # igdn: per-phase gamma stays (Cout, Cout); padded tail cols written as zeros in-kernel

    # ---- row tiling: pad M up to grid_m * tm (no "tm must divide M" requirement) ----
    tm = _choose_tm(_round_up(M, 8))
    grid_m = -(-M // tm)
    Mp = grid_m * tm
    if Mp != M:
        rows = jnp.pad(rows, ((0, Mp - M), (0, 0)))

    # ---- K tiling: single full-K step when it fits, otherwise 256-aligned K tiles ----
    if K <= _MAX_TK:
        nk, tk = 1, K
    else:
        nk = -(-K // _MAX_TK)
        tk = _round_up(-(-K // nk), 256)
        kp = tk * nk
        rows = jnp.pad(rows, ((0, 0), (0, kp - K)))
        w_mat = jnp.pad(w_mat, ((0, kp - K), (0, 0)))

    in_arrays = [rows.astype(jnp.bfloat16),
                 w_mat.astype(jnp.bfloat16),
                 bias.reshape(1, Np).astype(jnp.float32)]
    in_specs = [
        pl.BlockSpec((tm, tk), lambda i, k: (i, k)),
        pl.BlockSpec((tk, Np), lambda i, k: (k, 0)),
        pl.BlockSpec((1, Np), lambda i, k: (0, 0)),
    ]
    pad_cols = 0
    if epilogue in ("gdn", "igdn"):
        ng = gamma_t.shape[0]
        beta2 = beta_row.reshape(1, -1).astype(jnp.float32)
        in_arrays += [gamma_t.astype(jnp.bfloat16), beta2]
        in_specs += [
            pl.BlockSpec((ng, ng), lambda i, k: (0, 0)),
            pl.BlockSpec((1, beta2.shape[1]), lambda i, k: (0, 0)),
        ]
        if epilogue == "igdn":
            pad_cols = Np - igdn_phases * igdn_cout

    multi = len(out_dtypes) > 1
    out_shape = tuple(jax.ShapeDtypeStruct((Mp, Np), dt) for dt in out_dtypes)
    out_specs = tuple(pl.BlockSpec((tm, Np), lambda i, k: (i, 0)) for _ in out_dtypes)
    if not multi:
        out_shape, out_specs = out_shape[0], out_specs[0]

    out = pl.pallas_call(
        _make_fused_kernel(epilogue, phases=igdn_phases, cout=igdn_cout, pad_cols=pad_cols),
        out_shape=out_shape,
        grid=(grid_m, nk),
        in_specs=in_specs,
        out_specs=out_specs,
        scratch_shapes=[pltpu.VMEM((tm, Np), jnp.float32)],
        compiler_params=pltpu.CompilerParams(
            dimension_semantics=("parallel", "arbitrary"),
            vmem_limit_bytes=_VMEM_LIMIT,
        ),
    )(*in_arrays)

    if not multi:
        return out[:M, :Nout]
    return tuple(o[:M, :Nout] for o in out)


# ----------------------------------------------------------------------------- conv glue (weight rearrangement + 3x3 im2col)

def _im2col3x3(xp):
    """3x3 / stride-1 im2col.  xp: (B, H+2, W+2, C), already zero-padded by 1."""
    # TODO(synk): this is still XLA-materialized in HBM (9x replication of the activation).
    B, Hp, Wp, C = xp.shape
    H, W = Hp - 2, Wp - 2
    cols = [xp[:, dh:dh + H, dw:dw + W, :] for dh in range(3) for dw in range(3)]
    patches = jnp.stack(cols, axis=3)                   # (B, H, W, 9, C)
    return patches.reshape(B * H * W, 9 * C)


def _conv_weight_s2d(w_pt, s, pad):
    """Conv2d weight (Cout,Cin,k,k) -> (9*s*s*Cin, Cout) for the space-to-depth form:
    a kxk / stride-s conv == 3x3 / stride-1 conv over the s2d input (s*s*Cin channels)."""
    Cout, Cin, k, _ = w_pt.shape
    d = jnp.arange(3)[:, None]
    u = jnp.arange(s)[None, :]
    kk = s * (d - 1) + u + pad                          # original tap for (window pos, phase)
    valid = ((kk >= 0) & (kk < k)).reshape(-1)
    kkc = jnp.clip(kk, 0, k - 1).reshape(-1)            # (3*s,)
    w = jnp.transpose(w_pt, (2, 3, 1, 0))               # (k, k, Cin, Cout)
    w = w[kkc][:, kkc]                                  # (3s, 3s, Cin, Cout)
    mask = (valid[:, None] & valid[None, :]).astype(w.dtype)
    w = w * mask[:, :, None, None]
    w = w.reshape(3, s, 3, s, Cin, Cout).transpose(0, 2, 1, 3, 4, 5)   # (dh,dw,u,v,Cin,Cout)
    return w.reshape(9 * s * s * Cin, Cout)


def _deconv_weight_subpixel(w_t, s, pad):
    """ConvTranspose2d weight (Cin,Cout,k,k) -> (9*Cin, s*s*Cout) for the sub-pixel form:
    a kxk / stride-s transposed conv == 3x3 / stride-1 conv emitting one column block per
    output phase (pixel-shuffled afterwards)."""
    Cin, Cout, k, _ = w_t.shape
    m = jnp.arange(3)[:, None]
    r = jnp.arange(s)[None, :]
    kk = s * (1 - m) + r + pad                          # kernel tap for (window pos, phase)
    valid = ((kk >= 0) & (kk < k)).reshape(-1)
    kkc = jnp.clip(kk, 0, k - 1).reshape(-1)            # (3*s,)
    w = jnp.transpose(w_t, (2, 3, 0, 1))                # (k, k, Cin, Cout)
    w = w[kkc][:, kkc]                                  # (3s, 3s, Cin, Cout)
    mask = (valid[:, None] & valid[None, :]).astype(w.dtype)
    w = w * mask[:, :, None, None]
    w = w.reshape(3, s, 3, s, Cin, Cout).transpose(0, 2, 4, 1, 3, 5)   # (mh,mw,Cin,rh,rw,Cout)
    return w.reshape(9 * Cin, s * s * Cout)


def conv_gdn_fused(x_nhwc, w_pt, b, *, k, s, pad, epilogue,
                   gamma=None, beta=None, out_dtypes=(jnp.bfloat16,)):
    """Strided Conv2d with fused GDN / latent-round epilogue, as one Pallas matmul."""
    B, H, W, Cin = x_nhwc.shape
    Cout = w_pt.shape[0]
    assert H % s == 0 and W % s == 0
    assert (pad + s - 1) // s == 1 and (k - 1 - pad) // s == 1    # 3x3 window after s2d
    Hq, Wq = H // s, W // s
    x = x_nhwc.reshape(B, Hq, s, Wq, s, Cin).transpose(0, 1, 3, 2, 4, 5)
    x = x.reshape(B, Hq, Wq, s * s * Cin)
    xp = jnp.pad(x, ((0, 0), (1, 1), (1, 1), (0, 0)))
    rows = _im2col3x3(xp)
    w_mat = _conv_weight_s2d(w_pt, s, pad)
    gamma_t = None if gamma is None else jnp.transpose(gamma)
    out = _fused_matmul(rows, w_mat, b, epilogue=epilogue,
                        gamma_t=gamma_t, beta_row=beta, out_dtypes=out_dtypes)
    if len(out_dtypes) == 1:
        return out.reshape(B, Hq, Wq, Cout)
    return tuple(o.reshape(B, Hq, Wq, Cout) for o in out)


def deconv_fused(x_nhwc, w_t, b, *, k, s, pad, opad, epilogue,
                 gamma=None, beta=None, out_dtype=jnp.bfloat16):
    """ConvTranspose2d with fused IGDN / clamp epilogue (sub-pixel form + pixel shuffle)."""
    B, Hq, Wq, Cin = x_nhwc.shape
    Cout = w_t.shape[1]
    assert opad == s + 2 * pad - k            # output is exactly (s*Hq, s*Wq)
    xp = jnp.pad(x_nhwc, ((0, 0), (1, 1), (1, 1), (0, 0)))
    rows = _im2col3x3(xp)
    w_mat = _deconv_weight_subpixel(w_t, s, pad)        # (9*Cin, s*s*Cout)
    bias = jnp.tile(b, s * s)
    gamma_t = None if gamma is None else jnp.transpose(gamma)   # per-phase (Cout, Cout)

    out_rows = _fused_matmul(rows, w_mat, bias, epilogue=epilogue,
                             gamma_t=gamma_t, beta_row=beta,
                             out_dtypes=(out_dtype,),
                             igdn_phases=s * s, igdn_cout=Cout)
    # TODO(synk): pixel-shuffle + later NCHW transpose are separate XLA HBM passes.
    out = out_rows.reshape(B, Hq, Wq, s, s, Cout).transpose(0, 1, 3, 2, 4, 5)
    return out.reshape(B, s * Hq, s * Wq, Cout)


# ----------------------------------------------------------------------------- model

def init_params(key, out_channel_N=32):
    # NOTE: gamma/beta are consumed directly as the *effective* GDN parameters
    # (real checkpoints store reparameterized values and would need conversion).
    N = out_channel_N
    ks = jax.random.split(key, 6)

    def w_init(k, shape):
        fan_in = shape[1] * shape[2] * shape[3]
        return jax.random.normal(k, shape, jnp.float32) / math.sqrt(fan_in)

    def gdn_init(C):
        gamma = 0.1 * jnp.eye(C, dtype=jnp.float32) + 2e-3
        beta = jnp.ones((C,), jnp.float32)
        return gamma, beta

    p = {}
    p["conv1_w"] = w_init(ks[0], (N, 3, 9, 9)); p["conv1_b"] = jnp.zeros((N,), jnp.float32)
    p["gdn1_gamma"], p["gdn1_beta"] = gdn_init(N)
    p["conv2_w"] = w_init(ks[1], (N, N, 5, 5)); p["conv2_b"] = jnp.zeros((N,), jnp.float32)
    p["gdn2_gamma"], p["gdn2_beta"] = gdn_init(N)
    p["conv3_w"] = w_init(ks[2], (N, N, 5, 5)); p["conv3_b"] = jnp.zeros((N,), jnp.float32)
    # ConvTranspose2d weights: (Cin, Cout, k, k)
    p["deconv1_w"] = w_init(ks[3], (N, N, 5, 5)); p["deconv1_b"] = jnp.zeros((N,), jnp.float32)
    p["igdn1_gamma"], p["igdn1_beta"] = gdn_init(N)
    p["deconv2_w"] = w_init(ks[4], (N, N, 5, 5)); p["deconv2_b"] = jnp.zeros((N,), jnp.float32)
    p["igdn2_gamma"], p["igdn2_beta"] = gdn_init(N)
    p["deconv3_w"] = w_init(ks[5], (N, 3, 9, 9)); p["deconv3_b"] = jnp.zeros((3,), jnp.float32)
    return p


def image_compressor_forward(params, input_image_nchw, training=False):
    # NCHW (PyTorch) -> NHWC; bf16 activations for the conv operands
    # (f32 accumulation + GDN math in-kernel; latent and recon stay f32).
    x = jnp.transpose(input_image_nchw, (0, 2, 3, 1)).astype(jnp.bfloat16)

    # ---- Encoder (Analysis_net_17_new): conv(+GDN), conv(+GDN), conv(+fused round) ----
    h = conv_gdn_fused(x, params["conv1_w"], params["conv1_b"], k=9, s=4, pad=4,
                       epilogue="gdn", gamma=params["gdn1_gamma"],
                       beta=params["gdn1_beta"], out_dtypes=(jnp.bfloat16,))
    h = conv_gdn_fused(h, params["conv2_w"], params["conv2_b"], k=5, s=2, pad=2,
                       epilogue="gdn", gamma=params["gdn2_gamma"],
                       beta=params["gdn2_beta"], out_dtypes=(jnp.bfloat16,))
    feature, rounded = conv_gdn_fused(h, params["conv3_w"], params["conv3_b"],
                                      k=5, s=2, pad=2, epilogue="latent",
                                      out_dtypes=(jnp.float32, jnp.float32))
    feature_before_thresh = feature   # TODO(synk): identity threshold (see header)
    compressed = feature if training else rounded

    # ---- Decoder (Synthesis_net_17): deconv(+IGDN), deconv(+IGDN), deconv(+clamp01) ----
    d = deconv_fused(compressed.astype(jnp.bfloat16), params["deconv1_w"],
                     params["deconv1_b"], k=5, s=2, pad=2, opad=1, epilogue="igdn",
                     gamma=params["igdn1_gamma"], beta=params["igdn1_beta"],
                     out_dtype=jnp.bfloat16)
    d = deconv_fused(d, params["deconv2_w"], params["deconv2_b"],
                     k=5, s=2, pad=2, opad=1, epilogue="igdn",
                     gamma=params["igdn2_gamma"], beta=params["igdn2_beta"],
                     out_dtype=jnp.bfloat16)
    clipped_recon = deconv_fused(d, params["deconv3_w"], params["deconv3_b"],
                                 k=9, s=4, pad=4, opad=3, epilogue="clamp01",
                                 out_dtype=jnp.float32)    # clamp(0,1) fused in-kernel

    to_nchw = lambda t: jnp.transpose(t, (0, 3, 1, 2))
    return to_nchw(clipped_recon), to_nchw(compressed), to_nchw(feature_before_thresh)


# ----------------------------------------------------------------------------- main

if __name__ == "__main__":
    key = jax.random.PRNGKey(0)
    pkey, xkey = jax.random.split(key)

    out_channel_N = 32                          # small stand-in for the default 128
    params = init_params(pkey, out_channel_N)
    x = jax.random.uniform(xkey, (2, 3, 32, 32), jnp.float32)   # NCHW image in [0, 1]

    fwd = jax.jit(lambda p, xx: image_compressor_forward(p, xx, training=False))
    recon, compressed, feat_before = fwd(params, x)
    jax.block_until_ready((recon, compressed, feat_before))

    assert recon.shape == (2, 3, 32, 32)
    assert compressed.shape == (2, out_channel_N, 2, 2)
    assert feat_before.shape == (2, out_channel_N, 2, 2)
    assert float(jnp.min(recon)) >= 0.0 and float(jnp.max(recon)) <= 1.0
    # eval-mode quantization: the compressed latent is integer-valued
    assert bool(jnp.all(compressed == jnp.round(compressed)))

    print("KERNEL_OK")
</pallas_src>

<mosaic_0001>
module attributes {stable_mosaic.version = 11 : i64} {
  func.func @kernel(%arg0: i32, %arg1: i32, %arg2: memref<64x432xbf16, #tpu.memory_space<vmem>>, %arg3: memref<432x128xbf16, #tpu.memory_space<vmem>>, %arg4: memref<1x128xf32, #tpu.memory_space<vmem>>, %arg5: memref<128x128xbf16, #tpu.memory_space<vmem>>, %arg6: memref<1x128xf32, #tpu.memory_space<vmem>>, %arg7: memref<64x128xbf16, #tpu.memory_space<vmem>>, %arg8: memref<64x128xf32, #tpu.memory_space<vmem>>) attributes {dimension_semantics = [#tpu.dimension_semantics<parallel>, #tpu.dimension_semantics<arbitrary>], iteration_bounds = array<i64: 2, 1>, scalar_prefetch = 0 : i64, scratch_operands = 1 : i64, tpu.core_type = #tpu.core_type<tc>, window_params = [{transform_indices = @transform_0, window_bounds = array<i64: 64, 432>}, {transform_indices = @transform_1, window_bounds = array<i64: 432, 128>}, {pipeline_mode = #tpu.pipeline_mode<synchronous>, transform_indices = @transform_2, window_bounds = array<i64: 1, 128>}, {pipeline_mode = #tpu.pipeline_mode<synchronous>, transform_indices = @transform_3, window_bounds = array<i64: 128, 128>}, {pipeline_mode = #tpu.pipeline_mode<synchronous>, transform_indices = @transform_4, window_bounds = array<i64: 1, 128>}, {transform_indices = @transform_5, window_bounds = array<i64: 64, 128>}]} {
    %c0_i32 = arith.constant 0 : i32
    %0 = arith.cmpi eq, %arg1, %c0_i32 : i32
    %1 = arith.extui %0 : i1 to i32
    %c0_i32_0 = arith.constant 0 : i32
    %2 = arith.cmpi ne, %1, %c0_i32_0 : i32
    scf.if %2 {
      %cst_10 = arith.constant 0.000000e+00 : f32
      %12 = vector.broadcast %cst_10 : f32 to vector<64x128xf32>
      %c0_11 = arith.constant 0 : index
      %c0_12 = arith.constant 0 : index
      %13 = vector.load %arg8[%c0_11, %c0_12] : memref<64x128xf32, #tpu.memory_space<vmem>>, vector<64x128xf32>
      tpu.vector_store %arg8[%c0_11, %c0_12], %12 {strides = array<i32>} : memref<64x128xf32, #tpu.memory_space<vmem>>, vector<64x128xf32>,
    } else {
    }
    %c0 = arith.constant 0 : index
    %c0_1 = arith.constant 0 : index
    %3 = vector.load %arg8[%c0, %c0_1] : memref<64x128xf32, #tpu.memory_space<vmem>>, vector<64x128xf32>
    %c0_2 = arith.constant 0 : index
    %c0_3 = arith.constant 0 : index
    %4 = vector.load %arg2[%c0_2, %c0_3] : memref<64x432xbf16, #tpu.memory_space<vmem>>, vector<64x432xbf16>
    %c0_4 = arith.constant 0 : index
    %c0_5 = arith.constant 0 : index
    %5 = vector.load %arg3[%c0_4, %c0_5] : memref<432x128xbf16, #tpu.memory_space<vmem>>, vector<432x128xbf16>
    %cst = arith.constant dense<0.000000e+00> : vector<64x128xf32>
    %6 = tpu.matmul %4, %5, %cst {dimension_numbers = #tpu.dot_dimension_numbers<[1], [0], [0], [1], [0, 0, 1, 1], [], []>} : vector<64x432xbf16>, vector<432x128xbf16>, vector<64x128xf32> -> vector<64x128xf32>
    %7 = arith.addf %3, %6 : vector<64x128xf32>
    %c0_6 = arith.constant 0 : index
    %c0_7 = arith.constant 0 : index
    %8 = vector.load %arg8[%c0_6, %c0_7] : memref<64x128xf32, #tpu.memory_space<vmem>>, vector<64x128xf32>
    tpu.vector_store %arg8[%c0_6, %c0_7], %7 {strides = array<i32>} : memref<64x128xf32, #tpu.memory_space<vmem>>, vector<64x128xf32>,
    %c0_i32_8 = arith.constant 0 : i32
    %9 = arith.cmpi eq, %arg1, %c0_i32_8 : i32
    %10 = arith.extui %9 : i1 to i32
    %c0_i32_9 = arith.constant 0 : i32
    %11 = arith.cmpi ne, %10, %c0_i32_9 : i32
    scf.if %11 {
      %c0_10 = arith.constant 0 : index
      %c0_11 = arith.constant 0 : index
      %12 = vector.load %arg8[%c0_10, %c0_11] : memref<64x128xf32, #tpu.memory_space<vmem>>, vector<64x128xf32>
      %c0_12 = arith.constant 0 : index
      %c0_13 = arith.constant 0 : index
      %13 = vector.load %arg4[%c0_12, %c0_13] : memref<1x128xf32, #tpu.memory_space<vmem>>, vector<1x128xf32>
      %14 = vector.broadcast %13 : vector<1x128xf32> to vector<64x128xf32>
      %15 = arith.addf %12, %14 : vector<64x128xf32>
      %16 = arith.mulf %15, %15 : vector<64x128xf32>
      %17 = arith.truncf %16 : vector<64x128xf32> to vector<64x128xbf16>
      %c0_14 = arith.constant 0 : index
      %c0_15 = arith.constant 0 : index
      %18 = vector.load %arg5[%c0_14, %c0_15] : memref<128x128xbf16, #tpu.memory_space<vmem>>, vector<128x128xbf16>
      %cst_16 = arith.constant dense<0.000000e+00> : vector<64x128xf32>
      %19 = tpu.matmul %17, %18, %cst_16 {dimension_numbers = #tpu.dot_dimension_numbers<[1], [0], [0], [1], [0, 0, 1, 1], [], []>} : vector<64x128xbf16>, vector<128x128xbf16>, vector<64x128xf32> -> vector<64x128xf32>
      %c0_17 = arith.constant 0 : index
      %c0_18 = arith.constant 0 : index
      %20 = vector.load %arg6[%c0_17, %c0_18] : memref<1x128xf32, #tpu.memory_space<vmem>>, vector<1x128xf32>
      %21 = vector.broadcast %20 : vector<1x128xf32> to vector<64x128xf32>
      %22 = arith.addf %19, %21 : vector<64x128xf32>
      %23 = math.rsqrt %22 : vector<64x128xf32>
      %24 = arith.mulf %15, %23 : vector<64x128xf32>
      %25 = arith.truncf %24 : vector<64x128xf32> to vector<64x128xbf16>
      %c0_19 = arith.constant 0 : index
      %c0_20 = arith.constant 0 : index
      %26 = vector.load %arg7[%c0_19, %c0_20] : memref<64x128xbf16, #tpu.memory_space<vmem>>, vector<64x128xbf16>
      tpu.vector_store %arg7[%c0_19, %c0_20], %25 {strides = array<i32>} : memref<64x128xbf16, #tpu.memory_space<vmem>>, vector<64x128xbf16>,
    } else {
    }
    return
  }
  func.func @transform_0(%arg0: i32, %arg1: i32) -> (i32, i32) {
    %c0_i32 = arith.constant 0 : i32
    return %arg0, %arg1 : i32, i32
  }
  func.func @transform_1(%arg0: i32, %arg1: i32) -> (i32, i32) {
    %c0_i32 = arith.constant 0 : i32
    %c0_i32_0 = arith.constant 0 : i32
    return %arg1, %c0_i32 : i32, i32
  }
  func.func @transform_2(%arg0: i32, %arg1: i32) -> (i32, i32) {
    %c0_i32 = arith.constant 0 : i32
    %c0_i32_0 = arith.constant 0 : i32
    %c0_i32_1 = arith.constant 0 : i32
    return %c0_i32, %c0_i32_0 : i32, i32
  }
  func.func @transform_3(%arg0: i32, %arg1: i32) -> (i32, i32) {
    %c0_i32 = arith.constant 0 : i32
    %c0_i32_0 = arith.constant 0 : i32
    %c0_i32_1 = arith.constant 0 : i32
    return %c0_i32, %c0_i32_0 : i32, i32
  }
  func.func @transform_4(%arg0: i32, %arg1: i32) -> (i32, i32) {
    %c0_i32 = arith.constant 0 : i32
    %c0_i32_0 = arith.constant 0 : i32
    %c0_i32_1 = arith.constant 0 : i32
    return %c0_i32, %c0_i32_0 : i32, i32
  }
  func.func @transform_5(%arg0: i32, %arg1: i32) -> (i32, i32) {
    %c0_i32 = arith.constant 0 : i32
    %c0_i32_0 = arith.constant 0 : i32
    return %arg0, %c0_i32 : i32, i32
  }
}

module attributes {stable_mosaic.version = 11 : i64} {
  func.func @kernel(%arg0: i32, %arg1: i32, %arg2: memref<16x1152xbf16, #tpu.memory_space<vmem>>, %arg3: memref<1152x128xbf16, #tpu.memory_space<vmem>>, %arg4: memref<1x128xf32, #tpu.memory_space<vmem>>, %arg5: memref<128x128xbf16, #tpu.memory_space<vmem>>, %arg6: memref<1x128xf32, #tpu.memory_space<vmem>>, %arg7: memref<16x128xbf16, #tpu.memory_space<vmem>>, %arg8: memref<16x128xf32, #tpu.memory_space<vmem>>) attributes {dimension_semantics = [#tpu.dimension_semantics<parallel>, #tpu.dimension_semantics<arbitrary>], iteration_bounds = array<i64: 2, 1>, scalar_prefetch = 0 : i64, scratch_operands = 1 : i64, tpu.core_type = #tpu.core_type<tc>, window_params = [{transform_indices = @transform_0, window_bounds = array<i64: 16, 1152>}, {transform_indices = @transform_1, window_bounds = array<i64: 1152, 128>}, {pipeline_mode = #tpu.pipeline_mode<synchronous>, transform_indices = @transform_2, window_bounds = array<i64: 1, 128>}, {pipeline_mode = #tpu.pipeline_mode<synchronous>, transform_indices = @transform_3, window_bounds = array<i64: 128, 128>}, {pipeline_mode = #tpu.pipeline_mode<synchronous>, transform_indices = @transform_4, window_bounds = array<i64: 1, 128>}, {transform_indices = @transform_5, window_bounds = array<i64: 16, 128>}]} {
    %c0_i32 = arith.constant 0 : i32
    %0 = arith.cmpi eq, %arg1, %c0_i32 : i32
    %1 = arith.extui %0 : i1 to i32
    %c0_i32_0 = arith.constant 0 : i32
    %2 = arith.cmpi ne, %1, %c0_i32_0 : i32
    scf.if %2 {
      %cst_10 = arith.constant 0.000000e+00 : f32
      %12 = vector.broadcast %cst_10 : f32 to vector<16x128xf32>
      %c0_11 = arith.constant 0 : index
      %c0_12 = arith.constant 0 : index
      %13 = vector.load %arg8[%c0_11, %c0_12] : memref<16x128xf32, #tpu.memory_space<vmem>>, vector<16x128xf32>
      tpu.vector_store %arg8[%c0_11, %c0_12], %12 {strides = array<i32>} : memref<16x128xf32, #tpu.memory_space<vmem>>, vector<16x128xf32>,
    } else {
    }
    %c0 = arith.constant 0 : index
    %c0_1 = arith.constant 0 : index
    %3 = vector.load %arg8[%c0, %c0_1] : memref<16x128xf32, #tpu.memory_space<vmem>>, vector<16x128xf32>
    %c0_2 = arith.constant 0 : index
    %c0_3 = arith.constant 0 : index
    %4 = vector.load %arg2[%c0_2, %c0_3] : memref<16x1152xbf16, #tpu.memory_space<vmem>>, vector<16x1152xbf16>
    %c0_4 = arith.constant 0 : index
    %c0_5 = arith.constant 0 : index
    %5 = vector.load %arg3[%c0_4, %c0_5] : memref<1152x128xbf16, #tpu.memory_space<vmem>>, vector<1152x128xbf16>
    %cst = arith.constant dense<0.000000e+00> : vector<16x128xf32>
    %6 = tpu.matmul %4, %5, %cst {dimension_numbers = #tpu.dot_dimension_numbers<[1], [0], [0], [1], [0, 0, 1, 1], [], []>} : vector<16x1152xbf16>, vector<1152x128xbf16>, vector<16x128xf32> -> vector<16x128xf32>
    %7 = arith.addf %3, %6 : vector<16x128xf32>
    %c0_6 = arith.constant 0 : index
    %c0_7 = arith.constant 0 : index
    %8 = vector.load %arg8[%c0_6, %c0_7] : memref<16x128xf32, #tpu.memory_space<vmem>>, vector<16x128xf32>
    tpu.vector_store %arg8[%c0_6, %c0_7], %7 {strides = array<i32>} : memref<16x128xf32, #tpu.memory_space<vmem>>, vector<16x128xf32>,
    %c0_i32_8 = arith.constant 0 : i32
    %9 = arith.cmpi eq, %arg1, %c0_i32_8 : i32
    %10 = arith.extui %9 : i1 to i32
    %c0_i32_9 = arith.constant 0 : i32
    %11 = arith.cmpi ne, %10, %c0_i32_9 : i32
    scf.if %11 {
      %c0_10 = arith.constant 0 : index
      %c0_11 = arith.constant 0 : index
      %12 = vector.load %arg8[%c0_10, %c0_11] : memref<16x128xf32, #tpu.memory_space<vmem>>, vector<16x128xf32>
      %c0_12 = arith.constant 0 : index
      %c0_13 = arith.constant 0 : index
      %13 = vector.load %arg4[%c0_12, %c0_13] : memref<1x128xf32, #tpu.memory_space<vmem>>, vector<1x128xf32>
      %14 = vector.broadcast %13 : vector<1x128xf32> to vector<16x128xf32>
      %15 = arith.addf %12, %14 : vector<16x128xf32>
      %16 = arith.mulf %15, %15 : vector<16x128xf32>
      %17 = arith.truncf %16 : vector<16x128xf32> to vector<16x128xbf16>
      %c0_14 = arith.constant 0 : index
      %c0_15 = arith.constant 0 : index
      %18 = vector.load %arg5[%c0_14, %c0_15] : memref<128x128xbf16, #tpu.memory_space<vmem>>, vector<128x128xbf16>
      %cst_16 = arith.constant dense<0.000000e+00> : vector<16x128xf32>
      %19 = tpu.matmul %17, %18, %cst_16 {dimension_numbers = #tpu.dot_dimension_numbers<[1], [0], [0], [1], [0, 0, 1, 1], [], []>} : vector<16x128xbf16>, vector<128x128xbf16>, vector<16x128xf32> -> vector<16x128xf32>
      %c0_17 = arith.constant 0 : index
      %c0_18 = arith.constant 0 : index
      %20 = vector.load %arg6[%c0_17, %c0_18] : memref<1x128xf32, #tpu.memory_space<vmem>>, vector<1x128xf32>
      %21 = vector.broadcast %20 : vector<1x128xf32> to vector<16x128xf32>
      %22 = arith.addf %19, %21 : vector<16x128xf32>
      %23 = math.rsqrt %22 : vector<16x128xf32>
      %24 = arith.mulf %15, %23 : vector<16x128xf32>
      %25 = arith.truncf %24 : vector<16x128xf32> to vector<16x128xbf16>
      %c0_19 = arith.constant 0 : index
      %c0_20 = arith.constant 0 : index
      %26 = vector.load %arg7[%c0_19, %c0_20] : memref<16x128xbf16, #tpu.memory_space<vmem>>, vector<16x128xbf16>
      tpu.vector_store %arg7[%c0_19, %c0_20], %25 {strides = array<i32>} : memref<16x128xbf16, #tpu.memory_space<vmem>>, vector<16x128xbf16>,
    } else {
    }
    return
  }
  func.func @transform_0(%arg0: i32, %arg1: i32) -> (i32, i32) {
    %c0_i32 = arith.constant 0 : i32
    return %arg0, %arg1 : i32, i32
  }
  func.func @transform_1(%arg0: i32, %arg1: i32) -> (i32, i32) {
    %c0_i32 = arith.constant 0 : i32
    %c0_i32_0 = arith.constant 0 : i32
    return %arg1, %c0_i32 : i32, i32
  }
  func.func @transform_2(%arg0: i32, %arg1: i32) -> (i32, i32) {
    %c0_i32 = arith.constant 0 : i32
    %c0_i32_0 = arith.constant 0 : i32
    %c0_i32_1 = arith.constant 0 : i32
    return %c0_i32, %c0_i32_0 : i32, i32
  }
  func.func @transform_3(%arg0: i32, %arg1: i32) -> (i32, i32) {
    %c0_i32 = arith.constant 0 : i32
    %c0_i32_0 = arith.constant 0 : i32
    %c0_i32_1 = arith.constant 0 : i32
    return %c0_i32, %c0_i32_0 : i32, i32
  }
  func.func @transform_4(%arg0: i32, %arg1: i32) -> (i32, i32) {
    %c0_i32 = arith.constant 0 : i32
    %c0_i32_0 = arith.constant 0 : i32
    %c0_i32_1 = arith.constant 0 : i32
    return %c0_i32, %c0_i32_0 : i32, i32
  }
  func.func @transform_5(%arg0: i32, %arg1: i32) -> (i32, i32) {
    %c0_i32 = arith.constant 0 : i32
    %c0_i32_0 = arith.constant 0 : i32
    return %arg0, %c0_i32 : i32, i32
  }
}

module attributes {stable_mosaic.version = 11 : i64} {
  func.func @kernel(%arg0: i32, %arg1: i32, %arg2: memref<8x1152xbf16, #tpu.memory_space<vmem>>, %arg3: memref<1152x128xbf16, #tpu.memory_space<vmem>>, %arg4: memref<1x128xf32, #tpu.memory_space<vmem>>, %arg5: memref<8x128xf32, #tpu.memory_space<vmem>>, %arg6: memref<8x128xf32, #tpu.memory_space<vmem>>, %arg7: memref<8x128xf32, #tpu.memory_space<vmem>>) attributes {dimension_semantics = [#tpu.dimension_semantics<parallel>, #tpu.dimension_semantics<arbitrary>], iteration_bounds = array<i64: 1, 1>, scalar_prefetch = 0 : i64, scratch_operands = 1 : i64, tpu.core_type = #tpu.core_type<tc>, window_params = [{transform_indices = @transform_0, window_bounds = array<i64: 8, 1152>}, {transform_indices = @transform_1, window_bounds = array<i64: 1152, 128>}, {pipeline_mode = #tpu.pipeline_mode<synchronous>, transform_indices = @transform_2, window_bounds = array<i64: 1, 128>}, {transform_indices = @transform_3, window_bounds = array<i64: 8, 128>}, {transform_indices = @transform_4, window_bounds = array<i64: 8, 128>}]} {
    %c0_i32 = arith.constant 0 : i32
    %0 = arith.cmpi eq, %arg1, %c0_i32 : i32
    %1 = arith.extui %0 : i1 to i32
    %c0_i32_0 = arith.constant 0 : i32
    %2 = arith.cmpi ne, %1, %c0_i32_0 : i32
    scf.if %2 {
      %cst_10 = arith.constant 0.000000e+00 : f32
      %12 = vector.broadcast %cst_10 : f32 to vector<8x128xf32>
      %c0_11 = arith.constant 0 : index
      %c0_12 = arith.constant 0 : index
      %13 = vector.load %arg7[%c0_11, %c0_12] : memref<8x128xf32, #tpu.memory_space<vmem>>, vector<8x128xf32>
      tpu.vector_store %arg7[%c0_11, %c0_12], %12 {strides = array<i32>} : memref<8x128xf32, #tpu.memory_space<vmem>>, vector<8x128xf32>,
    } else {
    }
    %c0 = arith.constant 0 : index
    %c0_1 = arith.constant 0 : index
    %3 = vector.load %arg7[%c0, %c0_1] : memref<8x128xf32, #tpu.memory_space<vmem>>, vector<8x128xf32>
    %c0_2 = arith.constant 0 : index
    %c0_3 = arith.constant 0 : index
    %4 = vector.load %arg2[%c0_2, %c0_3] : memref<8x1152xbf16, #tpu.memory_space<vmem>>, vector<8x1152xbf16>
    %c0_4 = arith.constant 0 : index
    %c0_5 = arith.constant 0 : index
    %5 = vector.load %arg3[%c0_4, %c0_5] : memref<1152x128xbf16, #tpu.memory_space<vmem>>, vector<1152x128xbf16>
    %cst = arith.constant dense<0.000000e+00> : vector<8x128xf32>
    %6 = tpu.matmul %4, %5, %cst {dimension_numbers = #tpu.dot_dimension_numbers<[1], [0], [0], [1], [0, 0, 1, 1], [], []>} : vector<8x1152xbf16>, vector<1152x128xbf16>, vector<8x128xf32> -> vector<8x128xf32>
    %7 = arith.addf %3, %6 : vector<8x128xf32>
    %c0_6 = arith.constant 0 : index
    %c0_7 = arith.constant 0 : index
    %8 = vector.load %arg7[%c0_6, %c0_7] : memref<8x128xf32, #tpu.memory_space<vmem>>, vector<8x128xf32>
    tpu.vector_store %arg7[%c0_6, %c0_7], %7 {strides = array<i32>} : memref<8x128xf32, #tpu.memory_space<vmem>>, vector<8x128xf32>,
    %c0_i32_8 = arith.constant 0 : i32
    %9 = arith.cmpi eq, %arg1, %c0_i32_8 : i32
    %10 = arith.extui %9 : i1 to i32
    %c0_i32_9 = arith.constant 0 : i32
    %11 = arith.cmpi ne, %10, %c0_i32_9 : i32
    scf.if %11 {
      %c0_10 = arith.constant 0 : index
      %c0_11 = arith.constant 0 : index
      %12 = vector.load %arg7[%c0_10, %c0_11] : memref<8x128xf32, #tpu.memory_space<vmem>>, vector<8x128xf32>
      %c0_12 = arith.constant 0 : index
      %c0_13 = arith.constant 0 : index
      %13 = vector.load %arg4[%c0_12, %c0_13] : memref<1x128xf32, #tpu.memory_space<vmem>>, vector<1x128xf32>
      %14 = vector.broadcast %13 : vector<1x128xf32> to vector<8x128xf32>
      %15 = arith.addf %12, %14 : vector<8x128xf32>
      %c0_14 = arith.constant 0 : index
      %c0_15 = arith.constant 0 : index
      %16 = vector.load %arg5[%c0_14, %c0_15] : memref<8x128xf32, #tpu.memory_space<vmem>>, vector<8x128xf32>
      tpu.vector_store %arg5[%c0_14, %c0_15], %15 {strides = array<i32>} : memref<8x128xf32, #tpu.memory_space<vmem>>, vector<8x128xf32>,
      %17 = math.roundeven %15 : vector<8x128xf32>
      %c0_16 = arith.constant 0 : index
      %c0_17 = arith.constant 0 : index
      %18 = vector.load %arg6[%c0_16, %c0_17] : memref<8x128xf32, #tpu.memory_space<vmem>>, vector<8x128xf32>
      tpu.vector_store %arg6[%c0_16, %c0_17], %17 {strides = array<i32>} : memref<8x128xf32, #tpu.memory_space<vmem>>, vector<8x128xf32>,
    } else {
    }
    return
  }
  func.func @transform_0(%arg0: i32, %arg1: i32) -> (i32, i32) {
    %c0_i32 = arith.constant 0 : i32
    return %arg0, %arg1 : i32, i32
  }
  func.func @transform_1(%arg0: i32, %arg1: i32) -> (i32, i32) {
    %c0_i32 = arith.constant 0 : i32
    %c0_i32_0 = arith.constant 0 : i32
    return %arg1, %c0_i32 : i32, i32
  }
  func.func @transform_2(%arg0: i32, %arg1: i32) -> (i32, i32) {
    %c0_i32 = arith.constant 0 : i32
    %c0_i32_0 = arith.constant 0 : i32
    %c0_i32_1 = arith.constant 0 : i32
    return %c0_i32, %c0_i32_0 : i32, i32
  }
  func.func @transform_3(%arg0: i32, %arg1: i32) -> (i32, i32) {
    %c0_i32 = arith.constant 0 : i32
    %c0_i32_0 = arith.constant 0 : i32
    return %arg0, %c0_i32 : i32, i32
  }
  func.func @transform_4(%arg0: i32, %arg1: i32) -> (i32, i32) {
    %c0_i32 = arith.constant 0 : i32
    %c0_i32_0 = arith.constant 0 : i32
    return %arg0, %c0_i32 : i32, i32
  }
}

module attributes {stable_mosaic.version = 11 : i64} {
  func.func @kernel(%arg0: i32, %arg1: i32, %arg2: memref<8x288xbf16, #tpu.memory_space<vmem>>, %arg3: memref<288x128xbf16, #tpu.memory_space<vmem>>, %arg4: memref<1x128xf32, #tpu.memory_space<vmem>>, %arg5: memref<32x32xbf16, #tpu.memory_space<vmem>>, %arg6: memref<1x32xf32, #tpu.memory_space<vmem>>, %arg7: memref<8x128xbf16, #tpu.memory_space<vmem>>, %arg8: memref<8x128xf32, #tpu.memory_space<vmem>>) attributes {dimension_semantics = [#tpu.dimension_semantics<parallel>, #tpu.dimension_semantics<arbitrary>], iteration_bounds = array<i64: 1, 1>, scalar_prefetch = 0 : i64, scratch_operands = 1 : i64, tpu.core_type = #tpu.core_type<tc>, window_params = [{transform_indices = @transform_0, window_bounds = array<i64: 8, 288>}, {transform_indices = @transform_1, window_bounds = array<i64: 288, 128>}, {pipeline_mode = #tpu.pipeline_mode<synchronous>, transform_indices = @transform_2, window_bounds = array<i64: 1, 128>}, {pipeline_mode = #tpu.pipeline_mode<synchronous>, transform_indices = @transform_3, window_bounds = array<i64: 32, 32>}, {pipeline_mode = #tpu.pipeline_mode<synchronous>, transform_indices = @transform_4, window_bounds = array<i64: 1, 32>}, {transform_indices = @transform_5, window_bounds = array<i64: 8, 128>}]} {
    %c0_i32 = arith.constant 0 : i32
    %0 = arith.cmpi eq, %arg1, %c0_i32 : i32
    %1 = arith.extui %0 : i1 to i32
    %c0_i32_0 = arith.constant 0 : i32
    %2 = arith.cmpi ne, %1, %c0_i32_0 : i32
    scf.if %2 {
      %cst_10 = arith.constant 0.000000e+00 : f32
      %12 = vector.broadcast %cst_10 : f32 to vector<8x128xf32>
      %c0_11 = arith.constant 0 : index
      %c0_12 = arith.constant 0 : index
      %13 = vector.load %arg8[%c0_11, %c0_12] : memref<8x128xf32, #tpu.memory_space<vmem>>, vector<8x128xf32>
      tpu.vector_store %arg8[%c0_11, %c0_12], %12 {strides = array<i32>} : memref<8x128xf32, #tpu.memory_space<vmem>>, vector<8x128xf32>,
    } else {
    }
    %c0 = arith.constant 0 : index
    %c0_1 = arith.constant 0 : index
    %3 = vector.load %arg8[%c0, %c0_1] : memref<8x128xf32, #tpu.memory_space<vmem>>, vector<8x128xf32>
    %c0_2 = arith.constant 0 : index
    %c0_3 = arith.constant 0 : index
    %4 = vector.load %arg2[%c0_2, %c0_3] : memref<8x288xbf16, #tpu.memory_space<vmem>>, vector<8x288xbf16>
    %c0_4 = arith.constant 0 : index
    %c0_5 = arith.constant 0 : index
    %5 = vector.load %arg3[%c0_4, %c0_5] : memref<288x128xbf16, #tpu.memory_space<vmem>>, vector<288x128xbf16>
    %cst = arith.constant dense<0.000000e+00> : vector<8x128xf32>
    %6 = tpu.matmul %4, %5, %cst {dimension_numbers = #tpu.dot_dimension_numbers<[1], [0], [0], [1], [0, 0, 1, 1], [], []>} : vector<8x288xbf16>, vector<288x128xbf16>, vector<8x128xf32> -> vector<8x128xf32>
    %7 = arith.addf %3, %6 : vector<8x128xf32>
    %c0_6 = arith.constant 0 : index
    %c0_7 = arith.constant 0 : index
    %8 = vector.load %arg8[%c0_6, %c0_7] : memref<8x128xf32, #tpu.memory_space<vmem>>, vector<8x128xf32>
    tpu.vector_store %arg8[%c0_6, %c0_7], %7 {strides = array<i32>} : memref<8x128xf32, #tpu.memory_space<vmem>>, vector<8x128xf32>,
    %c0_i32_8 = arith.constant 0 : i32
    %9 = arith.cmpi eq, %arg1, %c0_i32_8 : i32
    %10 = arith.extui %9 : i1 to i32
    %c0_i32_9 = arith.constant 0 : i32
    %11 = arith.cmpi ne, %10, %c0_i32_9 : i32
    scf.if %11 {
      %c0_10 = arith.constant 0 : index
      %c0_11 = arith.constant 0 : index
      %12 = vector.load %arg8[%c0_10, %c0_11] : memref<8x128xf32, #tpu.memory_space<vmem>>, vector<8x128xf32>
      %c0_12 = arith.constant 0 : index
      %c0_13 = arith.constant 0 : index
      %13 = vector.load %arg4[%c0_12, %c0_13] : memref<1x128xf32, #tpu.memory_space<vmem>>, vector<1x128xf32>
      %14 = vector.broadcast %13 : vector<1x128xf32> to vector<8x128xf32>
      %15 = arith.addf %12, %14 : vector<8x128xf32>
      %16 = vector.extract_strided_slice %15 {offsets = [0, 0], sizes = [8, 32], strides = [1, 1]} : vector<8x128xf32> to vector<8x32xf32>
      %17 = arith.mulf %16, %16 : vector<8x32xf32>
      %18 = arith.truncf %17 : vector<8x32xf32> to vector<8x32xbf16>
      %c0_14 = arith.constant 0 : index
      %c0_15 = arith.constant 0 : index
      %19 = vector.load %arg5[%c0_14, %c0_15] : memref<32x32xbf16, #tpu.memory_space<vmem>>, vector<32x32xbf16>
      %cst_16 = arith.constant dense<0.000000e+00> : vector<8x32xf32>
      %20 = tpu.matmul %18, %19, %cst_16 {dimension_numbers = #tpu.dot_dimension_numbers<[1], [0], [0], [1], [0, 0, 1, 1], [], []>} : vector<8x32xbf16>, vector<32x32xbf16>, vector<8x32xf32> -> vector<8x32xf32>
      %c0_17 = arith.constant 0 : index
      %c0_18 = arith.constant 0 : index
      %21 = vector.load %arg6[%c0_17, %c0_18] : memref<1x32xf32, #tpu.memory_space<vmem>>, vector<1x32xf32>
      %22 = vector.broadcast %21 : vector<1x32xf32> to vector<8x32xf32>
      %23 = arith.addf %20, %22 : vector<8x32xf32>
      %24 = math.sqrt %23 : vector<8x32xf32>
      %25 = arith.mulf %16, %24 : vector<8x32xf32>
      %26 = arith.truncf %25 : vector<8x32xf32> to vector<8x32xbf16>
      %c0_19 = arith.constant 0 : index
      %c0_20 = arith.constant 0 : index
      %27 = vector.load %arg7[%c0_19, %c0_20] : memref<8x128xbf16, #tpu.memory_space<vmem>>, vector<8x32xbf16>
      tpu.vector_store %arg7[%c0_19, %c0_20], %26 {strides = array<i32>} : memref<8x128xbf16, #tpu.memory_space<vmem>>, vector<8x32xbf16>,
      %28 = vector.extract_strided_slice %15 {offsets = [0, 32], sizes = [8, 32], strides = [1, 1]} : vector<8x128xf32> to vector<8x32xf32>
      %29 = arith.mulf %28, %28 : vector<8x32xf32>
      %30 = arith.truncf %29 : vector<8x32xf32> to vector<8x32xbf16>
      %c0_21 = arith.constant 0 : index
      %c0_22 = arith.constant 0 : index
      %31 = vector.load %arg5[%c0_21, %c0_22] : memref<32x32xbf16, #tpu.memory_space<vmem>>, vector<32x32xbf16>
      %cst_23 = arith.constant dense<0.000000e+00> : vector<8x32xf32>
      %32 = tpu.matmul %30, %31, %cst_23 {dimension_numbers = #tpu.dot_dimension_numbers<[1], [0], [0], [1], [0, 0, 1, 1], [], []>} : vector<8x32xbf16>, vector<32x32xbf16>, vector<8x32xf32> -> vector<8x32xf32>
      %c0_24 = arith.constant 0 : index
      %c0_25 = arith.constant 0 : index
      %33 = vector.load %arg6[%c0_24, %c0_25] : memref<1x32xf32, #tpu.memory_space<vmem>>, vector<1x32xf32>
      %34 = vector.broadcast %33 : vector<1x32xf32> to vector<8x32xf32>
      %35 = arith.addf %32, %34 : vector<8x32xf32>
      %36 = math.sqrt %35 : vector<8x32xf32>
      %37 = arith.mulf %28, %36 : vector<8x32xf32>
      %38 = arith.truncf %37 : vector<8x32xf32> to vector<8x32xbf16>
      %c0_26 = arith.constant 0 : index
      %c32 = arith.constant 32 : index
      %39 = vector.load %arg7[%c0_26, %c32] : memref<8x128xbf16, #tpu.memory_space<vmem>>, vector<8x32xbf16>
      tpu.vector_store %arg7[%c0_26, %c32], %38 {strides = array<i32>} : memref<8x128xbf16, #tpu.memory_space<vmem>>, vector<8x32xbf16>,
      %40 = vector.extract_strided_slice %15 {offsets = [0, 64], sizes = [8, 32], strides = [1, 1]} : vector<8x128xf32> to vector<8x32xf32>
      %41 = arith.mulf %40, %40 : vector<8x32xf32>
      %42 = arith.truncf %41 : vector<8x32xf32> to vector<8x32xbf16>
      %c0_27 = arith.constant 0 : index
      %c0_28 = arith.constant 0 : index
      %43 = vector.load %arg5[%c0_27, %c0_28] : memref<32x32xbf16, #tpu.memory_space<vmem>>, vector<32x32xbf16>
      %cst_29 = arith.constant dense<0.000000e+00> : vector<8x32xf32>
      %44 = tpu.matmul %42, %43, %cst_29 {dimension_numbers = #tpu.dot_dimension_numbers<[1], [0], [0], [1], [0, 0, 1, 1], [], []>} : vector<8x32xbf16>, vector<32x32xbf16>, vector<8x32xf32> -> vector<8x32xf32>
      %c0_30 = arith.constant 0 : index
      %c0_31 = arith.constant 0 : index
      %45 = vector.load %arg6[%c0_30, %c0_31] : memref<1x32xf32, #tpu.memory_space<vmem>>, vector<1x32xf32>
      %46 = vector.broadcast %45 : vector<1x32xf32> to vector<8x32xf32>
      %47 = arith.addf %44, %46 : vector<8x32xf32>
      %48 = math.sqrt %47 : vector<8x32xf32>
      %49 = arith.mulf %40, %48 : vector<8x32xf32>
      %50 = arith.truncf %49 : vector<8x32xf32> to vector<8x32xbf16>
      %c0_32 = arith.constant 0 : index
      %c64 = arith.constant 64 : index
      %51 = vector.load %arg7[%c0_32, %c64] : memref<8x128xbf16, #tpu.memory_space<vmem>>, vector<8x32xbf16>
      tpu.vector_store %arg7[%c0_32, %c64], %50 {strides = array<i32>} : memref<8x128xbf16, #tpu.memory_space<vmem>>, vector<8x32xbf16>,
      %52 = vector.extract_strided_slice %15 {offsets = [0, 96], sizes = [8, 32], strides = [1, 1]} : vector<8x128xf32> to vector<8x32xf32>
      %53 = arith.mulf %52, %52 : vector<8x32xf32>
      %54 = arith.truncf %53 : vector<8x32xf32> to vector<8x32xbf16>
      %c0_33 = arith.constant 0 : index
      %c0_34 = arith.constant 0 : index
      %55 = vector.load %arg5[%c0_33, %c0_34] : memref<32x32xbf16, #tpu.memory_space<vmem>>, vector<32x32xbf16>
      %cst_35 = arith.constant dense<0.000000e+00> : vector<8x32xf32>
      %56 = tpu.matmul %54, %55, %cst_35 {dimension_numbers = #tpu.dot_dimension_numbers<[1], [0], [0], [1], [0, 0, 1, 1], [], []>} : vector<8x32xbf16>, vector<32x32xbf16>, vector<8x32xf32> -> vector<8x32xf32>
      %c0_36 = arith.constant 0 : index
      %c0_37 = arith.constant 0 : index
      %57 = vector.load %arg6[%c0_36, %c0_37] : memref<1x32xf32, #tpu.memory_space<vmem>>, vector<1x32xf32>
      %58 = vector.broadcast %57 : vector<1x32xf32> to vector<8x32xf32>
      %59 = arith.addf %56, %58 : vector<8x32xf32>
      %60 = math.sqrt %59 : vector<8x32xf32>
      %61 = arith.mulf %52, %60 : vector<8x32xf32>
      %62 = arith.truncf %61 : vector<8x32xf32> to vector<8x32xbf16>
      %c0_38 = arith.constant 0 : index
      %c96 = arith.constant 96 : index
      %63 = vector.load %arg7[%c0_38, %c96] : memref<8x128xbf16, #tpu.memory_space<vmem>>, vector<8x32xbf16>
      tpu.vector_store %arg7[%c0_38, %c96], %62 {strides = array<i32>} : memref<8x128xbf16, #tpu.memory_space<vmem>>, vector<8x32xbf16>,
    } else {
    }
    return
  }
  func.func @transform_0(%arg0: i32, %arg1: i32) -> (i32, i32) {
    %c0_i32 = arith.constant 0 : i32
    return %arg0, %arg1 : i32, i32
  }
  func.func @transform_1(%arg0: i32, %arg1: i32) -> (i32, i32) {
    %c0_i32 = arith.constant 0 : i32
    %c0_i32_0 = arith.constant 0 : i32
    return %arg1, %c0_i32 : i32, i32
  }
  func.func @transform_2(%arg0: i32, %arg1: i32) -> (i32, i32) {
    %c0_i32 = arith.constant 0 : i32
    %c0_i32_0 = arith.constant 0 : i32
    %c0_i32_1 = arith.constant 0 : i32
    return %c0_i32, %c0_i32_0 : i32, i32
  }
  func.func @transform_3(%arg0: i32, %arg1: i32) -> (i32, i32) {
    %c0_i32 = arith.constant 0 : i32
    %c0_i32_0 = arith.constant 0 : i32
    %c0_i32_1 = arith.constant 0 : i32
    return %c0_i32, %c0_i32_0 : i32, i32
  }
  func.func @transform_4(%arg0: i32, %arg1: i32) -> (i32, i32) {
    %c0_i32 = arith.constant 0 : i32
    %c0_i32_0 = arith.constant 0 : i32
    %c0_i32_1 = arith.constant 0 : i32
    return %c0_i32, %c0_i32_0 : i32, i32
  }
  func.func @transform_5(%arg0: i32, %arg1: i32) -> (i32, i32) {
    %c0_i32 = arith.constant 0 : i32
    %c0_i32_0 = arith.constant 0 : i32
    return %arg0, %c0_i32 : i32, i32
  }
}

module attributes {stable_mosaic.version = 11 : i64} {
  func.func @kernel(%arg0: i32, %arg1: i32, %arg2: memref<16x288xbf16, #tpu.memory_space<vmem>>, %arg3: memref<288x128xbf16, #tpu.memory_space<vmem>>, %arg4: memref<1x128xf32, #tpu.memory_space<vmem>>, %arg5: memref<32x32xbf16, #tpu.memory_space<vmem>>, %arg6: memref<1x32xf32, #tpu.memory_space<vmem>>, %arg7: memref<16x128xbf16, #tpu.memory_space<vmem>>, %arg8: memref<16x128xf32, #tpu.memory_space<vmem>>) attributes {dimension_semantics = [#tpu.dimension_semantics<parallel>, #tpu.dimension_semantics<arbitrary>], iteration_bounds = array<i64: 2, 1>, scalar_prefetch = 0 : i64, scratch_operands = 1 : i64, tpu.core_type = #tpu.core_type<tc>, window_params = [{transform_indices = @transform_0, window_bounds = array<i64: 16, 288>}, {transform_indices = @transform_1, window_bounds = array<i64: 288, 128>}, {pipeline_mode = #tpu.pipeline_mode<synchronous>, transform_indices = @transform_2, window_bounds = array<i64: 1, 128>}, {pipeline_mode = #tpu.pipeline_mode<synchronous>, transform_indices = @transform_3, window_bounds = array<i64: 32, 32>}, {pipeline_mode = #tpu.pipeline_mode<synchronous>, transform_indices = @transform_4, window_bounds = array<i64: 1, 32>}, {transform_indices = @transform_5, window_bounds = array<i64: 16, 128>}]} {
    %c0_i32 = arith.constant 0 : i32
    %0 = arith.cmpi eq, %arg1, %c0_i32 : i32
    %1 = arith.extui %0 : i1 to i32
    %c0_i32_0 = arith.constant 0 : i32
    %2 = arith.cmpi ne, %1, %c0_i32_0 : i32
    scf.if %2 {
      %cst_10 = arith.constant 0.000000e+00 : f32
      %12 = vector.broadcast %cst_10 : f32 to vector<16x128xf32>
      %c0_11 = arith.constant 0 : index
      %c0_12 = arith.constant 0 : index
      %13 = vector.load %arg8[%c0_11, %c0_12] : memref<16x128xf32, #tpu.memory_space<vmem>>, vector<16x128xf32>
      tpu.vector_store %arg8[%c0_11, %c0_12], %12 {strides = array<i32>} : memref<16x128xf32, #tpu.memory_space<vmem>>, vector<16x128xf32>,
    } else {
    }
    %c0 = arith.constant 0 : index
    %c0_1 = arith.constant 0 : index
    %3 = vector.load %arg8[%c0, %c0_1] : memref<16x128xf32, #tpu.memory_space<vmem>>, vector<16x128xf32>
    %c0_2 = arith.constant 0 : index
    %c0_3 = arith.constant 0 : index
    %4 = vector.load %arg2[%c0_2, %c0_3] : memref<16x288xbf16, #tpu.memory_space<vmem>>, vector<16x288xbf16>
    %c0_4 = arith.constant 0 : index
    %c0_5 = arith.constant 0 : index
    %5 = vector.load %arg3[%c0_4, %c0_5] : memref<288x128xbf16, #tpu.memory_space<vmem>>, vector<288x128xbf16>
    %cst = arith.constant dense<0.000000e+00> : vector<16x128xf32>
    %6 = tpu.matmul %4, %5, %cst {dimension_numbers = #tpu.dot_dimension_numbers<[1], [0], [0], [1], [0, 0, 1, 1], [], []>} : vector<16x288xbf16>, vector<288x128xbf16>, vector<16x128xf32> -> vector<16x128xf32>
    %7 = arith.addf %3, %6 : vector<16x128xf32>
    %c0_6 = arith.constant 0 : index
    %c0_7 = arith.constant 0 : index
    %8 = vector.load %arg8[%c0_6, %c0_7] : memref<16x128xf32, #tpu.memory_space<vmem>>, vector<16x128xf32>
    tpu.vector_store %arg8[%c0_6, %c0_7], %7 {strides = array<i32>} : memref<16x128xf32, #tpu.memory_space<vmem>>, vector<16x128xf32>,
    %c0_i32_8 = arith.constant 0 : i32
    %9 = arith.cmpi eq, %arg1, %c0_i32_8 : i32
    %10 = arith.extui %9 : i1 to i32
    %c0_i32_9 = arith.constant 0 : i32
    %11 = arith.cmpi ne, %10, %c0_i32_9 : i32
    scf.if %11 {
      %c0_10 = arith.constant 0 : index
      %c0_11 = arith.constant 0 : index
      %12 = vector.load %arg8[%c0_10, %c0_11] : memref<16x128xf32, #tpu.memory_space<vmem>>, vector<16x128xf32>
      %c0_12 = arith.constant 0 : index
      %c0_13 = arith.constant 0 : index
      %13 = vector.load %arg4[%c0_12, %c0_13] : memref<1x128xf32, #tpu.memory_space<vmem>>, vector<1x128xf32>
      %14 = vector.broadcast %13 : vector<1x128xf32> to vector<16x128xf32>
      %15 = arith.addf %12, %14 : vector<16x128xf32>
      %16 = vector.extract_strided_slice %15 {offsets = [0, 0], sizes = [16, 32], strides = [1, 1]} : vector<16x128xf32> to vector<16x32xf32>
      %17 = arith.mulf %16, %16 : vector<16x32xf32>
      %18 = arith.truncf %17 : vector<16x32xf32> to vector<16x32xbf16>
      %c0_14 = arith.constant 0 : index
      %c0_15 = arith.constant 0 : index
      %19 = vector.load %arg5[%c0_14, %c0_15] : memref<32x32xbf16, #tpu.memory_space<vmem>>, vector<32x32xbf16>
      %cst_16 = arith.constant dense<0.000000e+00> : vector<16x32xf32>
      %20 = tpu.matmul %18, %19, %cst_16 {dimension_numbers = #tpu.dot_dimension_numbers<[1], [0], [0], [1], [0, 0, 1, 1], [], []>} : vector<16x32xbf16>, vector<32x32xbf16>, vector<16x32xf32> -> vector<16x32xf32>
      %c0_17 = arith.constant 0 : index
      %c0_18 = arith.constant 0 : index
      %21 = vector.load %arg6[%c0_17, %c0_18] : memref<1x32xf32, #tpu.memory_space<vmem>>, vector<1x32xf32>
      %22 = vector.broadcast %21 : vector<1x32xf32> to vector<16x32xf32>
      %23 = arith.addf %20, %22 : vector<16x32xf32>
      %24 = math.sqrt %23 : vector<16x32xf32>
      %25 = arith.mulf %16, %24 : vector<16x32xf32>
      %26 = arith.truncf %25 : vector<16x32xf32> to vector<16x32xbf16>
      %c0_19 = arith.constant 0 : index
      %c0_20 = arith.constant 0 : index
      %27 = vector.load %arg7[%c0_19, %c0_20] : memref<16x128xbf16, #tpu.memory_space<vmem>>, vector<16x32xbf16>
      tpu.vector_store %arg7[%c0_19, %c0_20], %26 {strides = array<i32>} : memref<16x128xbf16, #tpu.memory_space<vmem>>, vector<16x32xbf16>,
      %28 = vector.extract_strided_slice %15 {offsets = [0, 32], sizes = [16, 32], strides = [1, 1]} : vector<16x128xf32> to vector<16x32xf32>
      %29 = arith.mulf %28, %28 : vector<16x32xf32>
      %30 = arith.truncf %29 : vector<16x32xf32> to vector<16x32xbf16>
      %c0_21 = arith.constant 0 : index
      %c0_22 = arith.constant 0 : index
      %31 = vector.load %arg5[%c0_21, %c0_22] : memref<32x32xbf16, #tpu.memory_space<vmem>>, vector<32x32xbf16>
      %cst_23 = arith.constant dense<0.000000e+00> : vector<16x32xf32>
      %32 = tpu.matmul %30, %31, %cst_23 {dimension_numbers = #tpu.dot_dimension_numbers<[1], [0], [0], [1], [0, 0, 1, 1], [], []>} : vector<16x32xbf16>, vector<32x32xbf16>, vector<16x32xf32> -> vector<16x32xf32>
      %c0_24 = arith.constant 0 : index
      %c0_25 = arith.constant 0 : index
      %33 = vector.load %arg6[%c0_24, %c0_25] : memref<1x32xf32, #tpu.memory_space<vmem>>, vector<1x32xf32>
      %34 = vector.broadcast %33 : vector<1x32xf32> to vector<16x32xf32>
      %35 = arith.addf %32, %34 : vector<16x32xf32>
      %36 = math.sqrt %35 : vector<16x32xf32>
      %37 = arith.mulf %28, %36 : vector<16x32xf32>
      %38 = arith.truncf %37 : vector<16x32xf32> to vector<16x32xbf16>
      %c0_26 = arith.constant 0 : index
      %c32 = arith.constant 32 : index
      %39 = vector.load %arg7[%c0_26, %c32] : memref<16x128xbf16, #tpu.memory_space<vmem>>, vector<16x32xbf16>
      tpu.vector_store %arg7[%c0_26, %c32], %38 {strides = array<i32>} : memref<16x128xbf16, #tpu.memory_space<vmem>>, vector<16x32xbf16>,
      %40 = vector.extract_strided_slice %15 {offsets = [0, 64], sizes = [16, 32], strides = [1, 1]} : vector<16x128xf32> to vector<16x32xf32>
      %41 = arith.mulf %40, %40 : vector<16x32xf32>
      %42 = arith.truncf %41 : vector<16x32xf32> to vector<16x32xbf16>
      %c0_27 = arith.constant 0 : index
      %c0_28 = arith.constant 0 : index
      %43 = vector.load %arg5[%c0_27, %c0_28] : memref<32x32xbf16, #tpu.memory_space<vmem>>, vector<32x32xbf16>
      %cst_29 = arith.constant dense<0.000000e+00> : vector<16x32xf32>
      %44 = tpu.matmul %42, %43, %cst_29 {dimension_numbers = #tpu.dot_dimension_numbers<[1], [0], [0], [1], [0, 0, 1, 1], [], []>} : vector<16x32xbf16>, vector<32x32xbf16>, vector<16x32xf32> -> vector<16x32xf32>
      %c0_30 = arith.constant 0 : index
      %c0_31 = arith.constant 0 : index
      %45 = vector.load %arg6[%c0_30, %c0_31] : memref<1x32xf32, #tpu.memory_space<vmem>>, vector<1x32xf32>
      %46 = vector.broadcast %45 : vector<1x32xf32> to vector<16x32xf32>
      %47 = arith.addf %44, %46 : vector<16x32xf32>
      %48 = math.sqrt %47 : vector<16x32xf32>
      %49 = arith.mulf %40, %48 : vector<16x32xf32>
      %50 = arith.truncf %49 : vector<16x32xf32> to vector<16x32xbf16>
      %c0_32 = arith.constant 0 : index
      %c64 = arith.constant 64 : index
      %51 = vector.load %arg7[%c0_32, %c64] : memref<16x128xbf16, #tpu.memory_space<vmem>>, vector<16x32xbf16>
      tpu.vector_store %arg7[%c0_32, %c64], %50 {strides = array<i32>} : memref<16x128xbf16, #tpu.memory_space<vmem>>, vector<16x32xbf16>,
      %52 = vector.extract_strided_slice %15 {offsets = [0, 96], sizes = [16, 32], strides = [1, 1]} : vector<16x128xf32> to vector<16x32xf32>
      %53 = arith.mulf %52, %52 : vector<16x32xf32>
      %54 = arith.truncf %53 : vector<16x32xf32> to vector<16x32xbf16>
      %c0_33 = arith.constant 0 : index
      %c0_34 = arith.constant 0 : index
      %55 = vector.load %arg5[%c0_33, %c0_34] : memref<32x32xbf16, #tpu.memory_space<vmem>>, vector<32x32xbf16>
      %cst_35 = arith.constant dense<0.000000e+00> : vector<16x32xf32>
      %56 = tpu.matmul %54, %55, %cst_35 {dimension_numbers = #tpu.dot_dimension_numbers<[1], [0], [0], [1], [0, 0, 1, 1], [], []>} : vector<16x32xbf16>, vector<32x32xbf16>, vector<16x32xf32> -> vector<16x32xf32>
      %c0_36 = arith.constant 0 : index
      %c0_37 = arith.constant 0 : index
      %57 = vector.load %arg6[%c0_36, %c0_37] : memref<1x32xf32, #tpu.memory_space<vmem>>, vector<1x32xf32>
      %58 = vector.broadcast %57 : vector<1x32xf32> to vector<16x32xf32>
      %59 = arith.addf %56, %58 : vector<16x32xf32>
      %60 = math.sqrt %59 : vector<16x32xf32>
      %61 = arith.mulf %52, %60 : vector<16x32xf32>
      %62 = arith.truncf %61 : vector<16x32xf32> to vector<16x32xbf16>
      %c0_38 = arith.constant 0 : index
      %c96 = arith.constant 96 : index
      %63 = vector.load %arg7[%c0_38, %c96] : memref<16x128xbf16, #tpu.memory_space<vmem>>, vector<16x32xbf16>
      tpu.vector_store %arg7[%c0_38, %c96], %62 {strides = array<i32>} : memref<16x128xbf16, #tpu.memory_space<vmem>>, vector<16x32xbf16>,
    } else {
    }
    return
  }
  func.func @transform_0(%arg0: i32, %arg1: i32) -> (i32, i32) {
    %c0_i32 = arith.constant 0 : i32
    return %arg0, %arg1 : i32, i32
  }
  func.func @transform_1(%arg0: i32, %arg1: i32) -> (i32, i32) {
    %c0_i32 = arith.constant 0 : i32
    %c0_i32_0 = arith.constant 0 : i32
    return %arg1, %c0_i32 : i32, i32
  }
  func.func @transform_2(%arg0: i32, %arg1: i32) -> (i32, i32) {
    %c0_i32 = arith.constant 0 : i32
    %c0_i32_0 = arith.constant 0 : i32
    %c0_i32_1 = arith.constant 0 : i32
    return %c0_i32, %c0_i32_0 : i32, i32
  }
  func.func @transform_3(%arg0: i32, %arg1: i32) -> (i32, i32) {
    %c0_i32 = arith.constant 0 : i32
    %c0_i32_0 = arith.constant 0 : i32
    %c0_i32_1 = arith.constant 0 : i32
    return %c0_i32, %c0_i32_0 : i32, i32
  }
  func.func @transform_4(%arg0: i32, %arg1: i32) -> (i32, i32) {
    %c0_i32 = arith.constant 0 : i32
    %c0_i32_0 = arith.constant 0 : i32
    %c0_i32_1 = arith.constant 0 : i32
    return %c0_i32, %c0_i32_0 : i32, i32
  }
  func.func @transform_5(%arg0: i32, %arg1: i32) -> (i32, i32) {
    %c0_i32 = arith.constant 0 : i32
    %c0_i32_0 = arith.constant 0 : i32
    return %arg0, %c0_i32 : i32, i32
  }
}

module attributes {stable_mosaic.version = 11 : i64} {
  func.func @kernel(%arg0: i32, %arg1: i32, %arg2: memref<64x288xbf16, #tpu.memory_space<vmem>>, %arg3: memref<288x128xbf16, #tpu.memory_space<vmem>>, %arg4: memref<1x128xf32, #tpu.memory_space<vmem>>, %arg5: memref<64x128xf32, #tpu.memory_space<vmem>>, %arg6: memref<64x128xf32, #tpu.memory_space<vmem>>) attributes {dimension_semantics = [#tpu.dimension_semantics<parallel>, #tpu.dimension_semantics<arbitrary>], iteration_bounds = array<i64: 2, 1>, scalar_prefetch = 0 : i64, scratch_operands = 1 : i64, tpu.core_type = #tpu.core_type<tc>, window_params = [{transform_indices = @transform_0, window_bounds = array<i64: 64, 288>}, {transform_indices = @transform_1, window_bounds = array<i64: 288, 128>}, {pipeline_mode = #tpu.pipeline_mode<synchronous>, transform_indices = @transform_2, window_bounds = array<i64: 1, 128>}, {transform_indices = @transform_3, window_bounds = array<i64: 64, 128>}]} {
    %c0_i32 = arith.constant 0 : i32
    %0 = arith.cmpi eq, %arg1, %c0_i32 : i32
    %1 = arith.extui %0 : i1 to i32
    %c0_i32_0 = arith.constant 0 : i32
    %2 = arith.cmpi ne, %1, %c0_i32_0 : i32
    scf.if %2 {
      %cst_10 = arith.constant 0.000000e+00 : f32
      %12 = vector.broadcast %cst_10 : f32 to vector<64x128xf32>
      %c0_11 = arith.constant 0 : index
      %c0_12 = arith.constant 0 : index
      %13 = vector.load %arg6[%c0_11, %c0_12] : memref<64x128xf32, #tpu.memory_space<vmem>>, vector<64x128xf32>
      tpu.vector_store %arg6[%c0_11, %c0_12], %12 {strides = array<i32>} : memref<64x128xf32, #tpu.memory_space<vmem>>, vector<64x128xf32>,
    } else {
    }
    %c0 = arith.constant 0 : index
    %c0_1 = arith.constant 0 : index
    %3 = vector.load %arg6[%c0, %c0_1] : memref<64x128xf32, #tpu.memory_space<vmem>>, vector<64x128xf32>
    %c0_2 = arith.constant 0 : index
    %c0_3 = arith.constant 0 : index
    %4 = vector.load %arg2[%c0_2, %c0_3] : memref<64x288xbf16, #tpu.memory_space<vmem>>, vector<64x288xbf16>
    %c0_4 = arith.constant 0 : index
    %c0_5 = arith.constant 0 : index
    %5 = vector.load %arg3[%c0_4, %c0_5] : memref<288x128xbf16, #tpu.memory_space<vmem>>, vector<288x128xbf16>
    %cst = arith.constant dense<0.000000e+00> : vector<64x128xf32>
    %6 = tpu.matmul %4, %5, %cst {dimension_numbers = #tpu.dot_dimension_numbers<[1], [0], [0], [1], [0, 0, 1, 1], [], []>} : vector<64x288xbf16>, vector<288x128xbf16>, vector<64x128xf32> -> vector<64x128xf32>
    %7 = arith.addf %3, %6 : vector<64x128xf32>
    %c0_6 = arith.constant 0 : index
    %c0_7 = arith.constant 0 : index
    %8 = vector.load %arg6[%c0_6, %c0_7] : memref<64x128xf32, #tpu.memory_space<vmem>>, vector<64x128xf32>
    tpu.vector_store %arg6[%c0_6, %c0_7], %7 {strides = array<i32>} : memref<64x128xf32, #tpu.memory_space<vmem>>, vector<64x128xf32>,
    %c0_i32_8 = arith.constant 0 : i32
    %9 = arith.cmpi eq, %arg1, %c0_i32_8 : i32
    %10 = arith.extui %9 : i1 to i32
    %c0_i32_9 = arith.constant 0 : i32
    %11 = arith.cmpi ne, %10, %c0_i32_9 : i32
    scf.if %11 {
      %c0_10 = arith.constant 0 : index
      %c0_11 = arith.constant 0 : index
      %12 = vector.load %arg6[%c0_10, %c0_11] : memref<64x128xf32, #tpu.memory_space<vmem>>, vector<64x128xf32>
      %c0_12 = arith.constant 0 : index
      %c0_13 = arith.constant 0 : index
      %13 = vector.load %arg4[%c0_12, %c0_13] : memref<1x128xf32, #tpu.memory_space<vmem>>, vector<1x128xf32>
      %14 = vector.broadcast %13 : vector<1x128xf32> to vector<64x128xf32>
      %15 = arith.addf %12, %14 : vector<64x128xf32>
      %cst_14 = arith.constant 0.000000e+00 : f32
      %cst_15 = arith.constant 1.000000e+00 : f32
      %16 = vector.broadcast %cst_14 : f32 to vector<64x128xf32>
      %17 = arith.maximumf %16, %15 : vector<64x128xf32>
      %18 = vector.broadcast %cst_15 : f32 to vector<64x128xf32>
      %19 = arith.minimumf %18, %17 : vector<64x128xf32>
      %c0_16 = arith.constant 0 : index
      %c0_17 = arith.constant 0 : index
      %20 = vector.load %arg5[%c0_16, %c0_17] : memref<64x128xf32, #tpu.memory_space<vmem>>, vector<64x128xf32>
      tpu.vector_store %arg5[%c0_16, %c0_17], %19 {strides = array<i32>} : memref<64x128xf32, #tpu.memory_space<vmem>>, vector<64x128xf32>,
    } else {
    }
    return
  }
  func.func @transform_0(%arg0: i32, %arg1: i32) -> (i32, i32) {
    %c0_i32 = arith.constant 0 : i32
    return %arg0, %arg1 : i32, i32
  }
  func.func @transform_1(%arg0: i32, %arg1: i32) -> (i32, i32) {
    %c0_i32 = arith.constant 0 : i32
    %c0_i32_0 = arith.constant 0 : i32
    return %arg1, %c0_i32 : i32, i32
  }
  func.func @transform_2(%arg0: i32, %arg1: i32) -> (i32, i32) {
    %c0_i32 = arith.constant 0 : i32
    %c0_i32_0 = arith.constant 0 : i32
    %c0_i32_1 = arith.constant 0 : i32
    return %c0_i32, %c0_i32_0 : i32, i32
  }
  func.func @transform_3(%arg0: i32, %arg1: i32) -> (i32, i32) {
    %c0_i32 = arith.constant 0 : i32
    %c0_i32_0 = arith.constant 0 : i32
    return %arg0, %c0_i32 : i32, i32
  }
}

</mosaic_0001>

<bundles_post_ra>
// kernel: _lambda_.6
= control target key start
LH: loop header
LB: loop body
LE: loop exit
PB: predicated region body
PF: predicated region fallthrough
CT: control target
= control target key end

     0   :  { %s1426_s18 = smov 0   ;;  %s1428_s19 = smov 0   ;;  %s1635_s0 = inlined_call_operand.vmem [shape: bf16[128,432], index: 0, kind: input, shape index: {}]   ;;  %s1636_s1 = inlined_call_operand.vmem [shape: bf16[432,128], index: 1, kind: input, shape index: {}]   ;;  %s1637_s2 = inlined_call_operand.vmem [shape: f32[1,128], index: 2, kind: input, shape index: {}]   ;;  %s1638_s3 = inlined_call_operand.vmem [shape: bf16[128,128], index: 3, kind: input, shape index: {}]   ;;  %s1639_s4 = inlined_call_operand.vmem [shape: f32[1,128], index: 4, kind: input, shape index: {}]   ;;  %s1640_s5 = inlined_call_operand.vmem [shape: bf16[128,128], index: 5, kind: output, shape index: {}]  }
   0x1   :  { %s1430_s20 = smov 0  }
   0x2 LB: > { %s27_s21 = sadd.s32 1, %s1389_s19  ;;  %p1090_p0 = scmp.ge.s32.totalorder %s1393_s20, 1  ;;  %s1393_s20 = sphi %s1430_s20, %s15_s20   ;;  %s1389_s19 = sphi %s1428_s19, %s1642_s19   ;;  %s1385_s18 = sphi %s1426_s18, %s1641_s18  }
   0x3   : > { %p29_p1 = scmp.ge.s32.totalorder %s27_s21, 2  ;;  %p219_p2 = scmp.lt.s32.totalorder %s1393_s20, 3 }
   0x5   : > { %s1644_s21 = smov (%p29_p1, %s27_s21), 0  ;;  %p220_p3 = pnand %p1090_p0, %p219_p2 }
   0x6   : > { %s1091_s15 = sshll.u32 (!%p220_p3), %s1385_s18, 3 }
   0x7   : > { %223 = sbr.rel (%p220_p3) target bundleno = 506 (0x1fa), region = 40  ;;  %p259_p4 = scmp.lt.s32.totalorder (!%p220_p3), %s1091_s15, 15 }
   0xc   : > { %v1296_v0 = vld [vmem:[%s1636_s1 + $0xb8] sm:$0xff]   ;;  %v1395_v1 = vmov 0   ;;  %v1299_v4 = vld [vmem:[%s1636_s1 + $0xb0] sm:$0xff]   ;;  %v1302_v7 = vld [vmem:[%s1636_s1 + $0xa8] sm:$0xff]   ;;  %s1646_s15 = smov (!%p259_p4, %s1091_s15), 15  ;;  %vm610_vm0 = vcmask 392192  }
   0xd   : > { %688 = vmatprep.subr.bf16.mxu1 %v1395_v1  ;;  %v1297_v2 = vld [vmem:[%s1636_s1 + $0x78] sm:$0xff]   ;;  %v1300_v5 = vld [vmem:[%s1636_s1 + $0x70] sm:$0xff]   ;;  %v1303_v8 = vld [vmem:[%s1636_s1 + $0x68] sm:$0xff]   ;;  %s1163_s10 = sshll.u32 %s1646_s15, 4  ;;  %s1095_s12 = sshll.u32 %s1646_s15, 2 }
   0xe   : > { %689 = vmatpush1.bf16.msra.mxu1 %v1296_v0  ;;  %v1298_v3 = vld [vmem:[%s1636_s1 + $0x38] sm:$0xff]   ;;  %1195 = vmatprep.subr.bf16.mxu0 %v1297_v2  ;;  %v1301_v6 = vld [vmem:[%s1636_s1 + $0x30] sm:$0xff]   ;;  %v1304_v9 = vld [vmem:[%s1636_s1 + $0x28] sm:$0xff]   ;;  %s1519_s24 = scalar_lea.vmem %s1635_s0, %s1163_s10  ;;  %s279_s16 = scalar_lea.vmem %s1640_s5, %s1095_s12 }
   0xf   : > { %690 = vmatprep.subr.bf16.mxu1 %v1395_v1  ;;  %1196 = vmatpush3.bf16.msra.mxu0 %v1298_v3  ;;  %v1305_v10 = vld [vmem:[%s1636_s1 + $0xa0] sm:$0xff]   ;;  %v1309_v13 = vld [vmem:[%s1636_s1 + $0x58] sm:$0xff]   ;;  %v1312_v16 = vld [vmem:[%s1636_s1 + $0x50] sm:$0xff]  }
  0x10   : > { %1197 = vmatprep.subr.bf16.mxu0 %v1300_v5  ;;  %v1306_v11 = vld [vmem:[%s1636_s1 + $0x60] sm:$0xff]   ;;  %v1308_v14 = vld [vmem:[%s1636_s1 + $0x98] sm:$0xff]   ;;  %v1311_v17 = vld [vmem:[%s1636_s1 + $0x90] sm:$0xff]  }
  0x11   : > { %v1307_v12 = vld [vmem:[%s1636_s1 + $0x20] sm:$0xff]   ;;  %v1310_v15 = vld [vmem:[%s1636_s1 + $0x18] sm:$0xff]   ;;  %v1313_v18 = vld [vmem:[%s1636_s1 + $0x10] sm:$0xff]  }
  0x12   : > { %691 = vmatpush1.bf16.msra.mxu1 %v1299_v4  ;;  %v1315_v19 = vld [vmem:[%s1636_s1 + $0x48] sm:$0xff]   ;;  %v1318_v22 = vld [vmem:[%s1636_s1 + $0x40] sm:$0xff]   ;;  %v1323_v26 = vld [vmem:[%s1636_s1 + $0xd0] sm:$0xff]  }
  0x13   : > { %692 = vmatprep.subr.bf16.mxu1 %v1395_v1  ;;  %1198 = vmatpush3.bf16.msra.mxu0 %v1301_v6  ;;  %v1314_v20 = vld [vmem:[%s1636_s1 + $0x88] sm:$0xff]   ;;  %v1322_v23 = vld [vmem:[%s1519_s24 + $0x4] ss:$16 sps:$4 sm:$0xff]   ;;  %v1320_v28 = vld [vmem:[%s1519_s24] ss:$16 sps:$4 sm:$0xff]  }
  0x14   : > { %1199 = vmatprep.subr.bf16.mxu0 %v1303_v8  ;;  %v1316_v21 = vld [vmem:[%s1636_s1 + $0x8] sm:$0xff]   ;;  %v1317_v24 = vld [vmem:[%s1636_s1 + $0x80] sm:$0xff]   ;;  %655 = vmatprep.mubr.bf16.mxu0 %v1322_v23  ;;  %v1347_v34 = vld [vmem:[%s1638_s3 + $0x38] sm:$0xff]  }
  0x15   : > { %v1319_v25 = vld [vmem:[%s1636_s1] sm:$0xff]   ;;  %v1331_v27 = vld [vmem:[%s1519_s24 + $0xc] ss:$16 sps:$4 sm:$0xff]   ;;  %v1329_v35 = vld [vmem:[%s1519_s24 + $0x8] ss:$16 sps:$4 sm:$0xff]  }
  0x16   : > { %693 = vmatpush1.bf16.msra.mxu1 %v1302_v7  ;;  %v1325_v29 = vld [vmem:[%s1519_s24 + $0x24] ss:$16 sps:$4 sm:$0xff]   ;;  %1139 = vmatprep.mubr.msk.bf16.mxu1 %vm610_vm0, %v1331_v27  ;;  %v1324_v30 = vld [vmem:[%s1636_s1 + $0xc8] sm:$0xff]   ;;  %v1328_v32 = vld [vmem:[%s1519_s24 + $0x20] ss:$16 sps:$4 sm:$0xff]  }
  0x17   : > { %694 = vmatprep.subr.bf16.mxu1 %v1395_v1  ;;  %1200 = vmatpush3.bf16.msra.mxu0 %v1304_v9  ;;  %v1327_v31 = vld [vmem:[%s1636_s1 + $0xc0] sm:$0xff]   ;;  %v1335_v36 = vld [vmem:[%s1519_s24 + $0x2c] ss:$16 sps:$4 sm:$0xff]   ;;  %v1337_v39 = vld [vmem:[%s1519_s24 + $0x28] ss:$16 sps:$4 sm:$0xff]  }
  0x18   : > { %1201 = vmatprep.subr.bf16.mxu0 %v1306_v11  ;;  %v1332_v33 = vld [vmem:[%s1519_s24 + $0x44] ss:$16 sps:$4 sm:$0xff]   ;;  %v1334_v37 = vld [vmem:[%s1519_s24 + $0x40] ss:$16 sps:$4 sm:$0xff]   ;;  %v1341_v40 = vld [vmem:[%s1519_s24 + $0x4c] ss:$16 sps:$4 sm:$0xff]  }
  0x19   : > { %v1338_v38 = vld [vmem:[%s1519_s24 + $0x64] ss:$16 sps:$4 sm:$0xff]   ;;  %v1340_v41 = vld [vmem:[%s1519_s24 + $0x60] ss:$16 sps:$4 sm:$0xff]   ;;  %v1343_v42 = vld [vmem:[%s1519_s24 + $0x48] ss:$16 sps:$4 sm:$0xff]  }
  0x1a   : > { %695 = vmatpush1.bf16.msra.mxu1 %v1305_v10  ;;  %v1344_v43 = vld [vmem:[%s1519_s24 + $0x6c] ss:$16 sps:$4 sm:$0xff]   ;;  %v1346_v44 = vld [vmem:[%s1519_s24 + $0x68] ss:$16 sps:$4 sm:$0xff]   ;;  %v1348_v45 = vld [vmem:[%s1638_s3 + $0x30] sm:$0xff]  }
  0x1b   : > { %696 = vmatprep.subr.bf16.mxu1 %v1395_v1  ;;  %1202 = vmatpush3.bf16.msra.mxu0 %v1307_v12  ;;  %v1349_v46 = vld [vmem:[%s1638_s3 + $0x28] sm:$0xff]   ;;  %v1350_v47 = vld [vmem:[%s1638_s3 + $0x20] sm:$0xff]   ;;  %v1351_v48 = vld [vmem:[%s1638_s3 + $0x18] sm:$0xff]  }
  0x1c   : > { %1203 = vmatprep.subr.bf16.mxu0 %v1309_v13  ;;  %v1352_v49 = vld [vmem:[%s1638_s3 + $0x10] sm:$0xff]   ;;  %v1353_v50 = vld [vmem:[%s1638_s3 + $0x8] sm:$0xff]   ;;  %v1354_v51 = vld [vmem:[%s1638_s3] sm:$0xff]  }
  0x1d   : > { %v1143_v61 = vld [vmem:[%s1637_s2] ss:$0 sm:$0xff] }
  0x1e   : > { %697 = vmatpush1.bf16.msra.mxu1 %v1308_v14 }
  0x1f   : > { %698 = vmatprep.subr.bf16.mxu1 %v1395_v1  ;;  %1204 = vmatpush3.bf16.msra.mxu0 %v1310_v15 }
  0x20   : > { %1205 = vmatprep.subr.bf16.mxu0 %v1312_v16 }
  0x22   : > { %699 = vmatpush1.bf16.msra.mxu1 %v1311_v17 }
  0x23   : > { %700 = vmatprep.subr.bf16.mxu1 %v1395_v1  ;;  %1206 = vmatpush3.bf16.msra.mxu0 %v1313_v18 }
  0x24   : > { %1207 = vmatprep.subr.bf16.mxu0 %v1315_v19 }
  0x26   : > { %701 = vmatpush1.bf16.msra.mxu1 %v1314_v20 }
  0x27   : > { %702 = vmatprep.subr.bf16.mxu1 %v1395_v1  ;;  %1208 = vmatpush3.bf16.msra.mxu0 %v1316_v21 }
  0x28   : > { %1209 = vmatprep.subr.bf16.mxu0 %v1318_v22 }
  0x2a   : > { %703 = vmatpush1.bf16.msra.mxu1 %v1317_v24 }
  0x2b   : > { %714 = vmatprep.subr.bf16.mxu1 %v1395_v1  ;;  %1210 = vmatpush3.bf16.msra.mxu0 %v1319_v25 }
  0x2c   : > { %1247 = vmatprep.subr.bf16.mxu0 %v1347_v34 }
  0x2e   : > { %715 = vmatpush2.bf16.msra.mxu1 %v1323_v26  ;;  %656 = vmatmul.mubr.bf16.vlgmr.msra.gmra.mxu0 %v1320_v28 }
  0x2f   : > { %716 = vmatprep.subr.bf16.mxu1 %v1395_v1  ;;  %663 = vmatprep.mubr.bf16.mxu0 %v1325_v29 }
  0x30   : > { %1248 = vmatpush3.bf16.msra.mxu0 %v1347_v34 }
  0x31   : > { %1249 = vmatprep.subr.bf16.mxu0 %v1348_v45 }
  0x32   : > { %717 = vmatpush2.bf16.msra.mxu1 %v1324_v30 }
  0x33   : > { %718 = vmatprep.subr.bf16.mxu1 %v1395_v1 }
  0x34   : > { %1250 = vmatpush3.bf16.msra.mxu0 %v1348_v45 }
  0x35   : > { %1251 = vmatprep.subr.bf16.mxu0 %v1349_v46 }
  0x36   : > { %719 = vmatpush2.bf16.msra.mxu1 %v1327_v31  ;;  %664 = vmatmul.mubr.bf16.gmra.mxu0 %v1328_v32 }
  0x37   : > { %671 = vmatprep.mubr.bf16.mxu0 %v1332_v33 }
  0x38   : > { %1252 = vmatpush3.bf16.msra.mxu0 %v1349_v46 }
  0x39   : > { %721 = vmatmul.mubr.bf16.vlgmr.msra.gmra.mxu1 %v1329_v35  ;;  %1253 = vmatprep.subr.bf16.mxu0 %v1350_v47 }
  0x3a   : > { %1140 = vmatprep.mubr.msk.bf16.mxu1 %vm610_vm0, %v1335_v36 }
  0x3c   : > { %1254 = vmatpush3.bf16.msra.mxu0 %v1350_v47 }
  0x3d   : > { %1255 = vmatprep.subr.bf16.mxu0 %v1351_v48 }
  0x3e   : > { %672 = vmatmul.mubr.bf16.gmra.mxu0 %v1334_v37 }
  0x3f   : > { %679 = vmatprep.mubr.bf16.mxu0 %v1338_v38 }
  0x40   : > { %1256 = vmatpush3.bf16.msra.mxu0 %v1351_v48 }
  0x41   : > { %729 = vmatmul.mubr.bf16.gmra.mxu1 %v1337_v39  ;;  %1257 = vmatprep.subr.bf16.mxu0 %v1352_v49 }
  0x42   : > { %1141 = vmatprep.mubr.msk.bf16.mxu1 %vm610_vm0, %v1341_v40 }
  0x44   : > { %1258 = vmatpush3.bf16.msra.mxu0 %v1352_v49 }
  0x45   : > { %1259 = vmatprep.subr.bf16.mxu0 %v1353_v50 }
  0x46   : > { %680 = vmatmul.mubr.bf16.gmra.mxu0 %v1340_v41 }
  0x48   : > { %1260 = vmatpush3.bf16.msra.mxu0 %v1353_v50 }
  0x49   : > { %737 = vmatmul.mubr.bf16.gmra.mxu1 %v1343_v42  ;;  %1261 = vmatprep.subr.bf16.mxu0 %v1354_v51 }
  0x4a   : > { %1142 = vmatprep.mubr.msk.bf16.mxu1 %vm610_vm0, %v1344_v43 }
  0x4c   : > { %1262 = vmatpush3.bf16.msra.mxu0 %v1354_v51 }
  0x51   : > { %745 = vmatmul.mubr.bf16.gmra.mxu1 %v1346_v44 }
  0xee   : > { %v1211_v52 = vpop.f32.mrf.mxu0 }
  0xf0   : > { %v1212_v53 = vpop.f32.mrf.mxu0 }
  0xf1   : > { %v1213_v57 = vadd.f32 %v1212_v53, %v1211_v52 }
  0xf2   : > { %v1214_v54 = vpop.f32.mrf.mxu0 }
  0xf4   : > { %v1215_v55 = vpop.f32.mrf.mxu0 }
  0xf5   : > { %v1216_v0 = vadd.f32 %v1215_v55, %v1214_v54 }
  0xf6   : > { %v1217_v56 = vpop.f32.mrf.mxu0 }
  0xf8   : > { %v1218_v58 = vpop.f32.mrf.mxu0 }
  0xf9   : > { %v722_v59 = vpop.f32.mrf.mxu1  ;;  %v1219_v7 = vadd.f32 %v1218_v58, %v1217_v56 }
  0xfa   : > { %v723_v60 = vadd.f32 %v1213_v57, %v722_v59  ;;  %v1220_v62 = vpop.f32.mrf.mxu0  ;;  %v1144_v57 = vld [vmem:[%s1639_s4] ss:$0 sm:$0xff] }
  0xfb   : > { %v724_v63 = vpop.f32.mrf.mxu1 }
  0xfc   : > { %v1221_v1 = vpop.f32.mrf.mxu0  ;;  %v1594_v3 = vadd.f32 %v1143_v61, %v723_v60 }
  0xfd   : > { %v725_v2 = vpop.f32.mrf.mxu1  ;;  %v1222_v16 = vadd.f32 %v1221_v1, %v1220_v62 }
  0xfe   : > { %v726_v4 = vadd.f32 %v1216_v0, %v725_v2  ;;  %v1223_v5 = vpop.f32.mrf.mxu0  ;;  %v795_v11 = vmul.f32 %v1594_v3, %v1594_v3 }
  0xff   : > { %v727_v6 = vpop.f32.mrf.mxu1 }
 0x100   : > { %v1596_v8 = vadd.f32 %v1143_v61, %v726_v4  ;;  %v1224_v9 = vpop.f32.mrf.mxu0 }
 0x101   : > { %v730_v10 = vpop.f32.mrf.mxu1  ;;  %v1225_v24 = vadd.f32 %v1224_v9, %v1223_v5 }
 0x102   : > { %v796_v12 = vmul.f32 %v1596_v8, %v1596_v8  ;;  %v731_v13 = vadd.f32 %v1219_v7, %v730_v10  ;;  %v1226_v14 = vpop.f32.mrf.mxu0 }
 0x103   : > { %v732_v15 = vpop.f32.mrf.mxu1 }
 0x104   : > { %v803_v17 = vpack.c.bf16 %v796_v12, %v795_v11  ;;  %v1227_v18 = vpop.f32.mrf.mxu0  ;;  %v1602_v20 = vadd.f32 %v1143_v61, %v731_v13 }
 0x105   : > { %v733_v19 = vpop.f32.mrf.mxu1  ;;  %v1228_v32 = vadd.f32 %v1227_v18, %v1226_v14 }
 0x106   : > { %v734_v21 = vadd.f32 %v1222_v16, %v733_v19  ;;  %1263 = vmatprep.mubr.bf16.mxu0 %v803_v17  ;;  %v1229_v22 = vpop.f32.mrf.mxu0  ;;  %v797_v28 = vmul.f32 %v1602_v20, %v1602_v20 }
 0x107   : > { %v735_v23 = vpop.f32.mrf.mxu1 }
 0x108   : > { %v790_v25 = vadd.f32 %v1143_v61, %v734_v21  ;;  %v1230_v26 = vpop.f32.mrf.mxu0 }
 0x109   : > { %v738_v27 = vpop.f32.mrf.mxu1  ;;  %v1231_v39 = vadd.f32 %v1230_v26, %v1229_v22 }
 0x10a   : > { %v798_v29 = vmul.f32 %v790_v25, %v790_v25  ;;  %v739_v30 = vadd.f32 %v1225_v24, %v738_v27  ;;  %v1232_v34 = vpop.f32.mrf.mxu0 }
 0x10b   : > { %v740_v31 = vpop.f32.mrf.mxu1 }
 0x10c   : > { %v804_v33 = vpack.c.bf16 %v798_v29, %v797_v28  ;;  %v1606_v36 = vadd.f32 %v1143_v61, %v739_v30  ;;  %v1233_v41 = vpop.f32.mrf.mxu0 }
 0x10d   : > { %v741_v35 = vpop.f32.mrf.mxu1  ;;  %v1234_v47 = vadd.f32 %v1233_v41, %v1232_v34 }
 0x10e   : > { %v742_v37 = vadd.f32 %v1228_v32, %v741_v35  ;;  %1264 = vmatmul.mubr.bf16.vlgmr.msra.gmra.mxu0 %v804_v33  ;;  %v799_v43 = vmul.f32 %v1606_v36, %v1606_v36 }
 0x10f   : > { %v743_v38 = vpop.f32.mrf.mxu1 }
 0x110   : > { %v1608_v40 = vadd.f32 %v1143_v61, %v742_v37 }
 0x111   : > { %v746_v42 = vpop.f32.mrf.mxu1 }
 0x112   : > { %v800_v44 = vmul.f32 %v1608_v40, %v1608_v40  ;;  %v747_v45 = vadd.f32 %v1231_v39, %v746_v42 }
 0x113   : > { %v748_v46 = vpop.f32.mrf.mxu1 }
 0x114   : > { %v805_v48 = vpack.c.bf16 %v800_v44, %v799_v43  ;;  %v793_v50 = vadd.f32 %v1143_v61, %v747_v45 }
 0x115   : > { %v749_v49 = vpop.f32.mrf.mxu1 }
 0x116   : > { %v750_v51 = vadd.f32 %v1234_v47, %v749_v49  ;;  %1267 = vmatprep.mubr.bf16.mxu0 %v805_v48  ;;  %v801_v54 = vmul.f32 %v793_v50, %v793_v50 }
 0x117   : > { %v751_v52 = vpop.f32.mrf.mxu1 }
 0x118   : > { %v794_v53 = vadd.f32 %v1143_v61, %v750_v51 }
 0x11a   : > { %v802_v55 = vmul.f32 %v794_v53, %v794_v53 }
 0x11c   : > { %v806_v56 = vpack.c.bf16 %v802_v55, %v801_v54 }
 0x11e   : > { %1268 = vmatmul.mubr.bf16.gmra.mxu0 %v806_v56 }
 0x1ce   : > { %v1265_v58 = vpop.f32.mrf.mxu0 }
 0x1cf   : > { %v921_v59 = vadd.f32 %v1265_v58, %v1144_v57 }
 0x1d0   : > { %v912_v60 = vpop.f32.mrf.mxu0 }
 0x1d1   : > { %v913_v62 = vadd.f32 %v1144_v57, %v912_v60  ;;  %1355 = vrsqrt.f32 %v921_v59 }
 0x1d2   : > { %v1266_v63 = vpop.f32.mrf.mxu0 }
 0x1d3   : > { %v924_v0 = vadd.f32 %v1266_v63, %v1144_v57  ;;  %1357 = vrsqrt.f32 %v913_v62 }
 0x1d4   : > { %v915_v1 = vpop.f32.mrf.mxu0 }
 0x1d5   : > { %1359 = vrsqrt.f32 %v924_v0  ;;  %v916_v61 = vadd.f32 %v1144_v57, %v915_v1 }
 0x1d7   : > { %1361 = vrsqrt.f32 %v916_v61 }
 0x1de   : > { %v1269_v2 = vpop.f32.mrf.mxu0  ;;  %v1356_v5 = vpop.eup %1355 }
 0x1df   : > { %v937_v4 = vadd.f32 %v1269_v2, %v1144_v57  ;;  %v953_v12 = vmul.f32 %v1356_v5, %v1602_v20 }
 0x1e0   : > { %v928_v6 = vpop.f32.mrf.mxu0  ;;  %v1358_v7 = vpop.eup %1357 }
 0x1e1   : > { %v929_v9 = vadd.f32 %v1144_v57, %v928_v6  ;;  %1363 = vrsqrt.f32 %v937_v4  ;;  %v951_v16 = vmul.f32 %v1358_v7, %v1594_v3 }
 0x1e2   : > { %v1360_v10 = vpop.eup %1359  ;;  %v1270_v11 = vpop.f32.mrf.mxu0 }
 0x1e3   : > { %v954_v13 = vmul.f32 %v1360_v10, %v790_v25  ;;  %v940_v14 = vadd.f32 %v1270_v11, %v1144_v57  ;;  %1365 = vrsqrt.f32 %v929_v9 }
 0x1e4   : > { %v1362_v15 = vpop.eup %1361  ;;  %v931_v17 = vpop.f32.mrf.mxu0 }
 0x1e5   : > { %v1180_v18 = vpack.c.bf16 %v954_v13, %v953_v12  ;;  %v952_v19 = vmul.f32 %v1362_v15, %v1596_v8  ;;  %1367 = vrsqrt.f32 %v940_v14  ;;  %v932_v21 = vadd.f32 %v1144_v57, %v931_v17 }
 0x1e7   : > { %1192 = vst [vmem:[%s279_s16 + $0x8] sm:$0xff] %v1180_v18   ;;  %v1175_v22 = vpack.c.bf16 %v952_v19, %v951_v16  ;;  %1369 = vrsqrt.f32 %v932_v21 }
 0x1e9   : > { %1176 = vst [vmem:[%s279_s16] sm:$0xff] %v1175_v22  }
 0x1ee   : > { %v1364_v20 = vpop.eup %1363 }
 0x1ef   : > { %v957_v25 = vmul.f32 %v1364_v20, %v793_v50 }
 0x1f0   : > { %v1366_v23 = vpop.eup %1365 }
 0x1f1   : > { %v955_v27 = vmul.f32 %v1366_v23, %v1606_v36 }
 0x1f2   : > { %v1368_v24 = vpop.eup %1367 }
 0x1f3   : > { %v958_v3 = vmul.f32 %v1368_v24, %v794_v53 }
 0x1f4   : > { %v1370_v26 = vpop.eup %1369 }
 0x1f5   : > { %v1190_v28 = vpack.c.bf16 %v958_v3, %v957_v25  ;;  %v956_v29 = vmul.f32 %v1370_v26, %v1608_v40 }
 0x1f7   : > { %1194 = vst [vmem:[%s279_s16 + $0x18] sm:$0xff] %v1190_v28   ;;  %v1185_v30 = vpack.c.bf16 %v956_v29, %v955_v27 }
 0x1f9   : > { %1193 = vst [vmem:[%s279_s16 + $0x10] sm:$0xff] %v1185_v30  }
 0x1fa PF: > { %s15_s20 = sadd.s32 1, %s1393_s20   ;;  %s1641_s18 = smov %s1389_s19 }
 0x1fb   : > { %p12_p5 = scmp.ge.s32.totalorder %s15_s20, 4   ;;  %s1642_s19 = smov %s1644_s21 }
 0x1fd   :  { %14 = sbr.rel (!%p12_p5) target bundleno = 2 (0x2), region = 81 }

// kernel: _lambda_.7
= control target key start
LH: loop header
LB: loop body
LE: loop exit
PB: predicated region body
PF: predicated region fallthrough
CT: control target
= control target key end

     0   :  { %s1798_s18 = smov 0   ;;  %s1800_s19 = smov 0   ;;  %s2095_s0 = inlined_call_operand.vmem [shape: bf16[32,1152], index: 0, kind: input, shape index: {}]   ;;  %s2096_s1 = inlined_call_operand.vmem [shape: bf16[1152,128], index: 1, kind: input, shape index: {}]   ;;  %s2097_s2 = inlined_call_operand.vmem [shape: f32[1,128], index: 2, kind: input, shape index: {}]   ;;  %s2098_s3 = inlined_call_operand.vmem [shape: bf16[128,128], index: 3, kind: input, shape index: {}]   ;;  %s2099_s4 = inlined_call_operand.vmem [shape: f32[1,128], index: 4, kind: input, shape index: {}]   ;;  %s2100_s5 = inlined_call_operand.vmem [shape: bf16[32,128], index: 5, kind: output, shape index: {}]  }
   0x1   :  { %s1802_s20 = smov 0  }
   0x2 LB: > { %s27_s21 = sadd.s32 1, %s1760_s19  ;;  %p1365_p0 = scmp.ge.s32.totalorder %s1764_s20, 1  ;;  %s1764_s20 = sphi %s1802_s20, %s15_s20   ;;  %s1760_s19 = sphi %s1800_s19, %s2102_s19   ;;  %s1756_s18 = sphi %s1798_s18, %s2101_s18  }
   0x3   : > { %p29_p1 = scmp.ge.s32.totalorder %s27_s21, 2  ;;  %p219_p2 = scmp.lt.s32.totalorder %s1764_s20, 3 }
   0x5   : > { %s2104_s21 = smov (%p29_p1, %s27_s21), 0  ;;  %p220_p3 = pnand %p1365_p0, %p219_p2 }
   0x6   : > { %s1366_s6 = sshll.u32 (!%p220_p3), %s1756_s18, 1 }
   0x7   : > { %223 = sbr.rel (%p220_p3) target bundleno = 533 (0x215), region = 40  ;;  %p259_p4 = scmp.lt.s32.totalorder (!%p220_p3), %s1366_s6, 3 }
   0xc   : > { %v1645_v0 = vld [vmem:[%s2096_s1 + $0x78] sm:$0xff]   ;;  %v1649_v4 = vld [vmem:[%s2096_s1 + $0x70] sm:$0xff]   ;;  %v1653_v8 = vld [vmem:[%s2096_s1 + $0x68] sm:$0xff]   ;;  %s2106_s6 = smov (!%p259_p4, %s1366_s6), 3  ;;  %vm1767_vm0 = vmmov 0  }
   0xd   : > { %v1646_v1 = vld [vmem:[%s2096_s1 + $0xf8] sm:$0xff]   ;;  %1472 = vmatprep.subr.bf16.mxu0 %v1645_v0  ;;  %v1650_v5 = vld [vmem:[%s2096_s1 + $0xf0] sm:$0xff]   ;;  %v1654_v9 = vld [vmem:[%s2096_s1 + $0xe8] sm:$0xff]   ;;  %s1618_s8 = smul.u32 36, %s2106_s6  ;;  %s1369_s26 = sshll.u32 %s2106_s6, 2 }
   0xe   : > { %v1647_v2 = vld [vmem:[%s2096_s1 + $0x38] sm:$0xff]   ;;  %1494 = vmatprep.subr.bf16.mxu1 %v1646_v1  ;;  %v1651_v6 = vld [vmem:[%s2096_s1 + $0x30] sm:$0xff]   ;;  %v1655_v10 = vld [vmem:[%s2096_s1 + $0x28] sm:$0xff]   ;;  %s279_s29 = scalar_lea.vmem %s2100_s5, %s1369_s26 }
   0xf   : > { %v1648_v3 = vld [vmem:[%s2096_s1 + $0xb8] sm:$0xff]   ;;  %1473 = vmatpush3.bf16.msra.mxu0 %v1647_v2  ;;  %v1652_v7 = vld [vmem:[%s2096_s1 + $0xb0] sm:$0xff]   ;;  %v1656_v11 = vld [vmem:[%s2096_s1 + $0xa8] sm:$0xff]   ;;  %s1915_s22 = scalar_lea.vmem %s2095_s0, %s1618_s8 }
  0x10   : > { %1495 = vmatpush3.bf16.msra.mxu1 %v1648_v3  ;;  %1474 = vmatprep.subr.bf16.mxu0 %v1649_v4  ;;  %v1657_v12 = vld [vmem:[%s2096_s1 + $0x60] sm:$0xff]   ;;  %v1661_v16 = vld [vmem:[%s2096_s1 + $0x58] sm:$0xff]   ;;  %v1665_v20 = vld [vmem:[%s2096_s1 + $0x50] sm:$0xff]  }
  0x11   : > { %1496 = vmatprep.subr.bf16.mxu1 %v1650_v5  ;;  %v1658_v13 = vld [vmem:[%s2096_s1 + $0xe0] sm:$0xff]   ;;  %v1662_v17 = vld [vmem:[%s2096_s1 + $0xd8] sm:$0xff]   ;;  %v1666_v21 = vld [vmem:[%s2096_s1 + $0xd0] sm:$0xff]  }
  0x12   : > { %v1659_v14 = vld [vmem:[%s2096_s1 + $0x20] sm:$0xff]   ;;  %v1663_v18 = vld [vmem:[%s2096_s1 + $0x18] sm:$0xff]   ;;  %v1667_v22 = vld [vmem:[%s2096_s1 + $0x10] sm:$0xff]  }
  0x13   : > { %1475 = vmatpush3.bf16.msra.mxu0 %v1651_v6  ;;  %v1660_v15 = vld [vmem:[%s2096_s1 + $0xa0] sm:$0xff]   ;;  %v1664_v19 = vld [vmem:[%s2096_s1 + $0x98] sm:$0xff]   ;;  %v1668_v23 = vld [vmem:[%s2096_s1 + $0x90] sm:$0xff]   ;;  %v1766_v6 = vmov 0.0  }
  0x14   : > { %1497 = vmatpush3.bf16.msra.mxu1 %v1652_v7  ;;  %1476 = vmatprep.subr.bf16.mxu0 %v1653_v8  ;;  %v1669_v24 = vld [vmem:[%s2096_s1 + $0x48] sm:$0xff]   ;;  %v1673_v28 = vld [vmem:[%s2096_s1 + $0x40] sm:$0xff]   ;;  %v1683_v36 = vld [vmem:[%s2096_s1 + $0x178] sm:$0xff]  }
  0x15   : > { %1498 = vmatprep.subr.bf16.mxu1 %v1654_v9  ;;  %v1670_v25 = vld [vmem:[%s2096_s1 + $0xc8] sm:$0xff]   ;;  %v1674_v29 = vld [vmem:[%s2096_s1 + $0xc0] sm:$0xff]   ;;  %v1684_v37 = vld [vmem:[%s2096_s1 + $0x138] sm:$0xff]  }
  0x16   : > { %v1671_v26 = vld [vmem:[%s2096_s1 + $0x8] sm:$0xff]   ;;  %v1675_v30 = vld [vmem:[%s2096_s1] sm:$0xff]   ;;  %v1685_v38 = vld [vmem:[%s2096_s1 + $0x1f8] sm:$0xff]  }
  0x17   : > { %1477 = vmatpush3.bf16.msra.mxu0 %v1655_v10  ;;  %v1672_v27 = vld [vmem:[%s2096_s1 + $0x88] sm:$0xff]   ;;  %v1676_v31 = vld [vmem:[%s2096_s1 + $0x80] sm:$0xff]   ;;  %v1686_v39 = vld [vmem:[%s2096_s1 + $0x1b8] sm:$0xff]  }
  0x18   : > { %1499 = vmatpush3.bf16.msra.mxu1 %v1656_v11  ;;  %1478 = vmatprep.subr.bf16.mxu0 %v1657_v12  ;;  %v1677_v32 = vld [vmem:[%s1915_s22] ss:$36 sps:$4 sm:$0xff]   ;;  %v1680_v34 = vld [vmem:[%s1915_s22 + $0x8] ss:$36 sps:$4 sm:$0xff]   ;;  %v1687_v40 = vld [vmem:[%s2096_s1 + $0x170] sm:$0xff]  }
  0x19   : > { %1500 = vmatprep.subr.bf16.mxu1 %v1658_v13  ;;  %v1679_v33 = vld [vmem:[%s1915_s22 + $0x4] ss:$36 sps:$4 sm:$0xff]   ;;  %v1682_v35 = vld [vmem:[%s1915_s22 + $0xc] ss:$36 sps:$4 sm:$0xff]   ;;  %v1699_v52 = vld [vmem:[%s2096_s1 + $0x158] sm:$0xff]  }
  0x1a   : > { %954 = vmatprep.mubr.bf16.mxu0 %v1679_v33  ;;  %995 = vmatprep.mubr.bf16.mxu1 %v1682_v35  ;;  %v1688_v41 = vld [vmem:[%s2096_s1 + $0x130] sm:$0xff]   ;;  %v1691_v44 = vld [vmem:[%s2096_s1 + $0x168] sm:$0xff]   ;;  %v1695_v48 = vld [vmem:[%s2096_s1 + $0x160] sm:$0xff]  }
  0x1b   : > { %1479 = vmatpush3.bf16.msra.mxu0 %v1659_v14  ;;  %v1689_v42 = vld [vmem:[%s2096_s1 + $0x1f0] sm:$0xff]   ;;  %v1692_v45 = vld [vmem:[%s2096_s1 + $0x128] sm:$0xff]   ;;  %v1696_v49 = vld [vmem:[%s2096_s1 + $0x120] sm:$0xff]  }
  0x1c   : > { %1501 = vmatpush3.bf16.msra.mxu1 %v1660_v15  ;;  %1480 = vmatprep.subr.bf16.mxu0 %v1661_v16  ;;  %v1690_v43 = vld [vmem:[%s2096_s1 + $0x1b0] sm:$0xff]   ;;  %v1693_v46 = vld [vmem:[%s2096_s1 + $0x1e8] sm:$0xff]   ;;  %v1697_v50 = vld [vmem:[%s2096_s1 + $0x1e0] sm:$0xff]  }
  0x1d   : > { %1502 = vmatprep.subr.bf16.mxu1 %v1662_v17  ;;  %v1694_v47 = vld [vmem:[%s2096_s1 + $0x1a8] sm:$0xff]   ;;  %v1698_v51 = vld [vmem:[%s2096_s1 + $0x1a0] sm:$0xff]   ;;  %v1700_v53 = vld [vmem:[%s2096_s1 + $0x118] sm:$0xff]  }
  0x1e   : > { %v1701_v54 = vld [vmem:[%s2096_s1 + $0x1d8] sm:$0xff]   ;;  %v1703_v56 = vld [vmem:[%s2096_s1 + $0x150] sm:$0xff]   ;;  %v1707_v60 = vld [vmem:[%s2096_s1 + $0x148] sm:$0xff]  }
  0x1f   : > { %1481 = vmatpush3.bf16.msra.mxu0 %v1663_v18  ;;  %v1702_v55 = vld [vmem:[%s2096_s1 + $0x198] sm:$0xff]   ;;  %v1704_v57 = vld [vmem:[%s2096_s1 + $0x110] sm:$0xff]   ;;  %v1708_v61 = vld [vmem:[%s2096_s1 + $0x108] sm:$0xff]  }
  0x20   : > { %1503 = vmatpush3.bf16.msra.mxu1 %v1664_v19  ;;  %1482 = vmatprep.subr.bf16.mxu0 %v1665_v20  ;;  %v1705_v58 = vld [vmem:[%s2096_s1 + $0x1d0] sm:$0xff]   ;;  %v1709_v62 = vld [vmem:[%s2096_s1 + $0x1c8] sm:$0xff]   ;;  %v1711_v0 = vld [vmem:[%s2096_s1 + $0x140] sm:$0xff]  }
  0x21   : > { %1504 = vmatprep.subr.bf16.mxu1 %v1666_v21  ;;  %v1706_v59 = vld [vmem:[%s2096_s1 + $0x190] sm:$0xff]   ;;  %v1710_v63 = vld [vmem:[%s2096_s1 + $0x188] sm:$0xff]   ;;  %v1712_v1 = vld [vmem:[%s2096_s1 + $0x100] sm:$0xff]  }
  0x22   : > { %v1713_v2 = vld [vmem:[%s2096_s1 + $0x1c0] sm:$0xff]   ;;  %v1714_v3 = vld [vmem:[%s1915_s22 + $0x10] ss:$36 sps:$4 sm:$0xff]   ;;  %v1718_v7 = vld [vmem:[%s1915_s22 + $0x18] ss:$36 sps:$4 sm:$0xff]  }
  0x23   : > { %1483 = vmatpush3.bf16.msra.mxu0 %v1667_v22  ;;  %v1716_v4 = vld [vmem:[%s1915_s22 + $0x14] ss:$36 sps:$4 sm:$0xff]   ;;  %v1717_v5 = vld [vmem:[%s2096_s1 + $0x180] sm:$0xff]   ;;  %v1723_v11 = vld [vmem:[%s2096_s1 + $0x228] sm:$0xff]  }
  0x24   : > { %1505 = vmatpush3.bf16.msra.mxu1 %v1668_v23  ;;  %1484 = vmatprep.subr.bf16.mxu0 %v1669_v24  ;;  %v1720_v8 = vld [vmem:[%s1915_s22 + $0x1c] ss:$36 sps:$4 sm:$0xff]   ;;  %v1722_v10 = vld [vmem:[%s2096_s1 + $0x230] sm:$0xff]   ;;  %v1727_v15 = vld [vmem:[%s2096_s1 + $0x208] sm:$0xff]  }
  0x25   : > { %1506 = vmatprep.subr.bf16.mxu1 %v1670_v25  ;;  %v1721_v9 = vld [vmem:[%s2096_s1 + $0x238] sm:$0xff]   ;;  %v1724_v12 = vld [vmem:[%s2096_s1 + $0x220] sm:$0xff]   ;;  %v1726_v14 = vld [vmem:[%s2096_s1 + $0x210] sm:$0xff]  }
  0x26   : > { %v1725_v13 = vld [vmem:[%s2096_s1 + $0x218] sm:$0xff]   ;;  %v1728_v16 = vld [vmem:[%s2096_s1 + $0x200] sm:$0xff]   ;;  %v1731_v19 = vld [vmem:[%s2098_s3 + $0x30] sm:$0xff]  }
  0x27   : > { %1485 = vmatpush3.bf16.msra.mxu0 %v1671_v26  ;;  %v1729_v17 = vld [vmem:[%s1915_s22 + $0x20] ss:$36 sps:$4 sm:$0xff]   ;;  %v1730_v18 = vld [vmem:[%s2098_s3 + $0x38] sm:$0xff]   ;;  %v1732_v20 = vld [vmem:[%s2098_s3 + $0x28] sm:$0xff]  }
  0x28   : > { %1507 = vmatpush3.bf16.msra.mxu1 %v1672_v27  ;;  %1486 = vmatprep.subr.bf16.mxu0 %v1673_v28  ;;  %v1733_v21 = vld [vmem:[%s2098_s3 + $0x20] sm:$0xff]   ;;  %v1734_v22 = vld [vmem:[%s2098_s3 + $0x18] sm:$0xff]   ;;  %v1735_v23 = vld [vmem:[%s2098_s3 + $0x10] sm:$0xff]  }
  0x29   : > { %1508 = vmatprep.subr.bf16.mxu1 %v1674_v29  ;;  %v1736_v24 = vld [vmem:[%s2098_s3 + $0x8] sm:$0xff]   ;;  %v1737_v25 = vld [vmem:[%s2098_s3] sm:$0xff]  }
  0x2b   : > { %1487 = vmatpush3.bf16.msra.mxu0 %v1675_v30 }
  0x2c   : > { %1509 = vmatpush3.bf16.msra.mxu1 %v1676_v31  ;;  %1516 = vmatprep.subr.bf16.mxu0 %v1683_v36 }
  0x2d   : > { %1538 = vmatprep.subr.bf16.mxu1 %v1685_v38 }
  0x2e   : > { %955 = vmatmul.mubr.bf16.vlgmr.msra.gmra.mxu0 %v1677_v32 }
  0x2f   : > { %996 = vmatmul.mubr.bf16.vlgmr.msra.gmra.mxu1 %v1680_v34  ;;  %1517 = vmatpush3.bf16.msra.mxu0 %v1684_v37 }
  0x30   : > { %1539 = vmatpush3.bf16.msra.mxu1 %v1686_v39  ;;  %1518 = vmatprep.subr.bf16.mxu0 %v1687_v40 }
  0x31   : > { %1540 = vmatprep.subr.bf16.mxu1 %v1689_v42  ;;  %1036 = vmatprep.mubr.bf16.mxu0 %v1716_v4  ;;  %v1452_v4 = vld [vmem:[%s2099_s4] ss:$0 sm:$0xff] }
  0x32   : > { %1077 = vmatprep.mubr.bf16.mxu1 %v1720_v8 }
  0x33   : > { %1519 = vmatpush3.bf16.msra.mxu0 %v1688_v41 }
  0x34   : > { %1541 = vmatpush3.bf16.msra.mxu1 %v1690_v43  ;;  %1520 = vmatprep.subr.bf16.mxu0 %v1691_v44 }
  0x35   : > { %1542 = vmatprep.subr.bf16.mxu1 %v1693_v46 }
  0x37   : > { %1521 = vmatpush3.bf16.msra.mxu0 %v1692_v45 }
  0x38   : > { %1543 = vmatpush3.bf16.msra.mxu1 %v1694_v47  ;;  %1522 = vmatprep.subr.bf16.mxu0 %v1695_v48 }
  0x39   : > { %1544 = vmatprep.subr.bf16.mxu1 %v1697_v50 }
  0x3b   : > { %1523 = vmatpush3.bf16.msra.mxu0 %v1696_v49 }
  0x3c   : > { %1545 = vmatpush3.bf16.msra.mxu1 %v1698_v51  ;;  %1524 = vmatprep.subr.bf16.mxu0 %v1699_v52 }
  0x3d   : > { %1546 = vmatprep.subr.bf16.mxu1 %v1701_v54 }
  0x3f   : > { %1525 = vmatpush3.bf16.msra.mxu0 %v1700_v53 }
  0x40   : > { %1547 = vmatpush3.bf16.msra.mxu1 %v1702_v55  ;;  %1526 = vmatprep.subr.bf16.mxu0 %v1703_v56 }
  0x41   : > { %1548 = vmatprep.subr.bf16.mxu1 %v1705_v58 }
  0x43   : > { %1527 = vmatpush3.bf16.msra.mxu0 %v1704_v57  ;;  %v1451_v57 = vld [vmem:[%s2097_s2] ss:$0 sm:$0xff] }
  0x44   : > { %1549 = vmatpush3.bf16.msra.mxu1 %v1706_v59  ;;  %1528 = vmatprep.subr.bf16.mxu0 %v1707_v60 }
  0x45   : > { %1550 = vmatprep.subr.bf16.mxu1 %v1709_v62 }
  0x47   : > { %1529 = vmatpush3.bf16.msra.mxu0 %v1708_v61 }
  0x48   : > { %1551 = vmatpush3.bf16.msra.mxu1 %v1710_v63  ;;  %1530 = vmatprep.subr.bf16.mxu0 %v1711_v0 }
  0x49   : > { %1552 = vmatprep.subr.bf16.mxu1 %v1713_v2 }
  0x4b   : > { %1531 = vmatpush3.bf16.msra.mxu0 %v1712_v1 }
  0x4c   : > { %1578 = vmatprep.subr.bf16.mxu0 %v1766_v6  ;;  %1553 = vmatpush3.bf16.msra.mxu1 %v1717_v5 }
  0x4d   : > { %1598 = vmatprep.subr.bf16.mxu1 %v1766_v6 }
  0x4e   : > { %1037 = vmatmul.mubr.bf16.vlgmr.msra.gmra.mxu0 %v1714_v3 }
  0x4f   : > { %1594 = vmatprep.mubr.msk.bf16.mxu0 %vm1767_vm0, %v1766_v6  ;;  %1579 = vmatpush3.bf16.msra.mxu0 %v1721_v9 }
  0x50   : > { %1078 = vmatmul.mubr.bf16.vlgmr.msra.gmra.mxu1 %v1718_v7  ;;  %1580 = vmatprep.subr.bf16.mxu0 %v1766_v6 }
  0x51   : > { %1614 = vmatprep.mubr.msk.bf16.mxu1 %vm1767_vm0, %v1766_v6  ;;  %1599 = vmatpush3.bf16.msra.mxu1 %v1730_v18 }
  0x52   : > { %1600 = vmatprep.subr.bf16.mxu1 %v1766_v6 }
  0x53   : > { %1581 = vmatpush3.bf16.msra.mxu0 %v1722_v10 }
  0x54   : > { %1582 = vmatprep.subr.bf16.mxu0 %v1766_v6 }
  0x55   : > { %1601 = vmatpush3.bf16.msra.mxu1 %v1731_v19 }
  0x56   : > { %1602 = vmatprep.subr.bf16.mxu1 %v1766_v6 }
  0x57   : > { %1583 = vmatpush3.bf16.msra.mxu0 %v1723_v11 }
  0x58   : > { %1584 = vmatprep.subr.bf16.mxu0 %v1766_v6 }
  0x59   : > { %1603 = vmatpush3.bf16.msra.mxu1 %v1732_v20 }
  0x5a   : > { %1604 = vmatprep.subr.bf16.mxu1 %v1766_v6 }
  0x5b   : > { %1585 = vmatpush3.bf16.msra.mxu0 %v1724_v12 }
  0x5c   : > { %1586 = vmatprep.subr.bf16.mxu0 %v1766_v6 }
  0x5d   : > { %1605 = vmatpush3.bf16.msra.mxu1 %v1733_v21 }
  0x5e   : > { %1606 = vmatprep.subr.bf16.mxu1 %v1766_v6 }
  0x5f   : > { %1587 = vmatpush3.bf16.msra.mxu0 %v1725_v13 }
  0x60   : > { %1588 = vmatprep.subr.bf16.mxu0 %v1766_v6 }
  0x61   : > { %1607 = vmatpush3.bf16.msra.mxu1 %v1734_v22 }
  0x62   : > { %1608 = vmatprep.subr.bf16.mxu1 %v1766_v6 }
  0x63   : > { %1589 = vmatpush3.bf16.msra.mxu0 %v1726_v14 }
  0x64   : > { %1590 = vmatprep.subr.bf16.mxu0 %v1766_v6 }
  0x65   : > { %1609 = vmatpush3.bf16.msra.mxu1 %v1735_v23 }
  0x66   : > { %1610 = vmatprep.subr.bf16.mxu1 %v1766_v6 }
  0x67   : > { %1591 = vmatpush3.bf16.msra.mxu0 %v1727_v15 }
  0x68   : > { %1592 = vmatprep.subr.bf16.mxu0 %v1766_v6 }
  0x69   : > { %1611 = vmatpush3.bf16.msra.mxu1 %v1736_v24 }
  0x6a   : > { %1612 = vmatprep.subr.bf16.mxu1 %v1766_v6 }
  0x6b   : > { %1593 = vmatpush3.bf16.msra.mxu0 %v1728_v16 }
  0x6d   : > { %1613 = vmatpush3.bf16.msra.mxu1 %v1737_v25 }
  0x6e   : > { %1595 = vmatmul.mubr.bf16.vlgmr.msra.gmra.mxu0 %v1729_v17 }
  0xee   : > { %v1488_v26 = vpop.f32.mrf.mxu0 }
  0xef   : > { %v1510_v27 = vpop.f32.mrf.mxu1 }
  0xf0   : > { %v1489_v28 = vpop.f32.mrf.mxu0 }
  0xf1   : > { %v1511_v29 = vpop.f32.mrf.mxu1  ;;  %v1490_v39 = vadd.f32 %v1489_v28, %v1488_v26 }
  0xf2   : > { %v1491_v30 = vpop.f32.mrf.mxu0  ;;  %v1512_v40 = vadd.f32 %v1511_v29, %v1510_v27 }
  0xf3   : > { %v1513_v31 = vpop.f32.mrf.mxu1 }
  0xf4   : > { %v1492_v32 = vpop.f32.mrf.mxu0  ;;  %v998_v44 = vadd.f32 %v1512_v40, %v1490_v39 }
  0xf5   : > { %v1514_v34 = vpop.f32.mrf.mxu1  ;;  %v1493_v45 = vadd.f32 %v1492_v32, %v1491_v30 }
  0xf6   : > { %v1515_v46 = vadd.f32 %v1514_v34, %v1513_v31 }
  0xf8   : > { %v1001_v51 = vadd.f32 %v1515_v46, %v1493_v45 }
 0x10e   : > { %v1532_v33 = vpop.f32.mrf.mxu0 }
 0x110   : > { %v1533_v35 = vpop.f32.mrf.mxu0  ;;  %v1554_v36 = vpop.f32.mrf.mxu1 }
 0x111   : > { %v1534_v41 = vadd.f32 %v1533_v35, %v1532_v33 }
 0x112   : > { %v1535_v37 = vpop.f32.mrf.mxu0  ;;  %v1555_v38 = vpop.f32.mrf.mxu1 }
 0x113   : > { %v1039_v47 = vadd.f32 %v1534_v41, %v998_v44  ;;  %v1556_v48 = vadd.f32 %v1555_v38, %v1554_v36 }
 0x114   : > { %v1536_v42 = vpop.f32.mrf.mxu0  ;;  %v1557_v43 = vpop.f32.mrf.mxu1 }
 0x115   : > { %v1537_v49 = vadd.f32 %v1536_v42, %v1535_v37  ;;  %v1080_v54 = vadd.f32 %v1556_v48, %v1039_v47 }
 0x116   : > { %v1558_v50 = vpop.f32.mrf.mxu1 }
 0x117   : > { %v1042_v52 = vadd.f32 %v1537_v49, %v1001_v51  ;;  %v1559_v53 = vadd.f32 %v1558_v50, %v1557_v43 }
 0x119   : > { %v1083_v59 = vadd.f32 %v1559_v53, %v1042_v52 }
 0x12e   : > { %v1120_v55 = vpop.f32.mrf.mxu0 }
 0x12f   : > { %v1121_v56 = vadd.f32 %v1120_v55, %v1080_v54 }
 0x130   : > { %v1596_v58 = vpop.f32.mrf.mxu0 }
 0x131   : > { %v1143_v61 = vadd.f32 %v1451_v57, %v1121_v56 }
 0x132   : > { %v1123_v60 = vpop.f32.mrf.mxu0 }
 0x133   : > { %v1124_v62 = vadd.f32 %v1123_v60, %v1083_v59  ;;  %v1145_v1 = vmul.f32 %v1143_v61, %v1143_v61 }
 0x134   : > { %v1597_v63 = vpop.f32.mrf.mxu0 }
 0x135   : > { %v1144_v0 = vadd.f32 %v1451_v57, %v1124_v62 }
 0x137   : > { %v1146_v2 = vmul.f32 %v1144_v0, %v1144_v0 }
 0x139   : > { %v1147_v3 = vpack.c.bf16 %v1146_v2, %v1145_v1 }
 0x13b   : > { %1615 = vmatmul.mubr.bf16.vlgmr.msra.gmra.mxu1 %v1147_v3 }
 0x1fb   : > { %v1253_v5 = vpop.f32.mrf.mxu1 }
 0x1fc   : > { %v1254_v6 = vadd.f32 %v1452_v4, %v1253_v5 }
 0x1fd   : > { %v1616_v7 = vpop.f32.mrf.mxu1 }
 0x1fe   : > { %1738 = vrsqrt.f32 %v1254_v6 }
 0x1ff   : > { %v1256_v8 = vpop.f32.mrf.mxu1 }
 0x200   : > { %v1257_v9 = vadd.f32 %v1452_v4, %v1256_v8 }
 0x201   : > { %v1617_v10 = vpop.f32.mrf.mxu1 }
 0x202   : > { %1740 = vrsqrt.f32 %v1257_v9 }
 0x20b   : > { %v1739_v11 = vpop.eup %1738 }
 0x20c   : > { %v1262_v13 = vmul.f32 %v1739_v11, %v1143_v61 }
 0x20f   : > { %v1741_v12 = vpop.eup %1740 }
 0x210   : > { %v1263_v14 = vmul.f32 %v1741_v12, %v1144_v0 }
 0x212   : > { %v1470_v15 = vpack.c.bf16 %v1263_v14, %v1262_v13 }
 0x214   : > { %1471 = vst [vmem:[%s279_s29] sm:$0xff] %v1470_v15  }
 0x215 PF: > { %s15_s20 = sadd.s32 1, %s1764_s20   ;;  %s2101_s18 = smov %s1760_s19 }
 0x216   : > { %p12_p5 = scmp.ge.s32.totalorder %s15_s20, 4   ;;  %s2102_s19 = smov %s2104_s21 }
 0x218   :  { %14 = sbr.rel (!%p12_p5) target bundleno = 2 (0x2), region = 81 }

// kernel: _lambda_.8
= control target key start
LH: loop header
LB: loop body
LE: loop exit
PB: predicated region body
PF: predicated region fallthrough
CT: control target
= control target key end

     0   :  { %vm1186_vm0 = vmmov 0   ;;  %s1453_s0 = inlined_call_operand.vmem [shape: bf16[8,1152], index: 0, kind: input, shape index: {}]   ;;  %s1454_s1 = inlined_call_operand.vmem [shape: bf16[1152,128], index: 1, kind: input, shape index: {}]   ;;  %s1455_s2 = inlined_call_operand.vmem [shape: f32[1,128], index: 2, kind: input, shape index: {}]   ;;  %s1456_s3 = inlined_call_operand.hbm [shape: f32[8,128], index: 3, kind: output, shape index: {0}]   ;;  %s1457_s4 = inlined_call_operand.vmem [shape: f32[8,128], index: 4, kind: output, shape index: {1}]  }
   0x1   :  { %v1082_v0 = vld [vmem:[%s1454_s1 + $0x78] sm:$0xff]   ;;  %v1086_v4 = vld [vmem:[%s1454_s1 + $0x70] sm:$0xff]   ;;  %v1090_v8 = vld [vmem:[%s1454_s1 + $0x68] sm:$0xff]  }
   0x2   :  { %v1083_v1 = vld [vmem:[%s1454_s1 + $0xf8] sm:$0xff]   ;;  %954 = vmatprep.subr.bf16.mxu0 %v1082_v0  ;;  %v1087_v5 = vld [vmem:[%s1454_s1 + $0xf0] sm:$0xff]   ;;  %v1091_v9 = vld [vmem:[%s1454_s1 + $0xe8] sm:$0xff]  }
   0x3   :  { %v1084_v2 = vld [vmem:[%s1454_s1 + $0x38] sm:$0xff]   ;;  %976 = vmatprep.subr.bf16.mxu1 %v1083_v1  ;;  %v1088_v6 = vld [vmem:[%s1454_s1 + $0x30] sm:$0xff]   ;;  %v1092_v10 = vld [vmem:[%s1454_s1 + $0x28] sm:$0xff]  }
   0x4   :  { %v1085_v3 = vld [vmem:[%s1454_s1 + $0xb8] sm:$0xff]   ;;  %955 = vmatpush3.bf16.msra.mxu0 %v1084_v2  ;;  %v1089_v7 = vld [vmem:[%s1454_s1 + $0xb0] sm:$0xff]   ;;  %v1093_v11 = vld [vmem:[%s1454_s1 + $0xa8] sm:$0xff]  }
   0x5   :  { %977 = vmatpush3.bf16.msra.mxu1 %v1085_v3  ;;  %956 = vmatprep.subr.bf16.mxu0 %v1086_v4  ;;  %v1094_v12 = vld [vmem:[%s1454_s1 + $0x60] sm:$0xff]   ;;  %v1098_v16 = vld [vmem:[%s1454_s1 + $0x58] sm:$0xff]   ;;  %v1102_v20 = vld [vmem:[%s1454_s1 + $0x50] sm:$0xff]  }
   0x6   :  { %978 = vmatprep.subr.bf16.mxu1 %v1087_v5  ;;  %v1095_v13 = vld [vmem:[%s1454_s1 + $0xe0] sm:$0xff]   ;;  %v1099_v17 = vld [vmem:[%s1454_s1 + $0xd8] sm:$0xff]   ;;  %v1103_v21 = vld [vmem:[%s1454_s1 + $0xd0] sm:$0xff]  }
   0x7   :  { %v1096_v14 = vld [vmem:[%s1454_s1 + $0x20] sm:$0xff]   ;;  %v1100_v18 = vld [vmem:[%s1454_s1 + $0x18] sm:$0xff]   ;;  %v1104_v22 = vld [vmem:[%s1454_s1 + $0x10] sm:$0xff]  }
   0x8   :  { %957 = vmatpush3.bf16.msra.mxu0 %v1088_v6  ;;  %v1097_v15 = vld [vmem:[%s1454_s1 + $0xa0] sm:$0xff]   ;;  %v1101_v19 = vld [vmem:[%s1454_s1 + $0x98] sm:$0xff]   ;;  %v1105_v23 = vld [vmem:[%s1454_s1 + $0x90] sm:$0xff]  }
   0x9   :  { %979 = vmatpush3.bf16.msra.mxu1 %v1089_v7  ;;  %958 = vmatprep.subr.bf16.mxu0 %v1090_v8  ;;  %v1106_v24 = vld [vmem:[%s1454_s1 + $0x48] sm:$0xff]   ;;  %v1110_v28 = vld [vmem:[%s1454_s1 + $0x40] sm:$0xff]   ;;  %v1118_v38 = vld [vmem:[%s1454_s1 + $0x178] sm:$0xff]  }
   0xa   :  { %980 = vmatprep.subr.bf16.mxu1 %v1091_v9  ;;  %v1107_v25 = vld [vmem:[%s1454_s1 + $0xc8] sm:$0xff]   ;;  %v1111_v29 = vld [vmem:[%s1454_s1 + $0xc0] sm:$0xff]   ;;  %v1119_v39 = vld [vmem:[%s1454_s1 + $0x138] sm:$0xff]  }
   0xb   :  { %v1108_v26 = vld [vmem:[%s1454_s1 + $0x8] sm:$0xff]   ;;  %v1112_v30 = vld [vmem:[%s1454_s1] sm:$0xff]   ;;  %v1120_v40 = vld [vmem:[%s1454_s1 + $0x1f8] sm:$0xff]  }
   0xc   :  { %959 = vmatpush3.bf16.msra.mxu0 %v1092_v10  ;;  %v1109_v27 = vld [vmem:[%s1454_s1 + $0x88] sm:$0xff]   ;;  %v1113_v31 = vld [vmem:[%s1454_s1 + $0x80] sm:$0xff]   ;;  %v1121_v41 = vld [vmem:[%s1454_s1 + $0x1b8] sm:$0xff]  }
   0xd   :  { %981 = vmatpush3.bf16.msra.mxu1 %v1093_v11  ;;  %960 = vmatprep.subr.bf16.mxu0 %v1094_v12  ;;  %v24_v32 = vld [vmem:[%s1453_s0] sm:$0xff]  ;;  %v25_v33 = vld [vmem:[%s1453_s0 + $0x8] sm:$0xff]  ;;  %v1122_v42 = vld [vmem:[%s1454_s1 + $0x170] sm:$0xff]  }
   0xe   :  { %982 = vmatprep.subr.bf16.mxu1 %v1095_v13  ;;  %v872_v34 = vcombine.low %v24_v32, %v24_v32  ;;  %v873_v35 = vcombine.high %v24_v32, %v24_v32  ;;  %v874_v36 = vcombine.low %v25_v33, %v25_v33  ;;  %v875_v37 = vcombine.high %v25_v33, %v25_v33  ;;  %v1123_v43 = vld [vmem:[%s1454_s1 + $0x130] sm:$0xff]   ;;  %v1126_v46 = vld [vmem:[%s1454_s1 + $0x168] sm:$0xff]   ;;  %v1130_v50 = vld [vmem:[%s1454_s1 + $0x160] sm:$0xff]  }
   0xf   :  { %v1124_v44 = vld [vmem:[%s1454_s1 + $0x1f0] sm:$0xff]   ;;  %v1127_v47 = vld [vmem:[%s1454_s1 + $0x128] sm:$0xff]   ;;  %v1131_v51 = vld [vmem:[%s1454_s1 + $0x120] sm:$0xff]   ;;  %v1185_v13 = vmov 0.0  }
  0x10   :  { %961 = vmatpush3.bf16.msra.mxu0 %v1096_v14  ;;  %669 = vmatprep.mubr.bf16.mxu0 %v873_v35  ;;  %v1125_v45 = vld [vmem:[%s1454_s1 + $0x1b0] sm:$0xff]   ;;  %v1128_v48 = vld [vmem:[%s1454_s1 + $0x1e8] sm:$0xff]   ;;  %v1132_v52 = vld [vmem:[%s1454_s1 + $0x1e0] sm:$0xff]  }
  0x11   :  { %983 = vmatpush3.bf16.msra.mxu1 %v1097_v15  ;;  %962 = vmatprep.subr.bf16.mxu0 %v1098_v16  ;;  %v1129_v49 = vld [vmem:[%s1454_s1 + $0x1a8] sm:$0xff]   ;;  %v1133_v53 = vld [vmem:[%s1454_s1 + $0x1a0] sm:$0xff]   ;;  %v1134_v54 = vld [vmem:[%s1454_s1 + $0x158] sm:$0xff]  }
  0x12   :  { %984 = vmatprep.subr.bf16.mxu1 %v1099_v17  ;;  %709 = vmatprep.mubr.bf16.mxu1 %v875_v37  ;;  %v1135_v55 = vld [vmem:[%s1454_s1 + $0x118] sm:$0xff]   ;;  %v1138_v58 = vld [vmem:[%s1454_s1 + $0x150] sm:$0xff]   ;;  %v1142_v62 = vld [vmem:[%s1454_s1 + $0x148] sm:$0xff]  }
  0x13   :  { %v1136_v56 = vld [vmem:[%s1454_s1 + $0x1d8] sm:$0xff]   ;;  %v1139_v59 = vld [vmem:[%s1454_s1 + $0x110] sm:$0xff]   ;;  %v1143_v63 = vld [vmem:[%s1454_s1 + $0x108] sm:$0xff]  }
  0x14   :  { %963 = vmatpush3.bf16.msra.mxu0 %v1100_v18  ;;  %v1137_v57 = vld [vmem:[%s1454_s1 + $0x198] sm:$0xff]   ;;  %v1140_v60 = vld [vmem:[%s1454_s1 + $0x1d0] sm:$0xff]   ;;  %v1144_v0 = vld [vmem:[%s1454_s1 + $0x1c8] sm:$0xff]  }
  0x15   :  { %985 = vmatpush3.bf16.msra.mxu1 %v1101_v19  ;;  %964 = vmatprep.subr.bf16.mxu0 %v1102_v20  ;;  %v1141_v61 = vld [vmem:[%s1454_s1 + $0x190] sm:$0xff]   ;;  %v1145_v1 = vld [vmem:[%s1454_s1 + $0x188] sm:$0xff]   ;;  %v1146_v2 = vld [vmem:[%s1454_s1 + $0x140] sm:$0xff]  }
  0x16   :  { %986 = vmatprep.subr.bf16.mxu1 %v1103_v21  ;;  %v1147_v3 = vld [vmem:[%s1454_s1 + $0x100] sm:$0xff]   ;;  %v26_v5 = vld [vmem:[%s1453_s0 + $0x10] sm:$0xff]  ;;  %v27_v9 = vld [vmem:[%s1453_s0 + $0x18] sm:$0xff] }
  0x17   :  { %v1148_v4 = vld [vmem:[%s1454_s1 + $0x1c0] sm:$0xff]   ;;  %v877_v6 = vcombine.high %v26_v5, %v26_v5  ;;  %v876_v8 = vcombine.low %v26_v5, %v26_v5  ;;  %v878_v10 = vcombine.low %v27_v9, %v27_v9  ;;  %v879_v11 = vcombine.high %v27_v9, %v27_v9  ;;  %v1154_v12 = vld [vmem:[%s1454_s1 + $0x238] sm:$0xff]   ;;  %v1155_v14 = vld [vmem:[%s1454_s1 + $0x230] sm:$0xff]  }
  0x18   :  { %965 = vmatpush3.bf16.msra.mxu0 %v1104_v22  ;;  %v1151_v7 = vld [vmem:[%s1454_s1 + $0x180] sm:$0xff]   ;;  %v1156_v15 = vld [vmem:[%s1454_s1 + $0x228] sm:$0xff]  }
  0x19   :  { %987 = vmatpush3.bf16.msra.mxu1 %v1105_v23  ;;  %966 = vmatprep.subr.bf16.mxu0 %v1106_v24 }
  0x1a   :  { %988 = vmatprep.subr.bf16.mxu1 %v1107_v25 }
  0x1c   :  { %967 = vmatpush3.bf16.msra.mxu0 %v1108_v26 }
  0x1d   :  { %989 = vmatpush3.bf16.msra.mxu1 %v1109_v27  ;;  %968 = vmatprep.subr.bf16.mxu0 %v1110_v28 }
  0x1e   :  { %990 = vmatprep.subr.bf16.mxu1 %v1111_v29 }
  0x20   :  { %969 = vmatpush3.bf16.msra.mxu0 %v1112_v30 }
  0x21   :  { %991 = vmatpush3.bf16.msra.mxu1 %v1113_v31  ;;  %998 = vmatprep.subr.bf16.mxu0 %v1118_v38 }
  0x22   :  { %1020 = vmatprep.subr.bf16.mxu1 %v1120_v40 }
  0x23   :  { %670 = vmatmul.mubr.bf16.vlgmr.msra.gmra.mxu0 %v872_v34 }
  0x24   :  { %710 = vmatmul.mubr.bf16.vlgmr.msra.gmra.mxu1 %v874_v36  ;;  %999 = vmatpush3.bf16.msra.mxu0 %v1119_v39 }
  0x25   :  { %1021 = vmatpush3.bf16.msra.mxu1 %v1121_v41  ;;  %1000 = vmatprep.subr.bf16.mxu0 %v1122_v42 }
  0x26   :  { %1022 = vmatprep.subr.bf16.mxu1 %v1124_v44  ;;  %749 = vmatprep.mubr.bf16.mxu0 %v877_v6 }
  0x27   :  { %789 = vmatprep.mubr.bf16.mxu1 %v879_v11 }
  0x28   :  { %1001 = vmatpush3.bf16.msra.mxu0 %v1123_v43 }
  0x29   :  { %1023 = vmatpush3.bf16.msra.mxu1 %v1125_v45  ;;  %1002 = vmatprep.subr.bf16.mxu0 %v1126_v46 }
  0x2a   :  { %1024 = vmatprep.subr.bf16.mxu1 %v1128_v48 }
  0x2c   :  { %1003 = vmatpush3.bf16.msra.mxu0 %v1127_v47 }
  0x2d   :  { %1025 = vmatpush3.bf16.msra.mxu1 %v1129_v49  ;;  %1004 = vmatprep.subr.bf16.mxu0 %v1130_v50 }
  0x2e   :  { %1026 = vmatprep.subr.bf16.mxu1 %v1132_v52 }
  0x30   :  { %1005 = vmatpush3.bf16.msra.mxu0 %v1131_v51 }
  0x31   :  { %1027 = vmatpush3.bf16.msra.mxu1 %v1133_v53  ;;  %1006 = vmatprep.subr.bf16.mxu0 %v1134_v54 }
  0x32   :  { %1028 = vmatprep.subr.bf16.mxu1 %v1136_v56 }
  0x34   :  { %1007 = vmatpush3.bf16.msra.mxu0 %v1135_v55 }
  0x35   :  { %1029 = vmatpush3.bf16.msra.mxu1 %v1137_v57  ;;  %1008 = vmatprep.subr.bf16.mxu0 %v1138_v58 }
  0x36   :  { %1030 = vmatprep.subr.bf16.mxu1 %v1140_v60 }
  0x38   :  { %1009 = vmatpush3.bf16.msra.mxu0 %v1139_v59 }
  0x39   :  { %1031 = vmatpush3.bf16.msra.mxu1 %v1141_v61  ;;  %1010 = vmatprep.subr.bf16.mxu0 %v1142_v62 }
  0x3a   :  { %1032 = vmatprep.subr.bf16.mxu1 %v1144_v0 }
  0x3c   :  { %1011 = vmatpush3.bf16.msra.mxu0 %v1143_v63 }
  0x3d   :  { %1033 = vmatpush3.bf16.msra.mxu1 %v1145_v1  ;;  %1012 = vmatprep.subr.bf16.mxu0 %v1146_v2 }
  0x3e   :  { %1034 = vmatprep.subr.bf16.mxu1 %v1148_v4 }
  0x40   :  { %1013 = vmatpush3.bf16.msra.mxu0 %v1147_v3 }
  0x41   :  { %1035 = vmatpush3.bf16.msra.mxu1 %v1151_v7  ;;  %1051 = vmatprep.subr.bf16.mxu0 %v1185_v13 }
  0x43   :  { %750 = vmatmul.mubr.bf16.vlgmr.msra.gmra.mxu0 %v876_v8 }
  0x44   :  { %1052 = vmatpush3.bf16.msra.mxu0 %v1154_v12  ;;  %790 = vmatmul.mubr.bf16.vlgmr.msra.gmra.mxu1 %v878_v10 }
  0x45   :  { %1053 = vmatprep.subr.bf16.mxu0 %v1185_v13  ;;  %1067 = vmatprep.mubr.msk.bf16.mxu0 %vm1186_vm0, %v1185_v13 }
  0x48   :  { %1054 = vmatpush3.bf16.msra.mxu0 %v1155_v14 }
  0x49   :  { %10 = vsyncpa [#allocation4], 0  ;;  %1055 = vmatprep.subr.bf16.mxu0 %v1185_v13  ;;  %v1157_v16 = vld [vmem:[%s1454_s1 + $0x220] sm:$0xff]   ;;  %v1158_v17 = vld [vmem:[%s1454_s1 + $0x218] sm:$0xff]   ;;  %s1187_s13 = smov [#allocation3]  }
  0x4a   :  { %v1159_v18 = vld [vmem:[%s1454_s1 + $0x210] sm:$0xff]   ;;  %v1160_v19 = vld [vmem:[%s1454_s1 + $0x208] sm:$0xff]   ;;  %v1161_v20 = vld [vmem:[%s1454_s1 + $0x200] sm:$0xff]   ;;  %s860_s14 = sshll.u32 %s1187_s13, 4  ;;  %s861_s14 = int_to_ptr.vmem [resolvable:$true] %s860_s14 }
  0x4b   :  { %v1162_v21 = vld [vmem:[%s1453_s0 + $0x20] ss:$0 sps:$4 sm:$0xff]   ;;  %s1163_s15 = scalar_lea.vmem %s861_s14, 128  ;;  %p1168_p1 = scmp.lt.s32.totalorder %s861_s14, %s861_s14 }
  0x4c   :  { %1056 = vmatpush3.bf16.msra.mxu0 %v1156_v15  ;;  %v953_v46 = vld [vmem:[%s1455_s2] ss:$0 sm:$0xff]  ;;  %p1164_p0 = scmp.ne.s32.totalorder %s861_s14, %s1163_s15  ;;  %p1169_p2 = scmp.lt.s32.totalorder %s1163_s15, %s1163_s15 }
  0x4d   :  { %1057 = vmatprep.subr.bf16.mxu0 %v1185_v13 }
  0x4e   :  { %p1170_p3 = por %p1169_p2, %p1168_p1 }
  0x50   :  { %1058 = vmatpush3.bf16.msra.mxu0 %v1157_v16  ;;  %p1171_p4 = pnand %p1170_p3, %p1164_p0 }
  0x51   :  { %1059 = vmatprep.subr.bf16.mxu0 %v1185_v13 }
  0x54   :  { %1060 = vmatpush3.bf16.msra.mxu0 %v1158_v17 }
  0x55   :  { %1061 = vmatprep.subr.bf16.mxu0 %v1185_v13 }
  0x58   :  { %1062 = vmatpush3.bf16.msra.mxu0 %v1159_v18 }
  0x59   :  { %1063 = vmatprep.subr.bf16.mxu0 %v1185_v13 }
  0x5c   :  { %1064 = vmatpush3.bf16.msra.mxu0 %v1160_v19 }
  0x5d   :  { %1065 = vmatprep.subr.bf16.mxu0 %v1185_v13 }
  0x60   :  { %1066 = vmatpush3.bf16.msra.mxu0 %v1161_v20 }
  0x63   :  { %1068 = vmatmul.mubr.bf16.vlgmr.msra.gmra.mxu0 %v1162_v21 }
  0xe3   :  { %v970_v22 = vpop.f32.mrf.mxu0 }
  0xe4   :  { %v992_v23 = vpop.f32.mrf.mxu1 }
  0xe5   :  { %v971_v24 = vpop.f32.mrf.mxu0 }
  0xe6   :  { %v993_v25 = vpop.f32.mrf.mxu1  ;;  %v972_v38 = vadd.f32 %v971_v24, %v970_v22 }
  0xe7   :  { %v973_v26 = vpop.f32.mrf.mxu0  ;;  %v994_v39 = vadd.f32 %v993_v25, %v992_v23 }
  0xe8   :  { %v995_v27 = vpop.f32.mrf.mxu1 }
  0xe9   :  { %v974_v28 = vpop.f32.mrf.mxu0  ;;  %v712_v41 = vadd.f32 %v994_v39, %v972_v38 }
  0xea   :  { %v996_v29 = vpop.f32.mrf.mxu1 }
 0x103   :  { %v1014_v30 = vpop.f32.mrf.mxu0 }
 0x104   :  { %v1036_v31 = vpop.f32.mrf.mxu1 }
 0x105   :  { %v1015_v32 = vpop.f32.mrf.mxu0 }
 0x106   :  { %v1037_v33 = vpop.f32.mrf.mxu1  ;;  %v1016_v40 = vadd.f32 %v1015_v32, %v1014_v30 }
 0x107   :  { %v1017_v34 = vpop.f32.mrf.mxu0  ;;  %v1038_v43 = vadd.f32 %v1037_v33, %v1036_v31 }
 0x108   :  { %v1039_v35 = vpop.f32.mrf.mxu1  ;;  %v752_v42 = vadd.f32 %v1016_v40, %v712_v41 }
 0x109   :  { %v1018_v36 = vpop.f32.mrf.mxu0 }
 0x10a   :  { %v1040_v37 = vpop.f32.mrf.mxu1  ;;  %v792_v44 = vadd.f32 %v1038_v43, %v752_v42 }
 0x123   :  { %v831_v45 = vpop.f32.mrf.mxu0 }
 0x124   :  { %v832_v47 = vadd.f32 %v831_v45, %v792_v44 }
 0x125   :  { %v1069_v48 = vpop.f32.mrf.mxu0 }
 0x126   :  { %v850_v49 = vadd.f32 %v953_v46, %v832_v47 }
 0x127   :  { %v834_v50 = vpop.f32.mrf.mxu0 }
 0x128   :  { %v1073_v51 = vcvt.f32.s32 %v850_v49  ;;  %851 = vst [vmem:[#allocation3] sm:$0xff] %v850_v49 }
 0x129   :  { %v1070_v52 = vpop.f32.mrf.mxu0 }
 0x12a   :  { %1174 = shalt.err (!%p1171_p4)
}
 0x12b   :  { %863 = dma.vmem_to_hbm [thread:$0]  %s861_s14, 128, %s1456_s3, [#allocation4]   ;;  %v1074_v53 = vcvt.s32.f32 %v1073_v51  ;;  %v1071_v54 = vand.u32 2147483647, %v850_v49  ;;  %v1076_v56 = vand.u32 2147483648, %v850_v49 }
 0x12d   :  { %v1075_v55 = vand.u32 2147483647, %v1074_v53  ;;  %vm1072_vm1 = vcmp.lt.f32.partialorder %v1071_v54, 8388608.0 }
 0x12f   :  { %v1077_v57 = vor.u32 %v1076_v56, %v1075_v55 }
 0x131   :  { %v1078_v58 = vsel %vm1072_vm1, %v1077_v57, %v850_v49 }
 0x132   :  { %853 = vst [vmem:[%s1457_s4] sm:$0xff] %v1078_v58 }
 0x133   :  { %1183 = dma.done.wait [#allocation4], 128  }
 0x134   :  { %1184 = vsyncadd [#allocation4], 4294967168 }
 0x135   :  { %871 = vsyncpa [#allocation4], 1 }

// kernel: tile.18
= control target key start
LH: loop header
LB: loop body
LE: loop exit
PB: predicated region body
PF: predicated region fallthrough
CT: control target
= control target key end

     0   :  { %s22_s0 = inlined_call_operand.vmem [shape: f32[32], index: 0, kind: input, shape index: {}]   ;;  %s23_s1 = inlined_call_operand.vmem [shape: f32[4,32], index: 1, kind: output, shape index: {}]  }
   0x1   :  { %v4_v0 = vld [vmem:[%s22_s0] ss:$0 sm:$0xff] }
   0x2   :  { %5 = vst [vmem:[%s23_s1] sm:$0xf] %v4_v0 }

// kernel: tile.19
= control target key start
LH: loop header
LB: loop body
LE: loop exit
PB: predicated region body
PF: predicated region fallthrough
CT: control target
= control target key end

     0   :  { %vm8_vm0 = vcmask 261120   ;;  %s40_s8 = smov 32   ;;  %s41_s9 = smov 64   ;;  %vm14_vm1 = vcmask 1048320   ;;  %vm20_vm2 = vcmask 785920   ;;  %vm26_vm3 = vcmask 523520   ;;  %s58_s0 = inlined_call_operand.vmem [shape: f32[4,32], index: 0, kind: input, shape index: {}]   ;;  %s59_s1 = inlined_call_operand.vmem [shape: f32[1,128], index: 1, kind: output, shape index: {}]  }
   0x1   :  { %v5_v0 = vld [vmem:[%s58_s0] sm:$0xf]  ;;  %s39_s0 = smov 96  }
   0x2   :  { %6 = vst [vmem:[#allocation1] sm:$0xf] %v5_v0 }
   0x9   :  { %v11_v1 = vld [vmem:[#allocation1 + $0x3] sm:$0x1]   ;;  %v23_v2 = vld [vmem:[#allocation1 + $0x1] sm:$0x1]   ;;  %v7_v3 = vld [vmem:[#allocation1] sm:$0x1]  }
   0xa   :  { %12 = vrot.lane.b32.xlu0 %v11_v1, %s39_s0  ;;  %24 = vrot.lane.b32.xlu1 %v23_v2, %s40_s8  ;;  %v17_v4 = vld [vmem:[#allocation1 + $0x2] sm:$0x1]   ;;  %9 = vst.msk [vmem:[#allocation0] sm:$0x1] %vm8_vm0, %v7_v3  }
   0xe   :  { %18 = vrot.lane.b32.xlu0 %v17_v4, %s41_s9 }
  0x7c   :  { %v13_v5 = vpop.permute.xlu0 %12   ;;  %v25_v6 = vpop.permute.xlu1 %24  }
  0x7d   :  { %15 = vst.msk [vmem:[#allocation0] sm:$0x1] %vm14_vm1, %v13_v5  }
  0x80   :  { %v19_v7 = vpop.permute.xlu0 %18  }
  0x81   :  { %21 = vst.msk [vmem:[#allocation0] sm:$0x1] %vm20_vm2, %v19_v7  }
  0x82   :  { %27 = vst.msk [vmem:[#allocation0] sm:$0x1] %vm26_vm3, %v25_v6  }
  0x89   :  { %v32_v8 = vld [vmem:[#allocation0] sm:$0x1] }
  0x8a   :  { %35 = vst [vmem:[%s59_s1] sm:$0x1] %v32_v8 }

// kernel: _lambda_.9
= control target key start
LH: loop header
LB: loop body
LE: loop exit
PB: predicated region body
PF: predicated region fallthrough
CT: control target
= control target key end

     0   :  { %v772_v1 = vmov 0.0   ;;  %vm773_vm0 = vmmov 0   ;;  %vm183_vm1 = vcmask 261120   ;;  %s774_s18 = smov 32   ;;  %s775_s19 = smov 96   ;;  %vm358_vm4 = vcmask 257024   ;;  %s948_s1 = inlined_call_operand.vmem [shape: bf16[288,128], index: 1, kind: input, shape index: {}]   ;;  %s949_s0 = inlined_call_operand.vmem [shape: bf16[8,288], index: 0, kind: input, shape index: {}]   ;;  %s950_s3 = inlined_call_operand.vmem [shape: bf16[32,32], index: 3, kind: input, shape index: {}]   ;;  %s951_s2 = inlined_call_operand.vmem [shape: f32[1,128], index: 2, kind: input, shape index: {}]   ;;  %s952_s4 = inlined_call_operand.vmem [shape: f32[1,32], index: 4, kind: input, shape index: {}]   ;;  %s953_s5 = inlined_call_operand.vmem [shape: bf16[8,128], index: 5, kind: output, shape index: {}]  }
   0x1   :  { %v735_v0 = vld [vmem:[%s948_s1 + $0x78] sm:$0xff]   ;;  %690 = vmatprep.subr.bf16.mxu1 %v772_v1  ;;  %694 = vmatprep.mubr.msk.bf16.mxu1 %vm773_vm0, %v772_v1  ;;  %v737_v3 = vld [vmem:[%s948_s1 + $0x70] sm:$0xff]   ;;  %v739_v5 = vld [vmem:[%s948_s1 + $0x68] sm:$0xff]   ;;  %s776_s21 = smov 64   ;;  %vm442_vm11 = vcmask 519424   ;;  %vm525_vm12 = vcmask 781824  }
   0x2   :  { %v736_v2 = vld [vmem:[%s948_s1 + $0x38] sm:$0xff]   ;;  %653 = vmatprep.subr.bf16.mxu0 %v735_v0  ;;  %v738_v4 = vld [vmem:[%s948_s1 + $0x30] sm:$0xff]   ;;  %v740_v6 = vld [vmem:[%s948_s1 + $0x28] sm:$0xff]   ;;  %vm608_vm13 = vcmask 1044224  }
   0x3   :  { %654 = vmatpush3.bf16.msra.mxu0 %v736_v2  ;;  %v741_v7 = vld [vmem:[%s948_s1 + $0x60] sm:$0xff]   ;;  %v743_v9 = vld [vmem:[%s948_s1 + $0x58] sm:$0xff]   ;;  %v747_v10 = vld [vmem:[%s948_s1 + $0x88] sm:$0xff]  }
   0x4   :  { %655 = vmatprep.subr.bf16.mxu0 %v737_v3  ;;  %v742_v8 = vld [vmem:[%s948_s1 + $0x20] sm:$0xff]   ;;  %v744_v11 = vld [vmem:[%s948_s1 + $0x18] sm:$0xff]   ;;  %691 = vmatpush3.bf16.msra.mxu1 %v747_v10  ;;  %v745_v13 = vld [vmem:[%s948_s1 + $0x50] sm:$0xff]  }
   0x5   :  { %692 = vmatprep.subr.bf16.mxu1 %v772_v1  ;;  %v750_v12 = vld [vmem:[%s948_s1 + $0x80] sm:$0xff]   ;;  %v753_v14 = vld [vmem:[%s949_s0 + $0x8] ss:$0 sps:$4 sm:$0xff]   ;;  %v746_v16 = vld [vmem:[%s948_s1 + $0x10] sm:$0xff]  }
   0x6   :  { %v27_v15 = vld [vmem:[%s949_s0] sm:$0xff]  ;;  %v748_v18 = vld [vmem:[%s948_s1 + $0x48] sm:$0xff]  }
   0x7   :  { %656 = vmatpush3.bf16.msra.mxu0 %v738_v4  ;;  %v615_v17 = vcombine.high %v27_v15, %v27_v15  ;;  %v749_v19 = vld [vmem:[%s948_s1 + $0x8] sm:$0xff]   ;;  %v751_v20 = vld [vmem:[%s948_s1 + $0x40] sm:$0xff]   ;;  %v614_v22 = vcombine.low %v27_v15, %v27_v15 }
   0x8   :  { %657 = vmatprep.subr.bf16.mxu0 %v739_v5  ;;  %693 = vmatpush3.bf16.msra.mxu1 %v750_v12  ;;  %v752_v21 = vld [vmem:[%s948_s1] sm:$0xff]   ;;  %v756_v23 = vld [vmem:[%s950_s3 + $0x8] sm:$0xff]  }
   0x9   :  { %698 = vmatprep.subr.bf16.mxu1 %v772_v1  ;;  %219 = vmatprep.mubr.bf16.mxu0 %v615_v17  ;;  %v757_v24 = vld [vmem:[%s950_s3] sm:$0xff]   ;;  %v759_v25 = vld [vmem:[%s950_s3 + $0x8] sm:$0xff]  }
   0xa   :  { %v761_v26 = vld [vmem:[%s950_s3] sm:$0xff]   ;;  %v758_v41 = vld [vmem:[%s950_s3 + $0x8] sm:$0xff]  }
   0xb   :  { %658 = vmatpush3.bf16.msra.mxu0 %v740_v6  ;;  %695 = vmatmul.mubr.msk.bf16.vlgmr.msra.gmra.mxu1 %vm183_vm1, %v753_v14  ;;  %v636_v34 = vld [vmem:[%s951_s2] ss:$0 sm:$0xff]  ;;  %v762_v43 = vld [vmem:[%s950_s3 + $0x8] sm:$0xff]  }
   0xc   :  { %659 = vmatprep.subr.bf16.mxu0 %v741_v7  ;;  %702 = vmatprep.mubr.msk.bf16.mxu1 %vm773_vm0, %v772_v1  ;;  %v760_v42 = vld [vmem:[%s950_s3] sm:$0xff]  }
   0xd   :  { %699 = vmatpush3.bf16.msra.mxu1 %v756_v23  ;;  %v763_v46 = vld [vmem:[%s950_s3] sm:$0xff]  }
   0xe   :  { %700 = vmatprep.subr.bf16.mxu1 %v772_v1  ;;  %v637_v48 = vld [vmem:[%s952_s4] ss:$0 sm:$0xff] }
   0xf   :  { %660 = vmatpush3.bf16.msra.mxu0 %v742_v8 }
  0x10   :  { %661 = vmatprep.subr.bf16.mxu0 %v743_v9 }
  0x11   :  { %701 = vmatpush3.bf16.msra.mxu1 %v757_v24 }
  0x12   :  { %706 = vmatprep.subr.bf16.mxu1 %v772_v1 }
  0x13   :  { %662 = vmatpush3.bf16.msra.mxu0 %v744_v11 }
  0x14   :  { %663 = vmatprep.subr.bf16.mxu0 %v745_v13 }
  0x17   :  { %664 = vmatpush3.bf16.msra.mxu0 %v746_v16 }
  0x18   :  { %665 = vmatprep.subr.bf16.mxu0 %v748_v18 }
  0x1b   :  { %666 = vmatpush3.bf16.msra.mxu0 %v749_v19 }
  0x1c   :  { %667 = vmatprep.subr.bf16.mxu0 %v751_v20 }
  0x1f   :  { %668 = vmatpush3.bf16.msra.mxu0 %v752_v21 }
  0x20   :  { %722 = vmatprep.subr.bf16.mxu0 %v772_v1 }
  0x22   :  { %220 = vmatmul.mubr.bf16.vlgmr.msra.gmra.mxu0 %v614_v22 }
  0x23   :  { %726 = vmatprep.mubr.msk.bf16.mxu0 %vm773_vm0, %v772_v1  ;;  %723 = vmatpush3.bf16.msra.mxu0 %v759_v25 }
  0x24   :  { %724 = vmatprep.subr.bf16.mxu0 %v772_v1 }
  0x27   :  { %725 = vmatpush3.bf16.msra.mxu0 %v761_v26 }
  0xcb   :  { %v261_v27 = vpop.f32.mrf.mxu1 }
  0xcd   :  { %v696_v28 = vpop.f32.mrf.mxu1 }
  0xcf   :  { %v264_v29 = vpop.f32.mrf.mxu1 }
  0xd1   :  { %v697_v30 = vpop.f32.mrf.mxu1 }
  0xe2   :  { %v669_v31 = vpop.f32.mrf.mxu0 }
  0xe4   :  { %v670_v32 = vpop.f32.mrf.mxu0 }
  0xe5   :  { %v671_v33 = vadd.f32 %v670_v32, %v669_v31 }
  0xe6   :  { %v672_v35 = vpop.f32.mrf.mxu0 }
  0xe7   :  { %v262_v36 = vadd.f32 %v671_v33, %v261_v27 }
  0xe8   :  { %v673_v37 = vpop.f32.mrf.mxu0 }
  0xe9   :  { %v896_v38 = vadd.f32 %v636_v34, %v262_v36 }
  0xeb   :  { %v281_v39 = vmul.f32 %v896_v38, %v896_v38 }
  0xed   :  { %v282_v40 = vpack.c.bf16 %v281_v39, %v281_v39 }
  0xef   :  { %538 = vrot.lane.b32.xlu1 %v282_v40, %s774_s18  ;;  %372 = vrot.lane.b32.xlu0 %v282_v40, %s775_s19 }
  0xf0   :  { %703 = vmatmul.mubr.msk.bf16.vlgmr.msra.gmra.mxu1 %vm183_vm1, %v282_v40 }
  0xf1   :  { %707 = vmatpush3.bf16.msra.mxu1 %v758_v41  ;;  %710 = vmatprep.mubr.msk.bf16.mxu1 %vm773_vm0, %v772_v1 }
  0xf2   :  { %708 = vmatprep.subr.bf16.mxu1 %v772_v1 }
  0xf3   :  { %455 = vrot.lane.b32.xlu0 %v282_v40, %s776_s21 }
  0xf5   :  { %709 = vmatpush3.bf16.msra.mxu1 %v760_v42 }
  0xf6   :  { %714 = vmatprep.subr.bf16.mxu1 %v772_v1 }
 0x161   :  { %v539_v44 = vpop.permute.xlu1 %538  ;;  %v373_v45 = vpop.permute.xlu0 %372 }
 0x162   :  { %711 = vmatmul.mubr.msk.bf16.vlgmr.msra.gmra.mxu1 %vm183_vm1, %v373_v45  ;;  %727 = vmatmul.mubr.msk.bf16.vlgmr.msra.gmra.mxu0 %vm183_vm1, %v539_v44 }
 0x163   :  { %715 = vmatpush3.bf16.msra.mxu1 %v762_v43  ;;  %718 = vmatprep.mubr.msk.bf16.mxu1 %vm773_vm0, %v772_v1 }
 0x164   :  { %716 = vmatprep.subr.bf16.mxu1 %v772_v1 }
 0x165   :  { %v456_v47 = vpop.permute.xlu0 %455 }
 0x167   :  { %717 = vmatpush3.bf16.msra.mxu1 %v763_v46 }
 0x16a   :  { %719 = vmatmul.mubr.msk.bf16.vlgmr.msra.gmra.mxu1 %vm183_vm1, %v456_v47 }
 0x1b0   :  { %v343_v49 = vpop.f32.mrf.mxu1 }
 0x1b1   :  { %v344_v50 = vadd.f32 %v637_v48, %v343_v49 }
 0x1b2   :  { %v704_v51 = vpop.f32.mrf.mxu1 }
 0x1b3   :  { %764 = vrsqrt.f32 %v344_v50  ;;  %vm351_vm2 = vcmp.eq.f32.partialorder %v344_v50, inf  ;;  %v354_v56 = vand.u32 2147483648, %v344_v50  ;;  %vm353_vm3 = vcmp.eq.f32.partialorder %v344_v50, 0.0 }
 0x1b4   :  { %v346_v52 = vpop.f32.mrf.mxu1 }
 0x1b6   :  { %v705_v53 = vpop.f32.mrf.mxu1 }
 0x1c0   :  { %v765_v54 = vpop.eup %764 }
 0x1c1   :  { %v350_v55 = vmul.f32 %v765_v54, %v344_v50 }
 0x1c3   :  { %v352_v57 = vsel %vm351_vm2, %v344_v50, %v350_v55 }
 0x1c4   :  { %v355_v58 = vsel %vm353_vm3, %v354_v56, %v352_v57 }
 0x1c5   :  { %v356_v59 = vmul.f32 %v355_v58, %v896_v38 }
 0x1c7   :  { %v357_v60 = vpack.c.bf16 %v356_v59, %v356_v59 }
 0x1c9   :  { %359 = vst.msk [vmem:[%s953_s5] sm:$0xf] %vm358_vm4, %v357_v60 }
 0x222   :  { %v423_v61 = vpop.f32.mrf.mxu1  ;;  %v589_v62 = vpop.f32.mrf.mxu0 }
 0x223   :  { %v424_v63 = vadd.f32 %v637_v48, %v423_v61  ;;  %v590_v0 = vadd.f32 %v637_v48, %v589_v62 }
 0x224   :  { %v712_v1 = vpop.f32.mrf.mxu1  ;;  %v728_v2 = vpop.f32.mrf.mxu0 }
 0x225   :  { %766 = vrsqrt.f32 %v424_v63  ;;  %vm431_vm5 = vcmp.eq.f32.partialorder %v424_v63, inf  ;;  %v434_v15 = vand.u32 2147483648, %v424_v63  ;;  %vm433_vm6 = vcmp.eq.f32.partialorder %v424_v63, 0.0 }
 0x226   :  { %768 = vrsqrt.f32 %v590_v0  ;;  %v426_v3 = vpop.f32.mrf.mxu1  ;;  %v592_v4 = vpop.f32.mrf.mxu0  ;;  %vm597_vm7 = vcmp.eq.f32.partialorder %v590_v0, inf  ;;  %v600_v20 = vand.u32 2147483648, %v590_v0  ;;  %vm599_vm8 = vcmp.eq.f32.partialorder %v590_v0, 0.0 }
 0x228   :  { %v713_v5 = vpop.f32.mrf.mxu1  ;;  %v729_v6 = vpop.f32.mrf.mxu0 }
 0x22a   :  { %v506_v7 = vpop.f32.mrf.mxu1 }
 0x22b   :  { %v507_v8 = vadd.f32 %v637_v48, %v506_v7 }
 0x22c   :  { %v720_v9 = vpop.f32.mrf.mxu1 }
 0x22d   :  { %770 = vrsqrt.f32 %v507_v8  ;;  %vm514_vm9 = vcmp.eq.f32.partialorder %v507_v8, inf  ;;  %v517_v24 = vand.u32 2147483648, %v507_v8  ;;  %vm516_vm10 = vcmp.eq.f32.partialorder %v507_v8, 0.0 }
 0x22e   :  { %v509_v10 = vpop.f32.mrf.mxu1 }
 0x230   :  { %v721_v11 = vpop.f32.mrf.mxu1 }
 0x232   :  { %v767_v12 = vpop.eup %766 }
 0x233   :  { %v769_v13 = vpop.eup %768  ;;  %v430_v14 = vmul.f32 %v767_v12, %v424_v63 }
 0x234   :  { %v596_v16 = vmul.f32 %v769_v13, %v590_v0 }
 0x235   :  { %v432_v17 = vsel %vm431_vm5, %v424_v63, %v430_v14 }
 0x236   :  { %v435_v18 = vsel %vm433_vm6, %v434_v15, %v432_v17  ;;  %v598_v19 = vsel %vm597_vm7, %v590_v0, %v596_v16 }
 0x237   :  { %437 = vrot.lane.b32.xlu1 %v435_v18, %s774_s18  ;;  %v601_v22 = vsel %vm599_vm8, %v600_v20, %v598_v19 }
 0x23a   :  { %v771_v21 = vpop.eup %770 }
 0x23b   :  { %603 = vrot.lane.b32.xlu1 %v601_v22, %s775_s19  ;;  %v513_v23 = vmul.f32 %v771_v21, %v507_v8 }
 0x23d   :  { %v515_v25 = vsel %vm514_vm9, %v507_v8, %v513_v23 }
 0x23e   :  { %v518_v26 = vsel %vm516_vm10, %v517_v24, %v515_v25 }
 0x23f   :  { %520 = vrot.lane.b32.xlu0 %v518_v26, %s776_s21 }
 0x2a9   :  { %v438_v27 = vpop.permute.xlu1 %437 }
 0x2aa   :  { %v440_v28 = vmul.f32 %v438_v27, %v896_v38 }
 0x2ac   :  { %v441_v29 = vpack.c.bf16 %v440_v28, %v440_v28 }
 0x2ad   :  { %v604_v30 = vpop.permute.xlu1 %603 }
 0x2ae   :  { %443 = vst.msk [vmem:[%s953_s5] sm:$0xf] %vm442_vm11, %v441_v29  ;;  %v606_v31 = vmul.f32 %v604_v30, %v896_v38 }
 0x2b0   :  { %v607_v35 = vpack.c.bf16 %v606_v31, %v606_v31 }
 0x2b1   :  { %v521_v32 = vpop.permute.xlu0 %520 }
 0x2b2   :  { %v523_v33 = vmul.f32 %v521_v32, %v896_v38 }
 0x2b4   :  { %v524_v34 = vpack.c.bf16 %v523_v33, %v523_v33 }
 0x2b6   :  { %526 = vst.msk [vmem:[%s953_s5] sm:$0xf] %vm525_vm12, %v524_v34 }
 0x2b7   :  { %609 = vst.msk [vmem:[%s953_s5] sm:$0xf] %vm608_vm13, %v607_v35 }

// kernel: _lambda_.10
= control target key start
LH: loop header
LB: loop body
LE: loop exit
PB: predicated region body
PF: predicated region fallthrough
CT: control target
= control target key end

     0   :  { %s1332_s18 = smov 0   ;;  %s1334_s19 = smov 0   ;;  %s1513_s0 = inlined_call_operand.vmem [shape: bf16[32,288], index: 0, kind: input, shape index: {}]   ;;  %s1514_s1 = inlined_call_operand.vmem [shape: bf16[288,128], index: 1, kind: input, shape index: {}]   ;;  %s1515_s2 = inlined_call_operand.vmem [shape: f32[1,128], index: 2, kind: input, shape index: {}]   ;;  %s1516_s3 = inlined_call_operand.vmem [shape: bf16[32,32], index: 3, kind: input, shape index: {}]   ;;  %s1517_s4 = inlined_call_operand.vmem [shape: f32[1,32], index: 4, kind: input, shape index: {}]   ;;  %s1518_s5 = inlined_call_operand.vmem [shape: bf16[32,128], index: 5, kind: output, shape index: {}]  }
   0x1   :  { %s1336_s20 = smov 0  }
   0x2 LB: > { %s27_s21 = sadd.s32 1, %s1291_s19  ;;  %p1058_p0 = scmp.ge.s32.totalorder %s1295_s20, 1  ;;  %s1295_s20 = sphi %s1336_s20, %s15_s20   ;;  %s1291_s19 = sphi %s1334_s19, %s1520_s19   ;;  %s1287_s18 = sphi %s1332_s18, %s1519_s18  }
   0x3   : > { %p29_p1 = scmp.ge.s32.totalorder %s27_s21, 2  ;;  %p219_p2 = scmp.lt.s32.totalorder %s1295_s20, 3 }
   0x5   : > { %s1522_s21 = smov (%p29_p1, %s27_s21), 0  ;;  %p220_p3 = pnand %p1058_p0, %p219_p2 }
   0x6   : > { %s1059_s28 = sshll.u32 (!%p220_p3), %s1287_s18, 1  ;;  %s1299_s8 = smov (!%p220_p3), 32  }
   0x7   : > { %223 = sbr.rel (%p220_p3) target bundleno = 718 (0x2ce), region = 40  ;;  %p259_p4 = scmp.lt.s32.totalorder (!%p220_p3), %s1059_s28, 3 }
   0x8   : > { %s1300_s9 = smov (!%p220_p3), 96   ;;  %s1301_s12 = smov (!%p220_p3), 64  }
   0xc   : > { %v1227_v0 = vld [vmem:[%s1514_s1 + $0x78] sm:$0xff]   ;;  %v1297_v2 = vmov 0.0   ;;  %v1229_v3 = vld [vmem:[%s1514_s1 + $0x70] sm:$0xff]   ;;  %vm1298_vm0 = vmmov 0   ;;  %v1231_v5 = vld [vmem:[%s1514_s1 + $0x68] sm:$0xff]   ;;  %s1524_s28 = smov (!%p259_p4, %s1059_s28), 3 }
   0xd   : > { %v1228_v1 = vld [vmem:[%s1514_s1 + $0x38] sm:$0xff]   ;;  %1157 = vmatprep.subr.bf16.mxu1 %v1297_v2  ;;  %1120 = vmatprep.subr.bf16.mxu0 %v1227_v0  ;;  %v1230_v4 = vld [vmem:[%s1514_s1 + $0x30] sm:$0xff]   ;;  %v1232_v6 = vld [vmem:[%s1514_s1 + $0x28] sm:$0xff]   ;;  %s1197_s16 = smul.u32 12, %s1524_s28  ;;  %vm453_vm1 = vcmask 261120   ;;  %s1062_s22 = sshll.u32 %s1524_s28, 2 }
   0xe   : > { %1161 = vmatprep.mubr.msk.bf16.mxu1 %vm1298_vm0, %v1297_v2  ;;  %1121 = vmatpush3.bf16.msra.mxu0 %v1228_v1  ;;  %v1233_v7 = vld [vmem:[%s1514_s1 + $0x60] sm:$0xff]   ;;  %v1235_v9 = vld [vmem:[%s1514_s1 + $0x58] sm:$0xff]   ;;  %v1239_v10 = vld [vmem:[%s1514_s1 + $0x88] sm:$0xff]   ;;  %s1481_s25 = scalar_lea.vmem %s1518_s5, %s1062_s22  ;;  %vm651_vm5 = vcmask 257024  }
   0xf   : > { %1122 = vmatprep.subr.bf16.mxu0 %v1229_v3  ;;  %v1234_v8 = vld [vmem:[%s1514_s1 + $0x20] sm:$0xff]   ;;  %v1236_v11 = vld [vmem:[%s1514_s1 + $0x18] sm:$0xff]   ;;  %1158 = vmatpush3.bf16.msra.mxu1 %v1239_v10  ;;  %s266_s29 = scalar_lea.vmem %s1513_s0, %s1197_s16  ;;  %v1237_v13 = vld [vmem:[%s1514_s1 + $0x50] sm:$0xff]  }
  0x10   : > { %1159 = vmatprep.subr.bf16.mxu1 %v1297_v2  ;;  %v1242_v12 = vld [vmem:[%s1514_s1 + $0x80] sm:$0xff]   ;;  %v1238_v14 = vld [vmem:[%s1514_s1 + $0x10] sm:$0xff]   ;;  %v1240_v16 = vld [vmem:[%s1514_s1 + $0x48] sm:$0xff]  }
  0x11   : > { %v1245_v15 = vld [vmem:[%s266_s29 + $0x8] ss:$12 sps:$4 sm:$0xff]   ;;  %v1248_v17 = vld [vmem:[%s266_s29 + $0x4] ss:$12 sps:$4 sm:$0xff]   ;;  %v1246_v21 = vld [vmem:[%s266_s29] ss:$12 sps:$4 sm:$0xff]  }
  0x12   : > { %1123 = vmatpush3.bf16.msra.mxu0 %v1230_v4  ;;  %v1241_v18 = vld [vmem:[%s1514_s1 + $0x8] sm:$0xff]   ;;  %v1243_v19 = vld [vmem:[%s1514_s1 + $0x40] sm:$0xff]   ;;  %489 = vmatprep.mubr.bf16.mxu0 %v1248_v17 }
  0x13   : > { %1124 = vmatprep.subr.bf16.mxu0 %v1231_v5  ;;  %1160 = vmatpush3.bf16.msra.mxu1 %v1242_v12  ;;  %v1244_v20 = vld [vmem:[%s1514_s1] sm:$0xff]   ;;  %v1249_v22 = vld [vmem:[%s1516_s3 + $0x8] sm:$0xff]  }
  0x14   : > { %1165 = vmatprep.subr.bf16.mxu1 %v1297_v2  ;;  %v1250_v23 = vld [vmem:[%s1516_s3] sm:$0xff]   ;;  %v1252_v24 = vld [vmem:[%s1516_s3 + $0x8] sm:$0xff]  }
  0x15   : > { %v1254_v25 = vld [vmem:[%s1516_s3] sm:$0xff]   ;;  %v1251_v44 = vld [vmem:[%s1516_s3 + $0x8] sm:$0xff]  }
  0x16   : > { %1125 = vmatpush3.bf16.msra.mxu0 %v1232_v6  ;;  %1162 = vmatmul.mubr.msk.bf16.vlgmr.msra.gmra.mxu1 %vm453_vm1, %v1245_v15  ;;  %v1085_v35 = vld [vmem:[%s1515_s2] ss:$0 sm:$0xff]  ;;  %v1255_v46 = vld [vmem:[%s1516_s3 + $0x8] sm:$0xff]  }
  0x17   : > { %1126 = vmatprep.subr.bf16.mxu0 %v1233_v7  ;;  %1169 = vmatprep.mubr.msk.bf16.mxu1 %vm1298_vm0, %v1297_v2  ;;  %v1253_v45 = vld [vmem:[%s1516_s3] sm:$0xff]  }
  0x18   : > { %1166 = vmatpush3.bf16.msra.mxu1 %v1249_v22  ;;  %v1256_v49 = vld [vmem:[%s1516_s3] sm:$0xff]  }
  0x19   : > { %1167 = vmatprep.subr.bf16.mxu1 %v1297_v2  ;;  %v1086_v51 = vld [vmem:[%s1517_s4] ss:$0 sm:$0xff] }
  0x1a   : > { %1127 = vmatpush3.bf16.msra.mxu0 %v1234_v8 }
  0x1b   : > { %1128 = vmatprep.subr.bf16.mxu0 %v1235_v9 }
  0x1c   : > { %1168 = vmatpush3.bf16.msra.mxu1 %v1250_v23 }
  0x1d   : > { %1173 = vmatprep.subr.bf16.mxu1 %v1297_v2 }
  0x1e   : > { %1129 = vmatpush3.bf16.msra.mxu0 %v1236_v11 }
  0x1f   : > { %1130 = vmatprep.subr.bf16.mxu0 %v1237_v13 }
  0x22   : > { %1131 = vmatpush3.bf16.msra.mxu0 %v1238_v14 }
  0x23   : > { %1132 = vmatprep.subr.bf16.mxu0 %v1240_v16 }
  0x26   : > { %1133 = vmatpush3.bf16.msra.mxu0 %v1241_v18 }
  0x27   : > { %1134 = vmatprep.subr.bf16.mxu0 %v1243_v19 }
  0x2a   : > { %1135 = vmatpush3.bf16.msra.mxu0 %v1244_v20 }
  0x2b   : > { %1189 = vmatprep.subr.bf16.mxu0 %v1297_v2 }
  0x2d   : > { %490 = vmatmul.mubr.bf16.vlgmr.msra.gmra.mxu0 %v1246_v21 }
  0x2e   : > { %1193 = vmatprep.mubr.msk.bf16.mxu0 %vm1298_vm0, %v1297_v2  ;;  %1190 = vmatpush3.bf16.msra.mxu0 %v1252_v24 }
  0x2f   : > { %1191 = vmatprep.subr.bf16.mxu0 %v1297_v2 }
  0x32   : > { %1192 = vmatpush3.bf16.msra.mxu0 %v1254_v25 }
  0xd6   : > { %v532_v26 = vpop.f32.mrf.mxu1 }
  0xd8   : > { %v1163_v27 = vpop.f32.mrf.mxu1 }
  0xda   : > { %v535_v28 = vpop.f32.mrf.mxu1 }
  0xdc   : > { %v1164_v29 = vpop.f32.mrf.mxu1 }
  0xed   : > { %v1136_v30 = vpop.f32.mrf.mxu0 }
  0xef   : > { %v1137_v31 = vpop.f32.mrf.mxu0 }
  0xf0   : > { %v1138_v32 = vadd.f32 %v1137_v31, %v1136_v30 }
  0xf1   : > { %v1139_v33 = vpop.f32.mrf.mxu0 }
  0xf2   : > { %v533_v34 = vadd.f32 %v1138_v32, %v532_v26 }
  0xf3   : > { %v1140_v36 = vpop.f32.mrf.mxu0 }
  0xf4   : > { %v1141_v37 = vadd.f32 %v1140_v36, %v1139_v33  ;;  %v1439_v38 = vadd.f32 %v1085_v35, %v533_v34 }
  0xf6   : > { %v536_v39 = vadd.f32 %v1141_v37, %v535_v28  ;;  %v557_v41 = vmul.f32 %v1439_v38, %v1439_v38 }
  0xf8   : > { %v1441_v40 = vadd.f32 %v1085_v35, %v536_v39 }
  0xfa   : > { %v558_v42 = vmul.f32 %v1441_v40, %v1441_v40 }
  0xfc   : > { %v559_v43 = vpack.c.bf16 %v558_v42, %v557_v41 }
  0xfe   : > { %874 = vrot.lane.b32.xlu1 %v559_v43, %s1299_s8  ;;  %666 = vrot.lane.b32.xlu0 %v559_v43, %s1300_s9 }
  0xff   : > { %1170 = vmatmul.mubr.msk.bf16.vlgmr.msra.gmra.mxu1 %vm453_vm1, %v559_v43 }
 0x100   : > { %1174 = vmatpush3.bf16.msra.mxu1 %v1251_v44  ;;  %1177 = vmatprep.mubr.msk.bf16.mxu1 %vm1298_vm0, %v1297_v2 }
 0x101   : > { %1175 = vmatprep.subr.bf16.mxu1 %v1297_v2 }
 0x102   : > { %770 = vrot.lane.b32.xlu0 %v559_v43, %s1301_s12 }
 0x104   : > { %1176 = vmatpush3.bf16.msra.mxu1 %v1253_v45 }
 0x105   : > { %1181 = vmatprep.subr.bf16.mxu1 %v1297_v2 }
 0x170   : > { %v875_v47 = vpop.permute.xlu1 %874  ;;  %v667_v48 = vpop.permute.xlu0 %666 }
 0x171   : > { %1178 = vmatmul.mubr.msk.bf16.vlgmr.msra.gmra.mxu1 %vm453_vm1, %v667_v48  ;;  %1194 = vmatmul.mubr.msk.bf16.vlgmr.msra.gmra.mxu0 %vm453_vm1, %v875_v47 }
 0x172   : > { %1182 = vmatpush3.bf16.msra.mxu1 %v1255_v46  ;;  %1185 = vmatprep.mubr.msk.bf16.mxu1 %vm1298_vm0, %v1297_v2 }
 0x173   : > { %1183 = vmatprep.subr.bf16.mxu1 %v1297_v2 }
 0x174   : > { %v771_v50 = vpop.permute.xlu0 %770 }
 0x176   : > { %1184 = vmatpush3.bf16.msra.mxu1 %v1256_v49 }
 0x179   : > { %1186 = vmatmul.mubr.msk.bf16.vlgmr.msra.gmra.mxu1 %vm453_vm1, %v771_v50 }
 0x1bf   : > { %v620_v52 = vpop.f32.mrf.mxu1 }
 0x1c0   : > { %v621_v53 = vadd.f32 %v1086_v51, %v620_v52 }
 0x1c1   : > { %v1171_v54 = vpop.f32.mrf.mxu1 }
 0x1c2   : > { %1257 = vrsqrt.f32 %v621_v53  ;;  %vm629_vm2 = vcmp.eq.f32.partialorder %v621_v53, inf  ;;  %v632_v60 = vand.u32 2147483648, %v621_v53  ;;  %vm631_vm3 = vcmp.eq.f32.partialorder %v621_v53, 0.0 }
 0x1c3   : > { %v623_v55 = vpop.f32.mrf.mxu1 }
 0x1c4   : > { %v624_v56 = vadd.f32 %v1086_v51, %v623_v55 }
 0x1c5   : > { %v1172_v57 = vpop.f32.mrf.mxu1 }
 0x1c6   : > { %1259 = vrsqrt.f32 %v624_v56  ;;  %vm636_vm4 = vcmp.eq.f32.partialorder %v624_v56, inf  ;;  %v639_v2 = vand.u32 2147483648, %v624_v56  ;;  %vm638_vm6 = vcmp.eq.f32.partialorder %v624_v56, 0.0 }
 0x1cf   : > { %v1258_v58 = vpop.eup %1257 }
 0x1d0   : > { %v628_v59 = vmul.f32 %v1258_v58, %v621_v53 }
 0x1d2   : > { %v630_v61 = vsel %vm629_vm2, %v621_v53, %v628_v59 }
 0x1d3   : > { %v1260_v62 = vpop.eup %1259  ;;  %v633_v63 = vsel %vm631_vm3, %v632_v60, %v630_v61  ;;  %vm756_vm3 = vcmask 519424  }
 0x1d4   : > { %v641_v0 = vmul.f32 %v633_v63, %v1439_v38  ;;  %v635_v1 = vmul.f32 %v1260_v62, %v624_v56 }
 0x1d6   : > { %v1112_v3 = vpack.c.bf16 %v641_v0, %v641_v0  ;;  %v637_v4 = vsel %vm636_vm4, %v624_v56, %v635_v1  ;;  %vm860_vm4 = vcmask 781824  }
 0x1d7   : > { %v640_v5 = vsel %vm638_vm6, %v639_v2, %v637_v4 }
 0x1d8   : > { %v642_v6 = vmul.f32 %v640_v5, %v1441_v40  ;;  %652 = vst.msk [vmem:[%s1481_s25] sm:$0xf] %vm651_vm5, %v1112_v3 }
 0x1da   : > { %v1113_v7 = vpack.c.bf16 %v642_v6, %v642_v6 }
 0x1dc   : > { %653 = vst.msk [vmem:[%s1481_s25 + $0x4] sm:$0xf] %vm651_vm5, %v1113_v7  ;;  %vm964_vm5 = vcmask 1044224  }
 0x231   : > { %v717_v8 = vpop.f32.mrf.mxu1  ;;  %v925_v9 = vpop.f32.mrf.mxu0 }
 0x232   : > { %v718_v10 = vadd.f32 %v1086_v51, %v717_v8  ;;  %v926_v15 = vadd.f32 %v1086_v51, %v925_v9 }
 0x233   : > { %v1179_v11 = vpop.f32.mrf.mxu1  ;;  %v1195_v12 = vpop.f32.mrf.mxu0 }
 0x234   : > { %1261 = vrsqrt.f32 %v718_v10  ;;  %vm726_vm7 = vcmp.eq.f32.partialorder %v718_v10, inf  ;;  %v729_v28 = vand.u32 2147483648, %v718_v10  ;;  %vm728_vm8 = vcmp.eq.f32.partialorder %v718_v10, 0.0 }
 0x235   : > { %v720_v13 = vpop.f32.mrf.mxu1  ;;  %v928_v14 = vpop.f32.mrf.mxu0  ;;  %vm934_vm13 = vcmp.eq.f32.partialorder %v926_v15, inf  ;;  %v937_v50 = vand.u32 2147483648, %v926_v15  ;;  %vm936_vm15 = vcmp.eq.f32.partialorder %v926_v15, 0.0 }
 0x236   : > { %v721_v16 = vadd.f32 %v1086_v51, %v720_v13  ;;  %v929_v20 = vadd.f32 %v1086_v51, %v928_v14 }
 0x237   : > { %v1180_v17 = vpop.f32.mrf.mxu1  ;;  %v1196_v18 = vpop.f32.mrf.mxu0 }
 0x238   : > { %1263 = vrsqrt.f32 %v721_v16  ;;  %vm733_vm9 = vcmp.eq.f32.partialorder %v721_v16, inf  ;;  %v736_v34 = vand.u32 2147483648, %v721_v16  ;;  %vm735_vm10 = vcmp.eq.f32.partialorder %v721_v16, 0.0 }
 0x239   : > { %v821_v19 = vpop.f32.mrf.mxu1  ;;  %1265 = vrsqrt.f32 %v926_v15  ;;  %vm941_vm1 = vcmp.eq.f32.partialorder %v929_v20, inf  ;;  %v944_v56 = vand.u32 2147483648, %v929_v20  ;;  %vm943_vm2 = vcmp.eq.f32.partialorder %v929_v20, 0.0 }
 0x23a   : > { %v822_v21 = vadd.f32 %v1086_v51, %v821_v19 }
 0x23b   : > { %v1187_v22 = vpop.f32.mrf.mxu1 }
 0x23c   : > { %1267 = vrsqrt.f32 %v822_v21  ;;  %vm830_vm11 = vcmp.eq.f32.partialorder %v822_v21, inf  ;;  %v833_v43 = vand.u32 2147483648, %v822_v21  ;;  %vm832_vm12 = vcmp.eq.f32.partialorder %v822_v21, 0.0 }
 0x23d   : > { %v824_v23 = vpop.f32.mrf.mxu1  ;;  %1269 = vrsqrt.f32 %v929_v20 }
 0x23e   : > { %v825_v24 = vadd.f32 %v1086_v51, %v824_v23 }
 0x23f   : > { %v1188_v25 = vpop.f32.mrf.mxu1 }
 0x240   : > { %1271 = vrsqrt.f32 %v825_v24  ;;  %vm837_vm14 = vcmp.eq.f32.partialorder %v825_v24, inf  ;;  %v840_v51 = vand.u32 2147483648, %v825_v24  ;;  %vm839_vm0 = vcmp.eq.f32.partialorder %v825_v24, 0.0 }
 0x241   : > { %v1262_v26 = vpop.eup %1261 }
 0x242   : > { %v725_v27 = vmul.f32 %v1262_v26, %v718_v10 }
 0x244   : > { %v727_v29 = vsel %vm726_vm7, %v718_v10, %v725_v27 }
 0x245   : > { %v1264_v30 = vpop.eup %1263  ;;  %v730_v31 = vsel %vm728_vm8, %v729_v28, %v727_v29 }
 0x246   : > { %740 = vrot.lane.b32.xlu1 %v730_v31, %s1299_s8  ;;  %v732_v32 = vmul.f32 %v1264_v30, %v721_v16  ;;  %v1266_v33 = vpop.eup %1265 }
 0x247   : > { %v933_v41 = vmul.f32 %v1266_v33, %v926_v15 }
 0x248   : > { %v734_v35 = vsel %vm733_vm9, %v721_v16, %v732_v32 }
 0x249   : > { %v1268_v36 = vpop.eup %1267  ;;  %v737_v37 = vsel %vm735_vm10, %v736_v34, %v734_v35  ;;  %v935_v47 = vsel %vm934_vm13, %v926_v15, %v933_v41 }
 0x24a   : > { %742 = vrot.lane.b32.xlu0 %v737_v37, %s1299_s8  ;;  %v829_v39 = vmul.f32 %v1268_v36, %v822_v21  ;;  %v1270_v42 = vpop.eup %1269  ;;  %v938_v53 = vsel %vm936_vm15, %v937_v50, %v935_v47 }
 0x24b   : > { %v940_v49 = vmul.f32 %v1270_v42, %v929_v20 }
 0x24c   : > { %v831_v44 = vsel %vm830_vm11, %v822_v21, %v829_v39 }
 0x24d   : > { %v1272_v45 = vpop.eup %1271  ;;  %v834_v46 = vsel %vm832_vm12, %v833_v43, %v831_v44  ;;  %v942_v55 = vsel %vm941_vm1, %v929_v20, %v940_v49 }
 0x24e   : > { %844 = vrot.lane.b32.xlu1 %v834_v46, %s1301_s12  ;;  %v836_v48 = vmul.f32 %v1272_v45, %v825_v24  ;;  %v945_v57 = vsel %vm943_vm2, %v944_v56, %v942_v55 }
 0x250   : > { %v838_v52 = vsel %vm837_vm14, %v825_v24, %v836_v48 }
 0x251   : > { %v841_v54 = vsel %vm839_vm0, %v840_v51, %v838_v52 }
 0x252   : > { %948 = vrot.lane.b32.xlu1 %v938_v53, %s1300_s9  ;;  %846 = vrot.lane.b32.xlu0 %v841_v54, %s1301_s12 }
 0x256   : > { %950 = vrot.lane.b32.xlu0 %v945_v57, %s1300_s9 }
 0x2b8   : > { %v741_v58 = vpop.permute.xlu1 %740 }
 0x2b9   : > { %v746_v59 = vmul.f32 %v741_v58, %v1439_v38 }
 0x2bb   : > { %v1114_v60 = vpack.c.bf16 %v746_v59, %v746_v59 }
 0x2bc   : > { %v743_v61 = vpop.permute.xlu0 %742 }
 0x2bd   : > { %757 = vst.msk [vmem:[%s1481_s25] sm:$0xf] %vm756_vm3, %v1114_v60  ;;  %v747_v62 = vmul.f32 %v743_v61, %v1441_v40 }
 0x2bf   : > { %v1115_v63 = vpack.c.bf16 %v747_v62, %v747_v62 }
 0x2c0   : > { %v845_v0 = vpop.permute.xlu1 %844 }
 0x2c1   : > { %758 = vst.msk [vmem:[%s1481_s25 + $0x4] sm:$0xf] %vm756_vm3, %v1115_v63  ;;  %v850_v1 = vmul.f32 %v845_v0, %v1439_v38 }
 0x2c3   : > { %v1116_v2 = vpack.c.bf16 %v850_v1, %v850_v1 }
 0x2c4   : > { %v949_v3 = vpop.permute.xlu1 %948  ;;  %v847_v4 = vpop.permute.xlu0 %846 }
 0x2c5   : > { %861 = vst.msk [vmem:[%s1481_s25] sm:$0xf] %vm860_vm4, %v1116_v2  ;;  %v954_v5 = vmul.f32 %v949_v3, %v1439_v38  ;;  %v851_v6 = vmul.f32 %v847_v4, %v1441_v40 }
 0x2c7   : > { %v1118_v7 = vpack.c.bf16 %v954_v5, %v954_v5  ;;  %v1117_v8 = vpack.c.bf16 %v851_v6, %v851_v6 }
 0x2c8   : > { %v951_v9 = vpop.permute.xlu0 %950 }
 0x2c9   : > { %862 = vst.msk [vmem:[%s1481_s25 + $0x4] sm:$0xf] %vm860_vm4, %v1117_v8  ;;  %v955_v10 = vmul.f32 %v951_v9, %v1441_v40 }
 0x2ca   : > { %965 = vst.msk [vmem:[%s1481_s25] sm:$0xf] %vm964_vm5, %v1118_v7 }
 0x2cb   : > { %v1119_v11 = vpack.c.bf16 %v955_v10, %v955_v10 }
 0x2cd   : > { %966 = vst.msk [vmem:[%s1481_s25 + $0x4] sm:$0xf] %vm964_vm5, %v1119_v11 }
 0x2ce PF: > { %s15_s20 = sadd.s32 1, %s1295_s20   ;;  %s1519_s18 = smov %s1291_s19 }
 0x2cf   : > { %p12_p5 = scmp.ge.s32.totalorder %s15_s20, 4   ;;  %s1520_s19 = smov %s1522_s21 }
 0x2d1   :  { %14 = sbr.rel (!%p12_p5) target bundleno = 2 (0x2), region = 81 }

// kernel: tile.28
= control target key start
LH: loop header
LB: loop body
LE: loop exit
PB: predicated region body
PF: predicated region fallthrough
CT: control target
= control target key end

     0   :  { %s28_s0 = inlined_call_operand.vmem [shape: f32[3], index: 0, kind: input, shape index: {}]   ;;  %s29_s1 = inlined_call_operand.vmem [shape: f32[16,3], index: 1, kind: output, shape index: {}]  }
   0x1   :  { %v4_v0 = vld [vmem:[%s28_s0] ss:$0 sm:$0xff] }
   0x2   :  { %5 = vst [vmem:[%s29_s1] sm:$0xff] %v4_v0  ;;  %8 = vst [vmem:[%s29_s1 + $0x8] sm:$0xff] %v4_v0 }

// kernel: tile.29
= control target key start
LH: loop header
LB: loop body
LE: loop exit
PB: predicated region body
PF: predicated region fallthrough
CT: control target
= control target key end

     0   :  { %s133_s10 = smov 45   ;;  %s134_s11 = smov 39   ;;  %vm3_vm0 = vcmask 23552   ;;  %vm9_vm1 = vcmask 392552   ;;  %vm15_vm2 = vcmask 367952   ;;  %vm21_vm3 = vcmask 343352   ;;  %s209_s0 = inlined_call_operand.vmem [shape: f32[16,3], index: 0, kind: input, shape index: {}]   ;;  %s210_s1 = inlined_call_operand.vmem [shape: f32[48], index: 1, kind: output, shape index: {}]  }
   0x1   :  { %v103_v0 = vld [vmem:[%s209_s0 + $0xf] sm:$0x1]   ;;  %v105_v1 = vld [vmem:[%s209_s0 + $0xd] sm:$0x1]   ;;  %v104_v2 = vld [vmem:[%s209_s0 + $0xe] sm:$0x1]  }
   0x2   :  { %7 = vrot.lane.b32.xlu0 %v103_v0, %s133_s10  ;;  %19 = vrot.lane.b32.xlu1 %v105_v1, %s134_s11  ;;  %v106_v3 = vld [vmem:[%s209_s0 + $0xc] sm:$0x1]   ;;  %s135_s16 = smov 42   ;;  %s136_s17 = smov 36   ;;  %v107_v4 = vld [vmem:[%s209_s0 + $0xb] sm:$0x1]  }
   0x3   :  { %v108_v5 = vld [vmem:[%s209_s0 + $0xa] sm:$0x1]   ;;  %v2_v6 = vld [vmem:[%s209_s0] sm:$0x1]   ;;  %s137_s24 = smov 33   ;;  %s138_s25 = smov 30  }
   0x4   :  { %4 = vst.msk [vmem:[#allocation0] sm:$0x1] %vm3_vm0, %v2_v6   ;;  %v109_v7 = vld [vmem:[%s209_s0 + $0x9] sm:$0x1]   ;;  %v110_v8 = vld [vmem:[%s209_s0 + $0x8] sm:$0x1]  }
   0x5   :  { %s139_s30 = smov 27   ;;  %s140_s2 = smov 24   ;;  %v111_v9 = vld [vmem:[%s209_s0 + $0x7] sm:$0x1]   ;;  %v112_v10 = vld [vmem:[%s209_s0 + $0x6] sm:$0x1]  }
   0x6   :  { %13 = vrot.lane.b32.xlu0 %v104_v2, %s135_s16  ;;  %25 = vrot.lane.b32.xlu1 %v106_v3, %s136_s17  ;;  %s141_s7 = smov 21   ;;  %s142_s8 = smov 18   ;;  %v113_v11 = vld [vmem:[%s209_s0 + $0x5] sm:$0x1]   ;;  %v114_v12 = vld [vmem:[%s209_s0 + $0x4] sm:$0x1]  }
   0x7   :  { %s143_s13 = smov 15   ;;  %s144_s14 = smov 12   ;;  %v115_v13 = vld [vmem:[%s209_s0 + $0x3] sm:$0x1]   ;;  %v116_v14 = vld [vmem:[%s209_s0 + $0x2] sm:$0x1]  }
   0x8   :  { %s145_s19 = smov 9   ;;  %s146_s20 = smov 6   ;;  %v117_v15 = vld [vmem:[%s209_s0 + $0x1] sm:$0x1]   ;;  %vm27_vm4 = vcmask 318752   ;;  %vm33_vm5 = vcmask 294152  }
   0x9   :  { %s147_s0 = smov 3   ;;  %vm39_vm6 = vcmask 269552   ;;  %vm45_vm7 = vcmask 244952   ;;  %vm51_vm8 = vcmask 220352   ;;  %vm57_vm9 = vcmask 195752  }
   0xa   :  { %31 = vrot.lane.b32.xlu0 %v107_v4, %s137_s24  ;;  %37 = vrot.lane.b32.xlu1 %v108_v5, %s138_s25  ;;  %vm63_vm10 = vcmask 171152   ;;  %vm69_vm11 = vcmask 146552   ;;  %vm75_vm12 = vcmask 121952   ;;  %vm81_vm13 = vcmask 97352  }
   0xb   :  { %vm87_vm14 = vcmask 72752   ;;  %vm93_vm15 = vcmask 48152  }
   0xe   :  { %43 = vrot.lane.b32.xlu0 %v109_v7, %s139_s30  ;;  %49 = vrot.lane.b32.xlu1 %v110_v8, %s140_s2 }
  0x12   :  { %55 = vrot.lane.b32.xlu0 %v111_v9, %s141_s7  ;;  %61 = vrot.lane.b32.xlu1 %v112_v10, %s142_s8 }
  0x16   :  { %67 = vrot.lane.b32.xlu0 %v113_v11, %s143_s13  ;;  %73 = vrot.lane.b32.xlu1 %v114_v12, %s144_s14 }
  0x1a   :  { %79 = vrot.lane.b32.xlu0 %v115_v13, %s145_s19  ;;  %85 = vrot.lane.b32.xlu1 %v116_v14, %s146_s20 }
  0x1e   :  { %91 = vrot.lane.b32.xlu0 %v117_v15, %s147_s0 }
  0x74   :  { %v8_v16 = vpop.permute.xlu0 %7   ;;  %v20_v17 = vpop.permute.xlu1 %19  }
  0x75   :  { %10 = vst.msk [vmem:[#allocation0] sm:$0x1] %vm9_vm1, %v8_v16  }
  0x78   :  { %v14_v18 = vpop.permute.xlu0 %13   ;;  %v26_v19 = vpop.permute.xlu1 %25  }
  0x79   :  { %16 = vst.msk [vmem:[#allocation0] sm:$0x1] %vm15_vm2, %v14_v18  }
  0x7a   :  { %22 = vst.msk [vmem:[#allocation0] sm:$0x1] %vm21_vm3, %v20_v17  }
  0x7b   :  { %28 = vst.msk [vmem:[#allocation0] sm:$0x1] %vm27_vm4, %v26_v19  }
  0x7c   :  { %v32_v20 = vpop.permute.xlu0 %31   ;;  %v38_v21 = vpop.permute.xlu1 %37  }
  0x7d   :  { %34 = vst.msk [vmem:[#allocation0] sm:$0x1] %vm33_vm5, %v32_v20  }
  0x7e   :  { %40 = vst.msk [vmem:[#allocation0] sm:$0x1] %vm39_vm6, %v38_v21  }
  0x80   :  { %v44_v22 = vpop.permute.xlu0 %43   ;;  %v50_v23 = vpop.permute.xlu1 %49  }
  0x81   :  { %46 = vst.msk [vmem:[#allocation0] sm:$0x1] %vm45_vm7, %v44_v22  }
  0x82   :  { %52 = vst.msk [vmem:[#allocation0] sm:$0x1] %vm51_vm8, %v50_v23  }
  0x84   :  { %v56_v24 = vpop.permute.xlu0 %55   ;;  %v62_v25 = vpop.permute.xlu1 %61  }
  0x85   :  { %58 = vst.msk [vmem:[#allocation0] sm:$0x1] %vm57_vm9, %v56_v24  }
  0x86   :  { %64 = vst.msk [vmem:[#allocation0] sm:$0x1] %vm63_vm10, %v62_v25  }
  0x88   :  { %v68_v26 = vpop.permute.xlu0 %67   ;;  %v74_v27 = vpop.permute.xlu1 %73  }
  0x89   :  { %70 = vst.msk [vmem:[#allocation0] sm:$0x1] %vm69_vm11, %v68_v26  }
  0x8a   :  { %76 = vst.msk [vmem:[#allocation0] sm:$0x1] %vm75_vm12, %v74_v27  }
  0x8c   :  { %v80_v28 = vpop.permute.xlu0 %79   ;;  %v86_v29 = vpop.permute.xlu1 %85  }
  0x8d   :  { %82 = vst.msk [vmem:[#allocation0] sm:$0x1] %vm81_vm13, %v80_v28  }
  0x8e   :  { %88 = vst.msk [vmem:[#allocation0] sm:$0x1] %vm87_vm14, %v86_v29  }
  0x90   :  { %v92_v30 = vpop.permute.xlu0 %91  }
  0x91   :  { %94 = vst.msk [vmem:[#allocation0] sm:$0x1] %vm93_vm15, %v92_v30  }
  0x98   :  { %v99_v31 = vld [vmem:[#allocation0] sm:$0x1] }
  0x99   :  { %102 = vst [vmem:[%s210_s1] sm:$0x1] %v99_v31 }

// kernel: _lambda_.11
= control target key start
LH: loop header
LB: loop body
LE: loop exit
PB: predicated region body
PF: predicated region fallthrough
CT: control target
= control target key end

     0   :  { %s987_s12 = smov 0   ;;  %s989_s13 = smov 0   ;;  %s1109_s0 = inlined_call_operand.vmem [shape: bf16[128,288], index: 0, kind: input, shape index: {}]   ;;  %s1110_s1 = inlined_call_operand.vmem [shape: bf16[288,128], index: 1, kind: input, shape index: {}]   ;;  %s1111_s2 = inlined_call_operand.vmem [shape: f32[1,128], index: 2, kind: input, shape index: {}]   ;;  %s1112_s3 = inlined_call_operand.vmem [shape: f32[128,128], index: 3, kind: output, shape index: {}]  }
   0x1   :  { %s991_s14 = smov 0  }
   0x2 LB: > { %s25_s15 = sadd.s32 1, %s961_s13  ;;  %p768_p0 = scmp.ge.s32.totalorder %s965_s14, 1  ;;  %s965_s14 = sphi %s991_s14, %s13_s14   ;;  %s961_s13 = sphi %s989_s13, %s1114_s13   ;;  %s957_s12 = sphi %s987_s12, %s1113_s12  }
   0x3   : > { %p27_p1 = scmp.ge.s32.totalorder %s25_s15, 2  ;;  %p169_p2 = scmp.lt.s32.totalorder %s965_s14, 3 }
   0x5   : > { %s1116_s15 = smov (%p27_p1, %s25_s15), 0  ;;  %p170_p3 = pnand %p768_p0, %p169_p2 }
   0x6   : > { %s769_s18 = sshll.u32 (!%p170_p3), %s957_s12, 3 }
   0x7   : > { %173 = sbr.rel (%p170_p3) target bundleno = 271 (0x10f), region = 32  ;;  %p205_p4 = scmp.lt.s32.totalorder (!%p170_p3), %s769_s18, 15 }
   0xc   : > { %v909_v0 = vld [vmem:[%s1110_s1 + $0x78] sm:$0xff]   ;;  %v911_v2 = vld [vmem:[%s1110_s1 + $0x70] sm:$0xff]   ;;  %v913_v4 = vld [vmem:[%s1110_s1 + $0x68] sm:$0xff]   ;;  %s1118_s18 = smov (!%p205_p4, %s769_s18), 15  ;;  %vm468_vm0 = vcmask 261120  }
   0xd   : > { %v910_v1 = vld [vmem:[%s1110_s1 + $0x38] sm:$0xff]   ;;  %810 = vmatprep.subr.bf16.mxu0 %v909_v0  ;;  %868 = vmatprep.subr.bf16.mxu1 %v909_v0  ;;  %v912_v3 = vld [vmem:[%s1110_s1 + $0x30] sm:$0xff]   ;;  %v914_v5 = vld [vmem:[%s1110_s1 + $0x28] sm:$0xff]   ;;  %s884_s4 = smul.u32 12, %s1118_s18  ;;  %s772_s9 = sshll.u32 %s1118_s18, 3 }
   0xe   : > { %811 = vmatpush3.bf16.msra.mxu0 %v910_v1  ;;  %876 = vmatpush3.bf16.msra.mxu1 %v910_v1  ;;  %v915_v6 = vld [vmem:[%s1110_s1 + $0x60] sm:$0xff]   ;;  %v917_v8 = vld [vmem:[%s1110_s1 + $0x58] sm:$0xff]   ;;  %v919_v10 = vld [vmem:[%s1110_s1 + $0x50] sm:$0xff]   ;;  %s1090_s12 = scalar_lea.vmem %s1112_s3, %s772_s9 }
   0xf   : > { %812 = vmatprep.subr.bf16.mxu0 %v911_v2  ;;  %869 = vmatprep.subr.bf16.mxu1 %v911_v2  ;;  %v916_v7 = vld [vmem:[%s1110_s1 + $0x20] sm:$0xff]   ;;  %s1038_s11 = scalar_lea.vmem %s1109_s0, %s884_s4  ;;  %v918_v9 = vld [vmem:[%s1110_s1 + $0x18] sm:$0xff]   ;;  %v920_v13 = vld [vmem:[%s1110_s1 + $0x10] sm:$0xff]  }
  0x10   : > { %v927_v11 = vld [vmem:[%s1038_s11 + $0x4] ss:$12 sps:$4 sm:$0xff]   ;;  %v930_v12 = vld [vmem:[%s1038_s11 + $0x4c] ss:$12 sps:$4 sm:$0xff]   ;;  %v928_v20 = vld [vmem:[%s1038_s11 + $0x48] ss:$12 sps:$4 sm:$0xff]  }
  0x11   : > { %v921_v14 = vld [vmem:[%s1110_s1 + $0x48] sm:$0xff]   ;;  %513 = vmatprep.mubr.bf16.mxu0 %v927_v11  ;;  %537 = vmatprep.mubr.bf16.mxu1 %v930_v12  ;;  %v923_v16 = vld [vmem:[%s1110_s1 + $0x40] sm:$0xff]   ;;  %v941_v28 = vld [vmem:[%s1038_s11 + $0x30] ss:$12 sps:$4 sm:$0xff]  }
  0x12   : > { %813 = vmatpush3.bf16.msra.mxu0 %v912_v3  ;;  %877 = vmatpush3.bf16.msra.mxu1 %v912_v3  ;;  %v922_v15 = vld [vmem:[%s1110_s1 + $0x8] sm:$0xff]   ;;  %v924_v17 = vld [vmem:[%s1110_s1] sm:$0xff]   ;;  %v942_v29 = vld [vmem:[%s1038_s11 + $0x50] ss:$12 sps:$4 sm:$0xff]  }
  0x13   : > { %814 = vmatprep.subr.bf16.mxu0 %v913_v4  ;;  %870 = vmatprep.subr.bf16.mxu1 %v913_v4  ;;  %v931_v18 = vld [vmem:[%s1110_s1 + $0x88] sm:$0xff]   ;;  %v932_v22 = vld [vmem:[%s1110_s1 + $0x80] sm:$0xff]  }
  0x14   : > { %v925_v19 = vld [vmem:[%s1038_s11] ss:$12 sps:$4 sm:$0xff]   ;;  %v933_v21 = vld [vmem:[%s1038_s11 + $0x1c] ss:$12 sps:$4 sm:$0xff]   ;;  %v936_v24 = vld [vmem:[%s1038_s11 + $0x18] ss:$12 sps:$4 sm:$0xff]  }
  0x15   : > { %v935_v23 = vld [vmem:[%s1038_s11 + $0x8] ss:$12 sps:$4 sm:$0xff]   ;;  %v937_v25 = vld [vmem:[%s1038_s11 + $0x20] ss:$12 sps:$4 sm:$0xff]   ;;  %v940_v27 = vld [vmem:[%s1038_s11 + $0x38] ss:$12 sps:$4 sm:$0xff]  }
  0x16   : > { %815 = vmatpush3.bf16.msra.mxu0 %v914_v5  ;;  %878 = vmatpush3.bf16.msra.mxu1 %v914_v5  ;;  %v938_v26 = vld [vmem:[%s1038_s11 + $0x34] ss:$12 sps:$4 sm:$0xff]  }
  0x17   : > { %816 = vmatprep.subr.bf16.mxu0 %v915_v6  ;;  %871 = vmatprep.subr.bf16.mxu1 %v915_v6  ;;  %v807_v42 = vld [vmem:[%s1111_s2] ss:$0 sm:$0xff] }
  0x1a   : > { %817 = vmatpush3.bf16.msra.mxu0 %v916_v7  ;;  %879 = vmatpush3.bf16.msra.mxu1 %v916_v7 }
  0x1b   : > { %818 = vmatprep.subr.bf16.mxu0 %v917_v8  ;;  %872 = vmatprep.subr.bf16.mxu1 %v917_v8 }
  0x1e   : > { %819 = vmatpush3.bf16.msra.mxu0 %v918_v9  ;;  %880 = vmatpush3.bf16.msra.mxu1 %v918_v9 }
  0x1f   : > { %820 = vmatprep.subr.bf16.mxu0 %v919_v10  ;;  %873 = vmatprep.subr.bf16.mxu1 %v919_v10 }
  0x22   : > { %821 = vmatpush3.bf16.msra.mxu0 %v920_v13  ;;  %881 = vmatpush3.bf16.msra.mxu1 %v920_v13 }
  0x23   : > { %822 = vmatprep.subr.bf16.mxu0 %v921_v14  ;;  %874 = vmatprep.subr.bf16.mxu1 %v921_v14 }
  0x26   : > { %823 = vmatpush3.bf16.msra.mxu0 %v922_v15  ;;  %882 = vmatpush3.bf16.msra.mxu1 %v922_v15 }
  0x27   : > { %824 = vmatprep.subr.bf16.mxu0 %v923_v16  ;;  %875 = vmatprep.subr.bf16.mxu1 %v923_v16 }
  0x2a   : > { %825 = vmatpush3.bf16.msra.mxu0 %v924_v17  ;;  %883 = vmatpush3.bf16.msra.mxu1 %v924_v17 }
  0x2b   : > { %856 = vmatprep.subr.bf16.mxu1 %v931_v18 }
  0x2d   : > { %514 = vmatmul.mubr.bf16.vlgmr.msra.gmra.mxu0 %v925_v19  ;;  %538 = vmatmul.mubr.bf16.vlgmr.msra.gmra.mxu1 %v928_v20 }
  0x2e   : > { %857 = vmatpush3.bf16.msra.mxu1 %v931_v18  ;;  %521 = vmatprep.mubr.bf16.mxu0 %v933_v21 }
  0x2f   : > { %858 = vmatprep.subr.bf16.mxu1 %v932_v22  ;;  %860 = vmatprep.mubr.msk.bf16.mxu1 %vm468_vm0, %v935_v23 }
  0x32   : > { %859 = vmatpush3.bf16.msra.mxu1 %v932_v22 }
  0x35   : > { %522 = vmatmul.mubr.bf16.gmra.mxu0 %v936_v24  ;;  %861 = vmatmul.mubr.msk.bf16.vlgmr.msra.gmra.mxu1 %vm468_vm0, %v937_v25 }
  0x36   : > { %529 = vmatprep.mubr.bf16.mxu0 %v938_v26  ;;  %864 = vmatprep.mubr.msk.bf16.mxu1 %vm468_vm0, %v940_v27 }
  0x3d   : > { %530 = vmatmul.mubr.bf16.gmra.mxu0 %v941_v28  ;;  %865 = vmatmul.mubr.msk.bf16.gmra.mxu1 %vm468_vm0, %v942_v29 }
  0xed   : > { %v826_v30 = vpop.f32.mrf.mxu0  ;;  %v844_v31 = vpop.f32.mrf.mxu1 }
  0xef   : > { %v827_v32 = vpop.f32.mrf.mxu0  ;;  %v845_v33 = vpop.f32.mrf.mxu1 }
  0xf0   : > { %v828_v40 = vadd.f32 %v827_v32, %v826_v30  ;;  %v846_v57 = vadd.f32 %v845_v33, %v844_v31 }
  0xf1   : > { %v829_v34 = vpop.f32.mrf.mxu0  ;;  %v847_v35 = vpop.f32.mrf.mxu1 }
  0xf3   : > { %v830_v36 = vpop.f32.mrf.mxu0  ;;  %v848_v37 = vpop.f32.mrf.mxu1 }
  0xf4   : > { %v831_v48 = vadd.f32 %v830_v36, %v829_v34  ;;  %v849_v0 = vadd.f32 %v848_v37, %v847_v35 }
  0xf5   : > { %v832_v38 = vpop.f32.mrf.mxu0  ;;  %v862_v39 = vpop.f32.mrf.mxu1 }
  0xf7   : > { %v833_v41 = vpop.f32.mrf.mxu0  ;;  %v580_v43 = vpop.f32.mrf.mxu1 }
  0xf8   : > { %v834_v44 = vadd.f32 %v833_v41, %v832_v38  ;;  %v581_v45 = vadd.f32 %v828_v40, %v580_v43 }
  0xf9   : > { %v835_v46 = vpop.f32.mrf.mxu0  ;;  %v863_v47 = vpop.f32.mrf.mxu1 }
  0xfa   : > { %v589_v49 = vadd.f32 %v862_v39, %v834_v44  ;;  %v645_v50 = vadd.f32 %v807_v42, %v581_v45 }
  0xfb   : > { %v836_v51 = vpop.f32.mrf.mxu0  ;;  %v583_v52 = vpop.f32.mrf.mxu1 }
  0xfc   : > { %v647_v53 = vadd.f32 %v807_v42, %v589_v49  ;;  %v653_v54 = vmax.f32 %v645_v50, 0.0  ;;  %v837_v55 = vadd.f32 %v836_v51, %v835_v46  ;;  %v584_v56 = vadd.f32 %v831_v48, %v583_v52 }
  0xfd   : > { %v838_v58 = vpop.f32.mrf.mxu0  ;;  %v866_v59 = vpop.f32.mrf.mxu1 }
  0xfe   : > { %v655_v60 = vmax.f32 %v647_v53, 0.0  ;;  %v661_v61 = vmin.f32 %v653_v54, 1.0  ;;  %v592_v62 = vadd.f32 %v863_v47, %v837_v55  ;;  %v646_v63 = vadd.f32 %v807_v42, %v584_v56 }
  0xff   : > { %v605_v1 = vadd.f32 %v866_v59, %v846_v57  ;;  %v839_v2 = vpop.f32.mrf.mxu0  ;;  %v596_v3 = vpop.f32.mrf.mxu1 }
 0x100   : > { %v663_v4 = vmin.f32 %v655_v60, 1.0  ;;  %669 = vst [vmem:[%s1090_s12] sm:$0xff] %v661_v61  ;;  %v648_v5 = vadd.f32 %v807_v42, %v592_v62  ;;  %v654_v6 = vmax.f32 %v646_v63, 0.0  ;;  %v840_v7 = vadd.f32 %v839_v2, %v838_v58 }
 0x101   : > { %v651_v8 = vadd.f32 %v807_v42, %v605_v1  ;;  %v841_v9 = vpop.f32.mrf.mxu0  ;;  %v867_v10 = vpop.f32.mrf.mxu1 }
 0x102   : > { %671 = vst [vmem:[%s1090_s12 + $0x10] sm:$0xff] %v663_v4  ;;  %v656_v11 = vmax.f32 %v648_v5, 0.0  ;;  %v662_v12 = vmin.f32 %v654_v6, 1.0  ;;  %v597_v13 = vadd.f32 %v840_v7, %v596_v3  ;;  %v608_v14 = vadd.f32 %v867_v10, %v849_v0 }
 0x103   : > { %v659_v15 = vmax.f32 %v651_v8, 0.0  ;;  %v842_v16 = vpop.f32.mrf.mxu0  ;;  %v599_v22 = vpop.f32.mrf.mxu1 }
 0x104   : > { %v664_v17 = vmin.f32 %v656_v11, 1.0  ;;  %670 = vst [vmem:[%s1090_s12 + $0x8] sm:$0xff] %v662_v12  ;;  %v649_v18 = vadd.f32 %v807_v42, %v597_v13  ;;  %v652_v19 = vadd.f32 %v807_v42, %v608_v14  ;;  %v843_v20 = vadd.f32 %v842_v16, %v841_v9 }
 0x105   : > { %v667_v21 = vmin.f32 %v659_v15, 1.0 }
 0x106   : > { %672 = vst [vmem:[%s1090_s12 + $0x18] sm:$0xff] %v664_v17  ;;  %v657_v23 = vmax.f32 %v649_v18, 0.0  ;;  %v660_v24 = vmax.f32 %v652_v19, 0.0  ;;  %v600_v25 = vadd.f32 %v843_v20, %v599_v22 }
 0x107   : > { %675 = vst [vmem:[%s1090_s12 + $0x30] sm:$0xff] %v667_v21 }
 0x108   : > { %v665_v26 = vmin.f32 %v657_v23, 1.0  ;;  %v668_v27 = vmin.f32 %v660_v24, 1.0  ;;  %v650_v28 = vadd.f32 %v807_v42, %v600_v25 }
 0x10a   : > { %673 = vst [vmem:[%s1090_s12 + $0x20] sm:$0xff] %v665_v26  ;;  %676 = vst [vmem:[%s1090_s12 + $0x38] sm:$0xff] %v668_v27  ;;  %v658_v29 = vmax.f32 %v650_v28, 0.0 }
 0x10c   : > { %v666_v30 = vmin.f32 %v658_v29, 1.0 }
 0x10e   : > { %674 = vst [vmem:[%s1090_s12 + $0x28] sm:$0xff] %v666_v30 }
 0x10f PF: > { %s13_s14 = sadd.s32 1, %s965_s14   ;;  %s1113_s12 = smov %s961_s13 }
 0x110   : > { %p10_p5 = scmp.ge.s32.totalorder %s13_s14, 4   ;;  %s1114_s13 = smov %s1116_s15 }
 0x112   :  { %12 = sbr.rel (!%p10_p5) target bundleno = 2 (0x2), region = 73 }

</bundles_post_ra>
